<compile_context>
chip_gen: v6e
topology: v6e:2x2x1
jax: 0.10.0
libtpu: 0.0.40
codegen_flags: <defaults>
</compile_context>

<pallas_src>
import functools

import jax
import jax.numpy as jnp
from jax.experimental import pallas as pl
from jax.experimental.pallas import tpu as pltpu

HP = 128  # per-gate padded lane width: each GRU gate occupies its own 128-lane tile


# ----------------------------------------------------------------------------- kernel
def _rrnn_kernel(flags_ref,                  # SMEM (Tdec,) f32 coin flips
                 xf_ref, yf_ref,             # VMEM (Tin*B, Din), (Tdec*B, Din) time-major
                 enc_wi_ref, enc_wh_ref, enc_bi_ref, enc_bhn_ref,
                 dec_wi_ref, dec_wcat_ref, dec_bi_ref, dec_bhn_ref, dec_bf2g_ref,
                 wout_ref, bout_ref,
                 out_ref,                    # VMEM (Tdec*B, 2)
                 hs_ref,                     # VMEM scratch (Tdec*B, HP): decoder hiddens
                 *, B, Tin, Tdec):
    f32 = jnp.float32
    G = 3 * HP

    # Hoisted weight loads / bias broadcasts (JAX does not CSE broadcast_in_dim, so
    # broadcasting inside the unrolled loops would emit it (Tin+Tdec) times).
    enc_wh = enc_wh_ref[...]                                   # (HP, 3HP)
    dec_wcat = dec_wcat_ref[...]                               # (HP, 6HP)
    enc_bhn = jnp.broadcast_to(enc_bhn_ref[...], (B, HP))
    dec_bhn = jnp.broadcast_to(dec_bhn_ref[...], (B, HP))
    bf2g = jnp.broadcast_to(dec_bf2g_ref[...], (B, G))

    def gates(gi, gh, bhn, h):
        # gi/gh: (B, 3HP), per-gate blocks [r | z | n] each tile-aligned at 128 lanes.
        # b_ir+b_hr / b_iz+b_hz are pre-folded into gi; b_hn stays inside the r*() term
        # (PyTorch GRU semantics). Padded lanes of h stay exactly 0 by construction.
        r = jax.nn.sigmoid(gi[:, 0:HP] + gh[:, 0:HP])
        z = jax.nn.sigmoid(gi[:, HP:2 * HP] + gh[:, HP:2 * HP])
        n = jnp.tanh(gi[:, 2 * HP:3 * HP] + r * (gh[:, 2 * HP:3 * HP] + bhn))
        return (1.0 - z) * n + z * h

    # ---------------- encoder ----------------
    # Input projection for ALL Tin steps in a single matmul (no recurrent dependence).
    xf = xf_ref[...]                                                          # (Tin*B, Din)
    gi_all = jnp.dot(xf, enc_wi_ref[...], preferred_element_type=f32) + enc_bi_ref[...]

    h = jnp.zeros((B, HP), f32)      # gate-padded hidden state; lanes [H:HP) remain 0
    for t in range(Tin):             # static unroll; switch to fori_loop if Tin grows
        gi = gi_all[t * B:(t + 1) * B, :]                                     # (B, 3HP)
        gh = jnp.dot(h, enc_wh, preferred_element_type=f32)                   # (B, 3HP)
        h = gates(gi, gh, enc_bhn, h)

    # ---------------- decoder ----------------
    # Ground-truth input projections for all Tdec steps in one matmul; the teacher-
    # forcing select is applied AFTER the (linear) projection, and the fid feedback is
    # folded through W_out, so the only per-step matmul is h @ [W_hh | W_fid2gi].
    yproj_all = (jnp.dot(yf_ref[...], dec_wi_ref[...], preferred_element_type=f32)
                 + dec_bi_ref[...])                                           # (Tdec*B, 3HP)
    x_last = xf[(Tin - 1) * B:Tin * B, :]                                     # (B, Din)
    gi = jnp.dot(x_last, dec_wi_ref[...], preferred_element_type=f32) + dec_bi_ref[...]

    for t in range(Tdec):            # static unroll; switch to fori_loop if Tdec grows
        big = jnp.dot(h, dec_wcat, preferred_element_type=f32)   # (B, 6HP): [gh | fidproj]
        if t > 0:
            f = flags_ref[t - 1]     # 1.0 -> model prediction, 0.0 -> ground truth
            fidproj = big[:, G:2 * G] + bf2g                     # == fid_{t-1} @ W_ih + b_i
            yproj = yproj_all[(t - 1) * B:t * B, :]              # == y[:, t-1] @ W_ih + b_i
            gi = f * fidproj + (1.0 - f) * yproj
        h = gates(gi, big[:, 0:G], dec_bhn, h)
        hs_ref[t * B:(t + 1) * B, :] = h

    # Output projection for all Tdec steps in one trailing matmul (off the serial chain).
    out_ref[...] = (jnp.dot(hs_ref[...], wout_ref[...], preferred_element_type=f32)
                    + bout_ref[...])


# ------------------------------------------------------------------------- wrapper
def _pad_gate_cols(w):
    """(K, 3H) [r|z|n] -> (K, 3*HP): each gate block zero-padded into its own 128-lane tile."""
    K, three_h = w.shape
    H = three_h // 3
    out = jnp.zeros((K, 3, HP), w.dtype).at[:, :, :H].set(w.reshape(K, 3, H))
    return out.reshape(K, 3 * HP)


def _pad_rows(w):
    """(K, N) -> (HP, N) with zero rows appended (matches the lane-padded hidden state)."""
    K, N = w.shape
    return jnp.zeros((HP, N), w.dtype).at[:K, :].set(w)


def _prepare_weights(params):
    H = params["enc_whh_T"].shape[0]

    def fold_bi(bih, bhh):
        # r/z: b_ih + b_hh fold together; n keeps only b_in here (b_hn stays separate).
        b = jnp.concatenate([bih[:, 0:H] + bhh[:, 0:H],
                             bih[:, H:2 * H] + bhh[:, H:2 * H],
                             bih[:, 2 * H:3 * H]], axis=1)
        return _pad_gate_cols(b)

    def pad_bhn(bhh):
        return jnp.zeros((1, HP), bhh.dtype).at[:, :H].set(bhh[:, 2 * H:3 * H])

    enc_wi = _pad_gate_cols(params["enc_wih_T"])                     # (Din, 3HP)
    enc_wh = _pad_rows(_pad_gate_cols(params["enc_whh_T"]))          # (HP, 3HP)
    dec_wi = _pad_gate_cols(params["dec_wih_T"])                     # (Din, 3HP)
    dec_wh = _pad_rows(_pad_gate_cols(params["dec_whh_T"]))          # (HP, 3HP)
    dec_bi = fold_bi(params["dec_bih"], params["dec_bhh"])           # (1, 3HP)

    # fid -> next-step gi feedback folded through the output projection:
    #   fid @ W_ih + b_i = h @ (W_out @ W_ih) + (b_out @ W_ih + b_i)
    w_f2g = _pad_rows(jnp.dot(params["w_out_T"], dec_wi))            # (HP, 3HP)
    b_f2g = jnp.dot(params["b_out"], dec_wi) + dec_bi                # (1, 3HP)

    return dict(
        enc_wi=enc_wi, enc_wh=enc_wh,
        enc_bi=fold_bi(params["enc_bih"], params["enc_bhh"]),
        enc_bhn=pad_bhn(params["enc_bhh"]),
        dec_wi=dec_wi,
        dec_wcat=jnp.concatenate([dec_wh, w_f2g], axis=1),           # (HP, 6HP)
        dec_bi=dec_bi,
        dec_bhn=pad_bhn(params["dec_bhh"]),
        dec_bf2g=b_f2g,
        w_out=_pad_rows(params["w_out_T"]),                          # (HP, 2)
        b_out=params["b_out"],                                       # (1, 2)
    )


def rrnn_forward(x, y, flags, params):
    """x: (B, Tin, Din), y: (B, Tdec, Din), flags: (Tdec,) f32 -> fids (B, Tdec, 2)."""
    B, Tin, Din = x.shape
    Tdec = y.shape[1]
    H = params["enc_whh_T"].shape[0]
    assert Din == 2, "decoder feeds its (B, 2) prediction back as input => Din must be 2"
    assert H <= HP

    w = _prepare_weights(params)

    # Time-major flatten so step t is the contiguous row block [t*B, (t+1)*B).
    x_flat = jnp.transpose(x, (1, 0, 2)).reshape(Tin * B, Din)
    y_flat = jnp.transpose(y, (1, 0, 2)).reshape(Tdec * B, Din)

    kernel = functools.partial(_rrnn_kernel, B=B, Tin=Tin, Tdec=Tdec)

    vmem = pl.BlockSpec(memory_space=pltpu.MemorySpace.VMEM)
    smem = pl.BlockSpec(memory_space=pltpu.MemorySpace.SMEM)

    # Shapes are tiny -> a single grid point with full-array VMEM blocks.
    # NOTE(scaling): for non-trivial B add a batch grid axis with
    # dimension_semantics=("parallel",) (uses v7x's 2 TensorCores) and, at larger H,
    # cast weights to bf16 for the MXU while keeping gate math and h in f32.
    out_flat = pl.pallas_call(
        kernel,
        out_shape=jax.ShapeDtypeStruct((Tdec * B, 2), jnp.float32),
        in_specs=[smem] + [vmem] * 13,
        out_specs=vmem,
        scratch_shapes=[pltpu.VMEM((Tdec * B, HP), jnp.float32)],
    )(flags, x_flat, y_flat,
      w["enc_wi"], w["enc_wh"], w["enc_bi"], w["enc_bhn"],
      w["dec_wi"], w["dec_wcat"], w["dec_bi"], w["dec_bhn"], w["dec_bf2g"],
      w["w_out"], w["b_out"])

    return jnp.transpose(out_flat.reshape(Tdec, B, 2), (1, 0, 2))    # (B, Tdec, 2)


# ------------------------------------------------------------------ params / reference
def init_params(key, din, hidden):
    """Deterministic PyTorch-style uniform(-1/sqrt(H), 1/sqrt(H)) init."""
    bound = 1.0 / (hidden ** 0.5)
    keys = jax.random.split(key, 10)

    def u(k, shape):
        return jax.random.uniform(k, shape, jnp.float32, -bound, bound)

    return {
        # weights stored transposed so forward does (B,K) @ (K,3H); gate order [r,z,n]
        "enc_wih_T": u(keys[0], (din, 3 * hidden)),
        "enc_whh_T": u(keys[1], (hidden, 3 * hidden)),
        "enc_bih":   u(keys[2], (1, 3 * hidden)),
        "enc_bhh":   u(keys[3], (1, 3 * hidden)),
        "dec_wih_T": u(keys[4], (din, 3 * hidden)),
        "dec_whh_T": u(keys[5], (hidden, 3 * hidden)),
        "dec_bih":   u(keys[6], (1, 3 * hidden)),
        "dec_bhh":   u(keys[7], (1, 3 * hidden)),
        "w_out_T":   u(keys[8], (hidden, 2)),
        "b_out":     u(keys[9], (1, 2)),
    }


def rrnn_reference(x, y, flags, params):
    """Pure-JAX reference with PyTorch GRU semantics (correctness check only)."""
    B, Tin, _ = x.shape
    Tdec = y.shape[1]
    H = params["enc_whh_T"].shape[0]

    def gru_step(xt, h, wih, whh, bih, bhh):
        gi = xt @ wih + bih
        gh = h @ whh + bhh
        r = jax.nn.sigmoid(gi[:, :H] + gh[:, :H])
        z = jax.nn.sigmoid(gi[:, H:2 * H] + gh[:, H:2 * H])
        n = jnp.tanh(gi[:, 2 * H:] + r * gh[:, 2 * H:])
        return (1.0 - z) * n + z * h

    h = jnp.zeros((B, H), jnp.float32)
    for t in range(Tin):
        h = gru_step(x[:, t, :], h, params["enc_wih_T"], params["enc_whh_T"],
                     params["enc_bih"], params["enc_bhh"])
    inp = x[:, -1, :]
    fids = []
    for t in range(Tdec):
        h = gru_step(inp, h, params["dec_wih_T"], params["dec_whh_T"],
                     params["dec_bih"], params["dec_bhh"])
        fid = h @ params["w_out_T"] + params["b_out"]
        fids.append(fid)
        inp = flags[t] * fid + (1.0 - flags[t]) * y[:, t, :]
    return jnp.stack(fids, axis=1)


# ----------------------------------------------------------------------------- main
if __name__ == "__main__":
    B, Din, H = 2, 2, 32
    xLen, yLen = 8, 16
    Tdec = yLen - xLen
    teach_force = 0.5

    root = jax.random.PRNGKey(0)
    k_x, k_y, k_p, k_coin = jax.random.split(root, 4)

    x = jax.random.normal(k_x, (B, xLen, Din), jnp.float32)
    y = jax.random.normal(k_y, (B, Tdec, Din), jnp.float32)
    params = init_params(k_p, Din, H)

    # one coin flip per decode step: torch.rand(1) > teachForce
    flags = (jax.random.uniform(k_coin, (Tdec,)) > teach_force).astype(jnp.float32)

    fids = rrnn_forward(x, y, flags, params)
    jax.block_until_ready(fids)
    assert fids.shape == (B, Tdec, 2)

    ref = rrnn_reference(x, y, flags, params)
    assert bool(jnp.allclose(fids, ref, atol=1e-3, rtol=1e-3)), "kernel != reference"

    print("KERNEL_OK")
</pallas_src>

<mosaic_0001>
module attributes {stable_mosaic.version = 11 : i64} {
  func.func @_rrnn_kernel(%arg0: memref<8xf32, #tpu.memory_space<smem>>, %arg1: memref<16x2xf32, #tpu.memory_space<vmem>>, %arg2: memref<16x2xf32, #tpu.memory_space<vmem>>, %arg3: memref<2x384xf32, #tpu.memory_space<vmem>>, %arg4: memref<128x384xf32, #tpu.memory_space<vmem>>, %arg5: memref<1x384xf32, #tpu.memory_space<vmem>>, %arg6: memref<1x128xf32, #tpu.memory_space<vmem>>, %arg7: memref<2x384xf32, #tpu.memory_space<vmem>>, %arg8: memref<128x768xf32, #tpu.memory_space<vmem>>, %arg9: memref<1x384xf32, #tpu.memory_space<vmem>>, %arg10: memref<1x128xf32, #tpu.memory_space<vmem>>, %arg11: memref<1x384xf32, #tpu.memory_space<vmem>>, %arg12: memref<128x2xf32, #tpu.memory_space<vmem>>, %arg13: memref<1x2xf32, #tpu.memory_space<vmem>>, %arg14: memref<16x2xf32, #tpu.memory_space<vmem>>, %arg15: memref<16x128xf32, #tpu.memory_space<vmem>>) attributes {dimension_semantics = [], scalar_prefetch = 0 : i64, scratch_operands = 1 : i64, tpu.core_type = #tpu.core_type<tc>} {
    %c0 = arith.constant 0 : index
    %c0_0 = arith.constant 0 : index
    %0 = vector.load %arg4[%c0, %c0_0] : memref<128x384xf32, #tpu.memory_space<vmem>>, vector<128x384xf32>
    %c0_1 = arith.constant 0 : index
    %c0_2 = arith.constant 0 : index
    %1 = vector.load %arg8[%c0_1, %c0_2] : memref<128x768xf32, #tpu.memory_space<vmem>>, vector<128x768xf32>
    %c0_3 = arith.constant 0 : index
    %c0_4 = arith.constant 0 : index
    %2 = vector.load %arg6[%c0_3, %c0_4] : memref<1x128xf32, #tpu.memory_space<vmem>>, vector<1x128xf32>
    %3 = vector.shape_cast %2 : vector<1x128xf32> to vector<1x128xf32>
    %4 = vector.broadcast %3 : vector<1x128xf32> to vector<2x128xf32>
    %c0_5 = arith.constant 0 : index
    %c0_6 = arith.constant 0 : index
    %5 = vector.load %arg10[%c0_5, %c0_6] : memref<1x128xf32, #tpu.memory_space<vmem>>, vector<1x128xf32>
    %6 = vector.shape_cast %5 : vector<1x128xf32> to vector<1x128xf32>
    %7 = vector.broadcast %6 : vector<1x128xf32> to vector<2x128xf32>
    %c0_7 = arith.constant 0 : index
    %c0_8 = arith.constant 0 : index
    %8 = vector.load %arg11[%c0_7, %c0_8] : memref<1x384xf32, #tpu.memory_space<vmem>>, vector<1x384xf32>
    %9 = vector.shape_cast %8 : vector<1x384xf32> to vector<1x384xf32>
    %10 = vector.broadcast %9 : vector<1x384xf32> to vector<2x384xf32>
    %c0_9 = arith.constant 0 : index
    %c0_10 = arith.constant 0 : index
    %11 = vector.load %arg1[%c0_9, %c0_10] : memref<16x2xf32, #tpu.memory_space<vmem>>, vector<16x2xf32>
    %c0_11 = arith.constant 0 : index
    %c0_12 = arith.constant 0 : index
    %12 = vector.load %arg3[%c0_11, %c0_12] : memref<2x384xf32, #tpu.memory_space<vmem>>, vector<2x384xf32>
    %cst = arith.constant dense<0.000000e+00> : vector<16x384xf32>
    %13 = tpu.matmul %11, %12, %cst {dimension_numbers = #tpu.dot_dimension_numbers<[1], [0], [0], [1], [0, 0, 1, 1], [], []>} : vector<16x2xf32>, vector<2x384xf32>, vector<16x384xf32> -> vector<16x384xf32>
    %c0_13 = arith.constant 0 : index
    %c0_14 = arith.constant 0 : index
    %14 = vector.load %arg5[%c0_13, %c0_14] : memref<1x384xf32, #tpu.memory_space<vmem>>, vector<1x384xf32>
    %15 = vector.broadcast %14 : vector<1x384xf32> to vector<16x384xf32>
    %16 = arith.addf %13, %15 : vector<16x384xf32>
    %cst_15 = arith.constant 0.000000e+00 : f32
    %17 = vector.broadcast %cst_15 : f32 to vector<2x128xf32>
    %18 = vector.extract_strided_slice %16 {offsets = [0, 0], sizes = [2, 384], strides = [1, 1]} : vector<16x384xf32> to vector<2x384xf32>
    %cst_16 = arith.constant dense<0.000000e+00> : vector<2x384xf32>
    %19 = tpu.matmul %17, %0, %cst_16 {dimension_numbers = #tpu.dot_dimension_numbers<[1], [0], [0], [1], [0, 0, 1, 1], [], []>} : vector<2x128xf32>, vector<128x384xf32>, vector<2x384xf32> -> vector<2x384xf32>
    %20 = vector.extract_strided_slice %18 {offsets = [0, 0], sizes = [2, 128], strides = [1, 1]} : vector<2x384xf32> to vector<2x128xf32>
    %21 = vector.extract_strided_slice %19 {offsets = [0, 0], sizes = [2, 128], strides = [1, 1]} : vector<2x384xf32> to vector<2x128xf32>
    %22 = arith.addf %20, %21 : vector<2x128xf32>
    %23 = arith.negf %22 : vector<2x128xf32>
    %24 = math.exp %23 : vector<2x128xf32>
    %cst_17 = arith.constant 1.000000e+00 : f32
    %25 = vector.broadcast %cst_17 : f32 to vector<2x128xf32>
    %26 = arith.addf %25, %24 : vector<2x128xf32>
    %27 = arith.divf %25, %26 : vector<2x128xf32>
    %28 = vector.extract_strided_slice %18 {offsets = [0, 128], sizes = [2, 128], strides = [1, 1]} : vector<2x384xf32> to vector<2x128xf32>
    %29 = vector.extract_strided_slice %19 {offsets = [0, 128], sizes = [2, 128], strides = [1, 1]} : vector<2x384xf32> to vector<2x128xf32>
    %30 = arith.addf %28, %29 : vector<2x128xf32>
    %31 = arith.negf %30 : vector<2x128xf32>
    %32 = math.exp %31 : vector<2x128xf32>
    %cst_18 = arith.constant 1.000000e+00 : f32
    %33 = vector.broadcast %cst_18 : f32 to vector<2x128xf32>
    %34 = arith.addf %33, %32 : vector<2x128xf32>
    %35 = arith.divf %33, %34 : vector<2x128xf32>
    %36 = vector.extract_strided_slice %18 {offsets = [0, 256], sizes = [2, 128], strides = [1, 1]} : vector<2x384xf32> to vector<2x128xf32>
    %37 = vector.extract_strided_slice %19 {offsets = [0, 256], sizes = [2, 128], strides = [1, 1]} : vector<2x384xf32> to vector<2x128xf32>
    %38 = arith.addf %37, %4 : vector<2x128xf32>
    %39 = arith.mulf %27, %38 : vector<2x128xf32>
    %40 = arith.addf %36, %39 : vector<2x128xf32>
    %41 = math.tanh %40 : vector<2x128xf32>
    %cst_19 = arith.constant 1.000000e+00 : f32
    %42 = vector.broadcast %cst_19 : f32 to vector<2x128xf32>
    %43 = arith.subf %42, %35 : vector<2x128xf32>
    %44 = arith.mulf %43, %41 : vector<2x128xf32>
    %45 = arith.mulf %35, %17 : vector<2x128xf32>
    %46 = arith.addf %44, %45 : vector<2x128xf32>
    %47 = vector.extract_strided_slice %16 {offsets = [2, 0], sizes = [2, 384], strides = [1, 1]} : vector<16x384xf32> to vector<2x384xf32>
    %cst_20 = arith.constant dense<0.000000e+00> : vector<2x384xf32>
    %48 = tpu.matmul %46, %0, %cst_20 {dimension_numbers = #tpu.dot_dimension_numbers<[1], [0], [0], [1], [0, 0, 1, 1], [], []>} : vector<2x128xf32>, vector<128x384xf32>, vector<2x384xf32> -> vector<2x384xf32>
    %49 = vector.extract_strided_slice %47 {offsets = [0, 0], sizes = [2, 128], strides = [1, 1]} : vector<2x384xf32> to vector<2x128xf32>
    %50 = vector.extract_strided_slice %48 {offsets = [0, 0], sizes = [2, 128], strides = [1, 1]} : vector<2x384xf32> to vector<2x128xf32>
    %51 = arith.addf %49, %50 : vector<2x128xf32>
    %52 = arith.negf %51 : vector<2x128xf32>
    %53 = math.exp %52 : vector<2x128xf32>
    %cst_21 = arith.constant 1.000000e+00 : f32
    %54 = vector.broadcast %cst_21 : f32 to vector<2x128xf32>
    %55 = arith.addf %54, %53 : vector<2x128xf32>
    %56 = arith.divf %54, %55 : vector<2x128xf32>
    %57 = vector.extract_strided_slice %47 {offsets = [0, 128], sizes = [2, 128], strides = [1, 1]} : vector<2x384xf32> to vector<2x128xf32>
    %58 = vector.extract_strided_slice %48 {offsets = [0, 128], sizes = [2, 128], strides = [1, 1]} : vector<2x384xf32> to vector<2x128xf32>
    %59 = arith.addf %57, %58 : vector<2x128xf32>
    %60 = arith.negf %59 : vector<2x128xf32>
    %61 = math.exp %60 : vector<2x128xf32>
    %cst_22 = arith.constant 1.000000e+00 : f32
    %62 = vector.broadcast %cst_22 : f32 to vector<2x128xf32>
    %63 = arith.addf %62, %61 : vector<2x128xf32>
    %64 = arith.divf %62, %63 : vector<2x128xf32>
    %65 = vector.extract_strided_slice %47 {offsets = [0, 256], sizes = [2, 128], strides = [1, 1]} : vector<2x384xf32> to vector<2x128xf32>
    %66 = vector.extract_strided_slice %48 {offsets = [0, 256], sizes = [2, 128], strides = [1, 1]} : vector<2x384xf32> to vector<2x128xf32>
    %67 = arith.addf %66, %4 : vector<2x128xf32>
    %68 = arith.mulf %56, %67 : vector<2x128xf32>
    %69 = arith.addf %65, %68 : vector<2x128xf32>
    %70 = math.tanh %69 : vector<2x128xf32>
    %cst_23 = arith.constant 1.000000e+00 : f32
    %71 = vector.broadcast %cst_23 : f32 to vector<2x128xf32>
    %72 = arith.subf %71, %64 : vector<2x128xf32>
    %73 = arith.mulf %72, %70 : vector<2x128xf32>
    %74 = arith.mulf %64, %46 : vector<2x128xf32>
    %75 = arith.addf %73, %74 : vector<2x128xf32>
    %76 = vector.extract_strided_slice %16 {offsets = [4, 0], sizes = [2, 384], strides = [1, 1]} : vector<16x384xf32> to vector<2x384xf32>
    %cst_24 = arith.constant dense<0.000000e+00> : vector<2x384xf32>
    %77 = tpu.matmul %75, %0, %cst_24 {dimension_numbers = #tpu.dot_dimension_numbers<[1], [0], [0], [1], [0, 0, 1, 1], [], []>} : vector<2x128xf32>, vector<128x384xf32>, vector<2x384xf32> -> vector<2x384xf32>
    %78 = vector.extract_strided_slice %76 {offsets = [0, 0], sizes = [2, 128], strides = [1, 1]} : vector<2x384xf32> to vector<2x128xf32>
    %79 = vector.extract_strided_slice %77 {offsets = [0, 0], sizes = [2, 128], strides = [1, 1]} : vector<2x384xf32> to vector<2x128xf32>
    %80 = arith.addf %78, %79 : vector<2x128xf32>
    %81 = arith.negf %80 : vector<2x128xf32>
    %82 = math.exp %81 : vector<2x128xf32>
    %cst_25 = arith.constant 1.000000e+00 : f32
    %83 = vector.broadcast %cst_25 : f32 to vector<2x128xf32>
    %84 = arith.addf %83, %82 : vector<2x128xf32>
    %85 = arith.divf %83, %84 : vector<2x128xf32>
    %86 = vector.extract_strided_slice %76 {offsets = [0, 128], sizes = [2, 128], strides = [1, 1]} : vector<2x384xf32> to vector<2x128xf32>
    %87 = vector.extract_strided_slice %77 {offsets = [0, 128], sizes = [2, 128], strides = [1, 1]} : vector<2x384xf32> to vector<2x128xf32>
    %88 = arith.addf %86, %87 : vector<2x128xf32>
    %89 = arith.negf %88 : vector<2x128xf32>
    %90 = math.exp %89 : vector<2x128xf32>
    %cst_26 = arith.constant 1.000000e+00 : f32
    %91 = vector.broadcast %cst_26 : f32 to vector<2x128xf32>
    %92 = arith.addf %91, %90 : vector<2x128xf32>
    %93 = arith.divf %91, %92 : vector<2x128xf32>
    %94 = vector.extract_strided_slice %76 {offsets = [0, 256], sizes = [2, 128], strides = [1, 1]} : vector<2x384xf32> to vector<2x128xf32>
    %95 = vector.extract_strided_slice %77 {offsets = [0, 256], sizes = [2, 128], strides = [1, 1]} : vector<2x384xf32> to vector<2x128xf32>
    %96 = arith.addf %95, %4 : vector<2x128xf32>
    %97 = arith.mulf %85, %96 : vector<2x128xf32>
    %98 = arith.addf %94, %97 : vector<2x128xf32>
    %99 = math.tanh %98 : vector<2x128xf32>
    %cst_27 = arith.constant 1.000000e+00 : f32
    %100 = vector.broadcast %cst_27 : f32 to vector<2x128xf32>
    %101 = arith.subf %100, %93 : vector<2x128xf32>
    %102 = arith.mulf %101, %99 : vector<2x128xf32>
    %103 = arith.mulf %93, %75 : vector<2x128xf32>
    %104 = arith.addf %102, %103 : vector<2x128xf32>
    %105 = vector.extract_strided_slice %16 {offsets = [6, 0], sizes = [2, 384], strides = [1, 1]} : vector<16x384xf32> to vector<2x384xf32>
    %cst_28 = arith.constant dense<0.000000e+00> : vector<2x384xf32>
    %106 = tpu.matmul %104, %0, %cst_28 {dimension_numbers = #tpu.dot_dimension_numbers<[1], [0], [0], [1], [0, 0, 1, 1], [], []>} : vector<2x128xf32>, vector<128x384xf32>, vector<2x384xf32> -> vector<2x384xf32>
    %107 = vector.extract_strided_slice %105 {offsets = [0, 0], sizes = [2, 128], strides = [1, 1]} : vector<2x384xf32> to vector<2x128xf32>
    %108 = vector.extract_strided_slice %106 {offsets = [0, 0], sizes = [2, 128], strides = [1, 1]} : vector<2x384xf32> to vector<2x128xf32>
    %109 = arith.addf %107, %108 : vector<2x128xf32>
    %110 = arith.negf %109 : vector<2x128xf32>
    %111 = math.exp %110 : vector<2x128xf32>
    %cst_29 = arith.constant 1.000000e+00 : f32
    %112 = vector.broadcast %cst_29 : f32 to vector<2x128xf32>
    %113 = arith.addf %112, %111 : vector<2x128xf32>
    %114 = arith.divf %112, %113 : vector<2x128xf32>
    %115 = vector.extract_strided_slice %105 {offsets = [0, 128], sizes = [2, 128], strides = [1, 1]} : vector<2x384xf32> to vector<2x128xf32>
    %116 = vector.extract_strided_slice %106 {offsets = [0, 128], sizes = [2, 128], strides = [1, 1]} : vector<2x384xf32> to vector<2x128xf32>
    %117 = arith.addf %115, %116 : vector<2x128xf32>
    %118 = arith.negf %117 : vector<2x128xf32>
    %119 = math.exp %118 : vector<2x128xf32>
    %cst_30 = arith.constant 1.000000e+00 : f32
    %120 = vector.broadcast %cst_30 : f32 to vector<2x128xf32>
    %121 = arith.addf %120, %119 : vector<2x128xf32>
    %122 = arith.divf %120, %121 : vector<2x128xf32>
    %123 = vector.extract_strided_slice %105 {offsets = [0, 256], sizes = [2, 128], strides = [1, 1]} : vector<2x384xf32> to vector<2x128xf32>
    %124 = vector.extract_strided_slice %106 {offsets = [0, 256], sizes = [2, 128], strides = [1, 1]} : vector<2x384xf32> to vector<2x128xf32>
    %125 = arith.addf %124, %4 : vector<2x128xf32>
    %126 = arith.mulf %114, %125 : vector<2x128xf32>
    %127 = arith.addf %123, %126 : vector<2x128xf32>
    %128 = math.tanh %127 : vector<2x128xf32>
    %cst_31 = arith.constant 1.000000e+00 : f32
    %129 = vector.broadcast %cst_31 : f32 to vector<2x128xf32>
    %130 = arith.subf %129, %122 : vector<2x128xf32>
    %131 = arith.mulf %130, %128 : vector<2x128xf32>
    %132 = arith.mulf %122, %104 : vector<2x128xf32>
    %133 = arith.addf %131, %132 : vector<2x128xf32>
    %134 = vector.extract_strided_slice %16 {offsets = [8, 0], sizes = [2, 384], strides = [1, 1]} : vector<16x384xf32> to vector<2x384xf32>
    %cst_32 = arith.constant dense<0.000000e+00> : vector<2x384xf32>
    %135 = tpu.matmul %133, %0, %cst_32 {dimension_numbers = #tpu.dot_dimension_numbers<[1], [0], [0], [1], [0, 0, 1, 1], [], []>} : vector<2x128xf32>, vector<128x384xf32>, vector<2x384xf32> -> vector<2x384xf32>
    %136 = vector.extract_strided_slice %134 {offsets = [0, 0], sizes = [2, 128], strides = [1, 1]} : vector<2x384xf32> to vector<2x128xf32>
    %137 = vector.extract_strided_slice %135 {offsets = [0, 0], sizes = [2, 128], strides = [1, 1]} : vector<2x384xf32> to vector<2x128xf32>
    %138 = arith.addf %136, %137 : vector<2x128xf32>
    %139 = arith.negf %138 : vector<2x128xf32>
    %140 = math.exp %139 : vector<2x128xf32>
    %cst_33 = arith.constant 1.000000e+00 : f32
    %141 = vector.broadcast %cst_33 : f32 to vector<2x128xf32>
    %142 = arith.addf %141, %140 : vector<2x128xf32>
    %143 = arith.divf %141, %142 : vector<2x128xf32>
    %144 = vector.extract_strided_slice %134 {offsets = [0, 128], sizes = [2, 128], strides = [1, 1]} : vector<2x384xf32> to vector<2x128xf32>
    %145 = vector.extract_strided_slice %135 {offsets = [0, 128], sizes = [2, 128], strides = [1, 1]} : vector<2x384xf32> to vector<2x128xf32>
    %146 = arith.addf %144, %145 : vector<2x128xf32>
    %147 = arith.negf %146 : vector<2x128xf32>
    %148 = math.exp %147 : vector<2x128xf32>
    %cst_34 = arith.constant 1.000000e+00 : f32
    %149 = vector.broadcast %cst_34 : f32 to vector<2x128xf32>
    %150 = arith.addf %149, %148 : vector<2x128xf32>
    %151 = arith.divf %149, %150 : vector<2x128xf32>
    %152 = vector.extract_strided_slice %134 {offsets = [0, 256], sizes = [2, 128], strides = [1, 1]} : vector<2x384xf32> to vector<2x128xf32>
    %153 = vector.extract_strided_slice %135 {offsets = [0, 256], sizes = [2, 128], strides = [1, 1]} : vector<2x384xf32> to vector<2x128xf32>
    %154 = arith.addf %153, %4 : vector<2x128xf32>
    %155 = arith.mulf %143, %154 : vector<2x128xf32>
    %156 = arith.addf %152, %155 : vector<2x128xf32>
    %157 = math.tanh %156 : vector<2x128xf32>
    %cst_35 = arith.constant 1.000000e+00 : f32
    %158 = vector.broadcast %cst_35 : f32 to vector<2x128xf32>
    %159 = arith.subf %158, %151 : vector<2x128xf32>
    %160 = arith.mulf %159, %157 : vector<2x128xf32>
    %161 = arith.mulf %151, %133 : vector<2x128xf32>
    %162 = arith.addf %160, %161 : vector<2x128xf32>
    %163 = vector.extract_strided_slice %16 {offsets = [10, 0], sizes = [2, 384], strides = [1, 1]} : vector<16x384xf32> to vector<2x384xf32>
    %cst_36 = arith.constant dense<0.000000e+00> : vector<2x384xf32>
    %164 = tpu.matmul %162, %0, %cst_36 {dimension_numbers = #tpu.dot_dimension_numbers<[1], [0], [0], [1], [0, 0, 1, 1], [], []>} : vector<2x128xf32>, vector<128x384xf32>, vector<2x384xf32> -> vector<2x384xf32>
    %165 = vector.extract_strided_slice %163 {offsets = [0, 0], sizes = [2, 128], strides = [1, 1]} : vector<2x384xf32> to vector<2x128xf32>
    %166 = vector.extract_strided_slice %164 {offsets = [0, 0], sizes = [2, 128], strides = [1, 1]} : vector<2x384xf32> to vector<2x128xf32>
    %167 = arith.addf %165, %166 : vector<2x128xf32>
    %168 = arith.negf %167 : vector<2x128xf32>
    %169 = math.exp %168 : vector<2x128xf32>
    %cst_37 = arith.constant 1.000000e+00 : f32
    %170 = vector.broadcast %cst_37 : f32 to vector<2x128xf32>
    %171 = arith.addf %170, %169 : vector<2x128xf32>
    %172 = arith.divf %170, %171 : vector<2x128xf32>
    %173 = vector.extract_strided_slice %163 {offsets = [0, 128], sizes = [2, 128], strides = [1, 1]} : vector<2x384xf32> to vector<2x128xf32>
    %174 = vector.extract_strided_slice %164 {offsets = [0, 128], sizes = [2, 128], strides = [1, 1]} : vector<2x384xf32> to vector<2x128xf32>
    %175 = arith.addf %173, %174 : vector<2x128xf32>
    %176 = arith.negf %175 : vector<2x128xf32>
    %177 = math.exp %176 : vector<2x128xf32>
    %cst_38 = arith.constant 1.000000e+00 : f32
    %178 = vector.broadcast %cst_38 : f32 to vector<2x128xf32>
    %179 = arith.addf %178, %177 : vector<2x128xf32>
    %180 = arith.divf %178, %179 : vector<2x128xf32>
    %181 = vector.extract_strided_slice %163 {offsets = [0, 256], sizes = [2, 128], strides = [1, 1]} : vector<2x384xf32> to vector<2x128xf32>
    %182 = vector.extract_strided_slice %164 {offsets = [0, 256], sizes = [2, 128], strides = [1, 1]} : vector<2x384xf32> to vector<2x128xf32>
    %183 = arith.addf %182, %4 : vector<2x128xf32>
    %184 = arith.mulf %172, %183 : vector<2x128xf32>
    %185 = arith.addf %181, %184 : vector<2x128xf32>
    %186 = math.tanh %185 : vector<2x128xf32>
    %cst_39 = arith.constant 1.000000e+00 : f32
    %187 = vector.broadcast %cst_39 : f32 to vector<2x128xf32>
    %188 = arith.subf %187, %180 : vector<2x128xf32>
    %189 = arith.mulf %188, %186 : vector<2x128xf32>
    %190 = arith.mulf %180, %162 : vector<2x128xf32>
    %191 = arith.addf %189, %190 : vector<2x128xf32>
    %192 = vector.extract_strided_slice %16 {offsets = [12, 0], sizes = [2, 384], strides = [1, 1]} : vector<16x384xf32> to vector<2x384xf32>
    %cst_40 = arith.constant dense<0.000000e+00> : vector<2x384xf32>
    %193 = tpu.matmul %191, %0, %cst_40 {dimension_numbers = #tpu.dot_dimension_numbers<[1], [0], [0], [1], [0, 0, 1, 1], [], []>} : vector<2x128xf32>, vector<128x384xf32>, vector<2x384xf32> -> vector<2x384xf32>
    %194 = vector.extract_strided_slice %192 {offsets = [0, 0], sizes = [2, 128], strides = [1, 1]} : vector<2x384xf32> to vector<2x128xf32>
    %195 = vector.extract_strided_slice %193 {offsets = [0, 0], sizes = [2, 128], strides = [1, 1]} : vector<2x384xf32> to vector<2x128xf32>
    %196 = arith.addf %194, %195 : vector<2x128xf32>
    %197 = arith.negf %196 : vector<2x128xf32>
    %198 = math.exp %197 : vector<2x128xf32>
    %cst_41 = arith.constant 1.000000e+00 : f32
    %199 = vector.broadcast %cst_41 : f32 to vector<2x128xf32>
    %200 = arith.addf %199, %198 : vector<2x128xf32>
    %201 = arith.divf %199, %200 : vector<2x128xf32>
    %202 = vector.extract_strided_slice %192 {offsets = [0, 128], sizes = [2, 128], strides = [1, 1]} : vector<2x384xf32> to vector<2x128xf32>
    %203 = vector.extract_strided_slice %193 {offsets = [0, 128], sizes = [2, 128], strides = [1, 1]} : vector<2x384xf32> to vector<2x128xf32>
    %204 = arith.addf %202, %203 : vector<2x128xf32>
    %205 = arith.negf %204 : vector<2x128xf32>
    %206 = math.exp %205 : vector<2x128xf32>
    %cst_42 = arith.constant 1.000000e+00 : f32
    %207 = vector.broadcast %cst_42 : f32 to vector<2x128xf32>
    %208 = arith.addf %207, %206 : vector<2x128xf32>
    %209 = arith.divf %207, %208 : vector<2x128xf32>
    %210 = vector.extract_strided_slice %192 {offsets = [0, 256], sizes = [2, 128], strides = [1, 1]} : vector<2x384xf32> to vector<2x128xf32>
    %211 = vector.extract_strided_slice %193 {offsets = [0, 256], sizes = [2, 128], strides = [1, 1]} : vector<2x384xf32> to vector<2x128xf32>
    %212 = arith.addf %211, %4 : vector<2x128xf32>
    %213 = arith.mulf %201, %212 : vector<2x128xf32>
    %214 = arith.addf %210, %213 : vector<2x128xf32>
    %215 = math.tanh %214 : vector<2x128xf32>
    %cst_43 = arith.constant 1.000000e+00 : f32
    %216 = vector.broadcast %cst_43 : f32 to vector<2x128xf32>
    %217 = arith.subf %216, %209 : vector<2x128xf32>
    %218 = arith.mulf %217, %215 : vector<2x128xf32>
    %219 = arith.mulf %209, %191 : vector<2x128xf32>
    %220 = arith.addf %218, %219 : vector<2x128xf32>
    %221 = vector.extract_strided_slice %16 {offsets = [14, 0], sizes = [2, 384], strides = [1, 1]} : vector<16x384xf32> to vector<2x384xf32>
    %cst_44 = arith.constant dense<0.000000e+00> : vector<2x384xf32>
    %222 = tpu.matmul %220, %0, %cst_44 {dimension_numbers = #tpu.dot_dimension_numbers<[1], [0], [0], [1], [0, 0, 1, 1], [], []>} : vector<2x128xf32>, vector<128x384xf32>, vector<2x384xf32> -> vector<2x384xf32>
    %223 = vector.extract_strided_slice %221 {offsets = [0, 0], sizes = [2, 128], strides = [1, 1]} : vector<2x384xf32> to vector<2x128xf32>
    %224 = vector.extract_strided_slice %222 {offsets = [0, 0], sizes = [2, 128], strides = [1, 1]} : vector<2x384xf32> to vector<2x128xf32>
    %225 = arith.addf %223, %224 : vector<2x128xf32>
    %226 = arith.negf %225 : vector<2x128xf32>
    %227 = math.exp %226 : vector<2x128xf32>
    %cst_45 = arith.constant 1.000000e+00 : f32
    %228 = vector.broadcast %cst_45 : f32 to vector<2x128xf32>
    %229 = arith.addf %228, %227 : vector<2x128xf32>
    %230 = arith.divf %228, %229 : vector<2x128xf32>
    %231 = vector.extract_strided_slice %221 {offsets = [0, 128], sizes = [2, 128], strides = [1, 1]} : vector<2x384xf32> to vector<2x128xf32>
    %232 = vector.extract_strided_slice %222 {offsets = [0, 128], sizes = [2, 128], strides = [1, 1]} : vector<2x384xf32> to vector<2x128xf32>
    %233 = arith.addf %231, %232 : vector<2x128xf32>
    %234 = arith.negf %233 : vector<2x128xf32>
    %235 = math.exp %234 : vector<2x128xf32>
    %cst_46 = arith.constant 1.000000e+00 : f32
    %236 = vector.broadcast %cst_46 : f32 to vector<2x128xf32>
    %237 = arith.addf %236, %235 : vector<2x128xf32>
    %238 = arith.divf %236, %237 : vector<2x128xf32>
    %239 = vector.extract_strided_slice %221 {offsets = [0, 256], sizes = [2, 128], strides = [1, 1]} : vector<2x384xf32> to vector<2x128xf32>
    %240 = vector.extract_strided_slice %222 {offsets = [0, 256], sizes = [2, 128], strides = [1, 1]} : vector<2x384xf32> to vector<2x128xf32>
    %241 = arith.addf %240, %4 : vector<2x128xf32>
    %242 = arith.mulf %230, %241 : vector<2x128xf32>
    %243 = arith.addf %239, %242 : vector<2x128xf32>
    %244 = math.tanh %243 : vector<2x128xf32>
    %cst_47 = arith.constant 1.000000e+00 : f32
    %245 = vector.broadcast %cst_47 : f32 to vector<2x128xf32>
    %246 = arith.subf %245, %238 : vector<2x128xf32>
    %247 = arith.mulf %246, %244 : vector<2x128xf32>
    %248 = arith.mulf %238, %220 : vector<2x128xf32>
    %249 = arith.addf %247, %248 : vector<2x128xf32>
    %c0_48 = arith.constant 0 : index
    %c0_49 = arith.constant 0 : index
    %250 = vector.load %arg2[%c0_48, %c0_49] : memref<16x2xf32, #tpu.memory_space<vmem>>, vector<16x2xf32>
    %c0_50 = arith.constant 0 : index
    %c0_51 = arith.constant 0 : index
    %251 = vector.load %arg7[%c0_50, %c0_51] : memref<2x384xf32, #tpu.memory_space<vmem>>, vector<2x384xf32>
    %cst_52 = arith.constant dense<0.000000e+00> : vector<16x384xf32>
    %252 = tpu.matmul %250, %251, %cst_52 {dimension_numbers = #tpu.dot_dimension_numbers<[1], [0], [0], [1], [0, 0, 1, 1], [], []>} : vector<16x2xf32>, vector<2x384xf32>, vector<16x384xf32> -> vector<16x384xf32>
    %c0_53 = arith.constant 0 : index
    %c0_54 = arith.constant 0 : index
    %253 = vector.load %arg9[%c0_53, %c0_54] : memref<1x384xf32, #tpu.memory_space<vmem>>, vector<1x384xf32>
    %254 = vector.broadcast %253 : vector<1x384xf32> to vector<16x384xf32>
    %255 = arith.addf %252, %254 : vector<16x384xf32>
    %256 = vector.extract_strided_slice %11 {offsets = [14, 0], sizes = [2, 2], strides = [1, 1]} : vector<16x2xf32> to vector<2x2xf32>
    %c0_55 = arith.constant 0 : index
    %c0_56 = arith.constant 0 : index
    %257 = vector.load %arg7[%c0_55, %c0_56] : memref<2x384xf32, #tpu.memory_space<vmem>>, vector<2x384xf32>
    %cst_57 = arith.constant dense<0.000000e+00> : vector<2x384xf32>
    %258 = tpu.matmul %256, %257, %cst_57 {dimension_numbers = #tpu.dot_dimension_numbers<[1], [0], [0], [1], [0, 0, 1, 1], [], []>} : vector<2x2xf32>, vector<2x384xf32>, vector<2x384xf32> -> vector<2x384xf32>
    %c0_58 = arith.constant 0 : index
    %c0_59 = arith.constant 0 : index
    %259 = vector.load %arg9[%c0_58, %c0_59] : memref<1x384xf32, #tpu.memory_space<vmem>>, vector<1x384xf32>
    %260 = vector.broadcast %259 : vector<1x384xf32> to vector<2x384xf32>
    %261 = arith.addf %258, %260 : vector<2x384xf32>
    %cst_60 = arith.constant dense<0.000000e+00> : vector<2x768xf32>
    %262 = tpu.matmul %249, %1, %cst_60 {dimension_numbers = #tpu.dot_dimension_numbers<[1], [0], [0], [1], [0, 0, 1, 1], [], []>} : vector<2x128xf32>, vector<128x768xf32>, vector<2x768xf32> -> vector<2x768xf32>
    %263 = vector.extract_strided_slice %262 {offsets = [0, 0], sizes = [2, 384], strides = [1, 1]} : vector<2x768xf32> to vector<2x384xf32>
    %264 = vector.extract_strided_slice %261 {offsets = [0, 0], sizes = [2, 128], strides = [1, 1]} : vector<2x384xf32> to vector<2x128xf32>
    %265 = vector.extract_strided_slice %263 {offsets = [0, 0], sizes = [2, 128], strides = [1, 1]} : vector<2x384xf32> to vector<2x128xf32>
    %266 = arith.addf %264, %265 : vector<2x128xf32>
    %267 = arith.negf %266 : vector<2x128xf32>
    %268 = math.exp %267 : vector<2x128xf32>
    %cst_61 = arith.constant 1.000000e+00 : f32
    %269 = vector.broadcast %cst_61 : f32 to vector<2x128xf32>
    %270 = arith.addf %269, %268 : vector<2x128xf32>
    %271 = arith.divf %269, %270 : vector<2x128xf32>
    %272 = vector.extract_strided_slice %261 {offsets = [0, 128], sizes = [2, 128], strides = [1, 1]} : vector<2x384xf32> to vector<2x128xf32>
    %273 = vector.extract_strided_slice %263 {offsets = [0, 128], sizes = [2, 128], strides = [1, 1]} : vector<2x384xf32> to vector<2x128xf32>
    %274 = arith.addf %272, %273 : vector<2x128xf32>
    %275 = arith.negf %274 : vector<2x128xf32>
    %276 = math.exp %275 : vector<2x128xf32>
    %cst_62 = arith.constant 1.000000e+00 : f32
    %277 = vector.broadcast %cst_62 : f32 to vector<2x128xf32>
    %278 = arith.addf %277, %276 : vector<2x128xf32>
    %279 = arith.divf %277, %278 : vector<2x128xf32>
    %280 = vector.extract_strided_slice %261 {offsets = [0, 256], sizes = [2, 128], strides = [1, 1]} : vector<2x384xf32> to vector<2x128xf32>
    %281 = vector.extract_strided_slice %263 {offsets = [0, 256], sizes = [2, 128], strides = [1, 1]} : vector<2x384xf32> to vector<2x128xf32>
    %282 = arith.addf %281, %7 : vector<2x128xf32>
    %283 = arith.mulf %271, %282 : vector<2x128xf32>
    %284 = arith.addf %280, %283 : vector<2x128xf32>
    %285 = math.tanh %284 : vector<2x128xf32>
    %cst_63 = arith.constant 1.000000e+00 : f32
    %286 = vector.broadcast %cst_63 : f32 to vector<2x128xf32>
    %287 = arith.subf %286, %279 : vector<2x128xf32>
    %288 = arith.mulf %287, %285 : vector<2x128xf32>
    %289 = arith.mulf %279, %249 : vector<2x128xf32>
    %290 = arith.addf %288, %289 : vector<2x128xf32>
    %c0_64 = arith.constant 0 : index
    %c0_65 = arith.constant 0 : index
    %291 = vector.load %arg15[%c0_64, %c0_65] : memref<16x128xf32, #tpu.memory_space<vmem>>, vector<2x128xf32>
    tpu.vector_store %arg15[%c0_64, %c0_65], %290 {strides = array<i32>} : memref<16x128xf32, #tpu.memory_space<vmem>>, vector<2x128xf32>,
    %cst_66 = arith.constant dense<0.000000e+00> : vector<2x768xf32>
    %292 = tpu.matmul %290, %1, %cst_66 {dimension_numbers = #tpu.dot_dimension_numbers<[1], [0], [0], [1], [0, 0, 1, 1], [], []>} : vector<2x128xf32>, vector<128x768xf32>, vector<2x768xf32> -> vector<2x768xf32>
    %c0_67 = arith.constant 0 : index
    %293 = memref.load %arg0[%c0_67] : memref<8xf32, #tpu.memory_space<smem>>
    %294 = vector.extract_strided_slice %292 {offsets = [0, 384], sizes = [2, 384], strides = [1, 1]} : vector<2x768xf32> to vector<2x384xf32>
    %295 = arith.addf %294, %10 : vector<2x384xf32>
    %296 = vector.extract_strided_slice %255 {offsets = [0, 0], sizes = [2, 384], strides = [1, 1]} : vector<16x384xf32> to vector<2x384xf32>
    %297 = vector.broadcast %293 : f32 to vector<2x384xf32>
    %298 = arith.mulf %297, %295 : vector<2x384xf32>
    %cst_68 = arith.constant 1.000000e+00 : f32
    %299 = arith.subf %cst_68, %293 : f32
    %300 = vector.broadcast %299 : f32 to vector<2x384xf32>
    %301 = arith.mulf %300, %296 : vector<2x384xf32>
    %302 = arith.addf %298, %301 : vector<2x384xf32>
    %303 = vector.extract_strided_slice %292 {offsets = [0, 0], sizes = [2, 384], strides = [1, 1]} : vector<2x768xf32> to vector<2x384xf32>
    %304 = vector.extract_strided_slice %302 {offsets = [0, 0], sizes = [2, 128], strides = [1, 1]} : vector<2x384xf32> to vector<2x128xf32>
    %305 = vector.extract_strided_slice %303 {offsets = [0, 0], sizes = [2, 128], strides = [1, 1]} : vector<2x384xf32> to vector<2x128xf32>
    %306 = arith.addf %304, %305 : vector<2x128xf32>
    %307 = arith.negf %306 : vector<2x128xf32>
    %308 = math.exp %307 : vector<2x128xf32>
    %cst_69 = arith.constant 1.000000e+00 : f32
    %309 = vector.broadcast %cst_69 : f32 to vector<2x128xf32>
    %310 = arith.addf %309, %308 : vector<2x128xf32>
    %311 = arith.divf %309, %310 : vector<2x128xf32>
    %312 = vector.extract_strided_slice %302 {offsets = [0, 128], sizes = [2, 128], strides = [1, 1]} : vector<2x384xf32> to vector<2x128xf32>
    %313 = vector.extract_strided_slice %303 {offsets = [0, 128], sizes = [2, 128], strides = [1, 1]} : vector<2x384xf32> to vector<2x128xf32>
    %314 = arith.addf %312, %313 : vector<2x128xf32>
    %315 = arith.negf %314 : vector<2x128xf32>
    %316 = math.exp %315 : vector<2x128xf32>
    %cst_70 = arith.constant 1.000000e+00 : f32
    %317 = vector.broadcast %cst_70 : f32 to vector<2x128xf32>
    %318 = arith.addf %317, %316 : vector<2x128xf32>
    %319 = arith.divf %317, %318 : vector<2x128xf32>
    %320 = vector.extract_strided_slice %302 {offsets = [0, 256], sizes = [2, 128], strides = [1, 1]} : vector<2x384xf32> to vector<2x128xf32>
    %321 = vector.extract_strided_slice %303 {offsets = [0, 256], sizes = [2, 128], strides = [1, 1]} : vector<2x384xf32> to vector<2x128xf32>
    %322 = arith.addf %321, %7 : vector<2x128xf32>
    %323 = arith.mulf %311, %322 : vector<2x128xf32>
    %324 = arith.addf %320, %323 : vector<2x128xf32>
    %325 = math.tanh %324 : vector<2x128xf32>
    %cst_71 = arith.constant 1.000000e+00 : f32
    %326 = vector.broadcast %cst_71 : f32 to vector<2x128xf32>
    %327 = arith.subf %326, %319 : vector<2x128xf32>
    %328 = arith.mulf %327, %325 : vector<2x128xf32>
    %329 = arith.mulf %319, %290 : vector<2x128xf32>
    %330 = arith.addf %328, %329 : vector<2x128xf32>
    %c2 = arith.constant 2 : index
    %c0_72 = arith.constant 0 : index
    %331 = vector.load %arg15[%c2, %c0_72] : memref<16x128xf32, #tpu.memory_space<vmem>>, vector<2x128xf32>
    tpu.vector_store %arg15[%c2, %c0_72], %330 {strides = array<i32>} : memref<16x128xf32, #tpu.memory_space<vmem>>, vector<2x128xf32>,
    %cst_73 = arith.constant dense<0.000000e+00> : vector<2x768xf32>
    %332 = tpu.matmul %330, %1, %cst_73 {dimension_numbers = #tpu.dot_dimension_numbers<[1], [0], [0], [1], [0, 0, 1, 1], [], []>} : vector<2x128xf32>, vector<128x768xf32>, vector<2x768xf32> -> vector<2x768xf32>
    %c1 = arith.constant 1 : index
    %333 = memref.load %arg0[%c1] : memref<8xf32, #tpu.memory_space<smem>>
    %334 = vector.extract_strided_slice %332 {offsets = [0, 384], sizes = [2, 384], strides = [1, 1]} : vector<2x768xf32> to vector<2x384xf32>
    %335 = arith.addf %334, %10 : vector<2x384xf32>
    %336 = vector.extract_strided_slice %255 {offsets = [2, 0], sizes = [2, 384], strides = [1, 1]} : vector<16x384xf32> to vector<2x384xf32>
    %337 = vector.broadcast %333 : f32 to vector<2x384xf32>
    %338 = arith.mulf %337, %335 : vector<2x384xf32>
    %cst_74 = arith.constant 1.000000e+00 : f32
    %339 = arith.subf %cst_74, %333 : f32
    %340 = vector.broadcast %339 : f32 to vector<2x384xf32>
    %341 = arith.mulf %340, %336 : vector<2x384xf32>
    %342 = arith.addf %338, %341 : vector<2x384xf32>
    %343 = vector.extract_strided_slice %332 {offsets = [0, 0], sizes = [2, 384], strides = [1, 1]} : vector<2x768xf32> to vector<2x384xf32>
    %344 = vector.extract_strided_slice %342 {offsets = [0, 0], sizes = [2, 128], strides = [1, 1]} : vector<2x384xf32> to vector<2x128xf32>
    %345 = vector.extract_strided_slice %343 {offsets = [0, 0], sizes = [2, 128], strides = [1, 1]} : vector<2x384xf32> to vector<2x128xf32>
    %346 = arith.addf %344, %345 : vector<2x128xf32>
    %347 = arith.negf %346 : vector<2x128xf32>
    %348 = math.exp %347 : vector<2x128xf32>
    %cst_75 = arith.constant 1.000000e+00 : f32
    %349 = vector.broadcast %cst_75 : f32 to vector<2x128xf32>
    %350 = arith.addf %349, %348 : vector<2x128xf32>
    %351 = arith.divf %349, %350 : vector<2x128xf32>
    %352 = vector.extract_strided_slice %342 {offsets = [0, 128], sizes = [2, 128], strides = [1, 1]} : vector<2x384xf32> to vector<2x128xf32>
    %353 = vector.extract_strided_slice %343 {offsets = [0, 128], sizes = [2, 128], strides = [1, 1]} : vector<2x384xf32> to vector<2x128xf32>
    %354 = arith.addf %352, %353 : vector<2x128xf32>
    %355 = arith.negf %354 : vector<2x128xf32>
    %356 = math.exp %355 : vector<2x128xf32>
    %cst_76 = arith.constant 1.000000e+00 : f32
    %357 = vector.broadcast %cst_76 : f32 to vector<2x128xf32>
    %358 = arith.addf %357, %356 : vector<2x128xf32>
    %359 = arith.divf %357, %358 : vector<2x128xf32>
    %360 = vector.extract_strided_slice %342 {offsets = [0, 256], sizes = [2, 128], strides = [1, 1]} : vector<2x384xf32> to vector<2x128xf32>
    %361 = vector.extract_strided_slice %343 {offsets = [0, 256], sizes = [2, 128], strides = [1, 1]} : vector<2x384xf32> to vector<2x128xf32>
    %362 = arith.addf %361, %7 : vector<2x128xf32>
    %363 = arith.mulf %351, %362 : vector<2x128xf32>
    %364 = arith.addf %360, %363 : vector<2x128xf32>
    %365 = math.tanh %364 : vector<2x128xf32>
    %cst_77 = arith.constant 1.000000e+00 : f32
    %366 = vector.broadcast %cst_77 : f32 to vector<2x128xf32>
    %367 = arith.subf %366, %359 : vector<2x128xf32>
    %368 = arith.mulf %367, %365 : vector<2x128xf32>
    %369 = arith.mulf %359, %330 : vector<2x128xf32>
    %370 = arith.addf %368, %369 : vector<2x128xf32>
    %c4 = arith.constant 4 : index
    %c0_78 = arith.constant 0 : index
    %371 = vector.load %arg15[%c4, %c0_78] : memref<16x128xf32, #tpu.memory_space<vmem>>, vector<2x128xf32>
    tpu.vector_store %arg15[%c4, %c0_78], %370 {strides = array<i32>} : memref<16x128xf32, #tpu.memory_space<vmem>>, vector<2x128xf32>,
    %cst_79 = arith.constant dense<0.000000e+00> : vector<2x768xf32>
    %372 = tpu.matmul %370, %1, %cst_79 {dimension_numbers = #tpu.dot_dimension_numbers<[1], [0], [0], [1], [0, 0, 1, 1], [], []>} : vector<2x128xf32>, vector<128x768xf32>, vector<2x768xf32> -> vector<2x768xf32>
    %c2_80 = arith.constant 2 : index
    %373 = memref.load %arg0[%c2_80] : memref<8xf32, #tpu.memory_space<smem>>
    %374 = vector.extract_strided_slice %372 {offsets = [0, 384], sizes = [2, 384], strides = [1, 1]} : vector<2x768xf32> to vector<2x384xf32>
    %375 = arith.addf %374, %10 : vector<2x384xf32>
    %376 = vector.extract_strided_slice %255 {offsets = [4, 0], sizes = [2, 384], strides = [1, 1]} : vector<16x384xf32> to vector<2x384xf32>
    %377 = vector.broadcast %373 : f32 to vector<2x384xf32>
    %378 = arith.mulf %377, %375 : vector<2x384xf32>
    %cst_81 = arith.constant 1.000000e+00 : f32
    %379 = arith.subf %cst_81, %373 : f32
    %380 = vector.broadcast %379 : f32 to vector<2x384xf32>
    %381 = arith.mulf %380, %376 : vector<2x384xf32>
    %382 = arith.addf %378, %381 : vector<2x384xf32>
    %383 = vector.extract_strided_slice %372 {offsets = [0, 0], sizes = [2, 384], strides = [1, 1]} : vector<2x768xf32> to vector<2x384xf32>
    %384 = vector.extract_strided_slice %382 {offsets = [0, 0], sizes = [2, 128], strides = [1, 1]} : vector<2x384xf32> to vector<2x128xf32>
    %385 = vector.extract_strided_slice %383 {offsets = [0, 0], sizes = [2, 128], strides = [1, 1]} : vector<2x384xf32> to vector<2x128xf32>
    %386 = arith.addf %384, %385 : vector<2x128xf32>
    %387 = arith.negf %386 : vector<2x128xf32>
    %388 = math.exp %387 : vector<2x128xf32>
    %cst_82 = arith.constant 1.000000e+00 : f32
    %389 = vector.broadcast %cst_82 : f32 to vector<2x128xf32>
    %390 = arith.addf %389, %388 : vector<2x128xf32>
    %391 = arith.divf %389, %390 : vector<2x128xf32>
    %392 = vector.extract_strided_slice %382 {offsets = [0, 128], sizes = [2, 128], strides = [1, 1]} : vector<2x384xf32> to vector<2x128xf32>
    %393 = vector.extract_strided_slice %383 {offsets = [0, 128], sizes = [2, 128], strides = [1, 1]} : vector<2x384xf32> to vector<2x128xf32>
    %394 = arith.addf %392, %393 : vector<2x128xf32>
    %395 = arith.negf %394 : vector<2x128xf32>
    %396 = math.exp %395 : vector<2x128xf32>
    %cst_83 = arith.constant 1.000000e+00 : f32
    %397 = vector.broadcast %cst_83 : f32 to vector<2x128xf32>
    %398 = arith.addf %397, %396 : vector<2x128xf32>
    %399 = arith.divf %397, %398 : vector<2x128xf32>
    %400 = vector.extract_strided_slice %382 {offsets = [0, 256], sizes = [2, 128], strides = [1, 1]} : vector<2x384xf32> to vector<2x128xf32>
    %401 = vector.extract_strided_slice %383 {offsets = [0, 256], sizes = [2, 128], strides = [1, 1]} : vector<2x384xf32> to vector<2x128xf32>
    %402 = arith.addf %401, %7 : vector<2x128xf32>
    %403 = arith.mulf %391, %402 : vector<2x128xf32>
    %404 = arith.addf %400, %403 : vector<2x128xf32>
    %405 = math.tanh %404 : vector<2x128xf32>
    %cst_84 = arith.constant 1.000000e+00 : f32
    %406 = vector.broadcast %cst_84 : f32 to vector<2x128xf32>
    %407 = arith.subf %406, %399 : vector<2x128xf32>
    %408 = arith.mulf %407, %405 : vector<2x128xf32>
    %409 = arith.mulf %399, %370 : vector<2x128xf32>
    %410 = arith.addf %408, %409 : vector<2x128xf32>
    %c6 = arith.constant 6 : index
    %c0_85 = arith.constant 0 : index
    %411 = vector.load %arg15[%c6, %c0_85] : memref<16x128xf32, #tpu.memory_space<vmem>>, vector<2x128xf32>
    tpu.vector_store %arg15[%c6, %c0_85], %410 {strides = array<i32>} : memref<16x128xf32, #tpu.memory_space<vmem>>, vector<2x128xf32>,
    %cst_86 = arith.constant dense<0.000000e+00> : vector<2x768xf32>
    %412 = tpu.matmul %410, %1, %cst_86 {dimension_numbers = #tpu.dot_dimension_numbers<[1], [0], [0], [1], [0, 0, 1, 1], [], []>} : vector<2x128xf32>, vector<128x768xf32>, vector<2x768xf32> -> vector<2x768xf32>
    %c3 = arith.constant 3 : index
    %413 = memref.load %arg0[%c3] : memref<8xf32, #tpu.memory_space<smem>>
    %414 = vector.extract_strided_slice %412 {offsets = [0, 384], sizes = [2, 384], strides = [1, 1]} : vector<2x768xf32> to vector<2x384xf32>
    %415 = arith.addf %414, %10 : vector<2x384xf32>
    %416 = vector.extract_strided_slice %255 {offsets = [6, 0], sizes = [2, 384], strides = [1, 1]} : vector<16x384xf32> to vector<2x384xf32>
    %417 = vector.broadcast %413 : f32 to vector<2x384xf32>
    %418 = arith.mulf %417, %415 : vector<2x384xf32>
    %cst_87 = arith.constant 1.000000e+00 : f32
    %419 = arith.subf %cst_87, %413 : f32
    %420 = vector.broadcast %419 : f32 to vector<2x384xf32>
    %421 = arith.mulf %420, %416 : vector<2x384xf32>
    %422 = arith.addf %418, %421 : vector<2x384xf32>
    %423 = vector.extract_strided_slice %412 {offsets = [0, 0], sizes = [2, 384], strides = [1, 1]} : vector<2x768xf32> to vector<2x384xf32>
    %424 = vector.extract_strided_slice %422 {offsets = [0, 0], sizes = [2, 128], strides = [1, 1]} : vector<2x384xf32> to vector<2x128xf32>
    %425 = vector.extract_strided_slice %423 {offsets = [0, 0], sizes = [2, 128], strides = [1, 1]} : vector<2x384xf32> to vector<2x128xf32>
    %426 = arith.addf %424, %425 : vector<2x128xf32>
    %427 = arith.negf %426 : vector<2x128xf32>
    %428 = math.exp %427 : vector<2x128xf32>
    %cst_88 = arith.constant 1.000000e+00 : f32
    %429 = vector.broadcast %cst_88 : f32 to vector<2x128xf32>
    %430 = arith.addf %429, %428 : vector<2x128xf32>
    %431 = arith.divf %429, %430 : vector<2x128xf32>
    %432 = vector.extract_strided_slice %422 {offsets = [0, 128], sizes = [2, 128], strides = [1, 1]} : vector<2x384xf32> to vector<2x128xf32>
    %433 = vector.extract_strided_slice %423 {offsets = [0, 128], sizes = [2, 128], strides = [1, 1]} : vector<2x384xf32> to vector<2x128xf32>
    %434 = arith.addf %432, %433 : vector<2x128xf32>
    %435 = arith.negf %434 : vector<2x128xf32>
    %436 = math.exp %435 : vector<2x128xf32>
    %cst_89 = arith.constant 1.000000e+00 : f32
    %437 = vector.broadcast %cst_89 : f32 to vector<2x128xf32>
    %438 = arith.addf %437, %436 : vector<2x128xf32>
    %439 = arith.divf %437, %438 : vector<2x128xf32>
    %440 = vector.extract_strided_slice %422 {offsets = [0, 256], sizes = [2, 128], strides = [1, 1]} : vector<2x384xf32> to vector<2x128xf32>
    %441 = vector.extract_strided_slice %423 {offsets = [0, 256], sizes = [2, 128], strides = [1, 1]} : vector<2x384xf32> to vector<2x128xf32>
    %442 = arith.addf %441, %7 : vector<2x128xf32>
    %443 = arith.mulf %431, %442 : vector<2x128xf32>
    %444 = arith.addf %440, %443 : vector<2x128xf32>
    %445 = math.tanh %444 : vector<2x128xf32>
    %cst_90 = arith.constant 1.000000e+00 : f32
    %446 = vector.broadcast %cst_90 : f32 to vector<2x128xf32>
    %447 = arith.subf %446, %439 : vector<2x128xf32>
    %448 = arith.mulf %447, %445 : vector<2x128xf32>
    %449 = arith.mulf %439, %410 : vector<2x128xf32>
    %450 = arith.addf %448, %449 : vector<2x128xf32>
    %c8 = arith.constant 8 : index
    %c0_91 = arith.constant 0 : index
    %451 = vector.load %arg15[%c8, %c0_91] : memref<16x128xf32, #tpu.memory_space<vmem>>, vector<2x128xf32>
    tpu.vector_store %arg15[%c8, %c0_91], %450 {strides = array<i32>} : memref<16x128xf32, #tpu.memory_space<vmem>>, vector<2x128xf32>,
    %cst_92 = arith.constant dense<0.000000e+00> : vector<2x768xf32>
    %452 = tpu.matmul %450, %1, %cst_92 {dimension_numbers = #tpu.dot_dimension_numbers<[1], [0], [0], [1], [0, 0, 1, 1], [], []>} : vector<2x128xf32>, vector<128x768xf32>, vector<2x768xf32> -> vector<2x768xf32>
    %c4_93 = arith.constant 4 : index
    %453 = memref.load %arg0[%c4_93] : memref<8xf32, #tpu.memory_space<smem>>
    %454 = vector.extract_strided_slice %452 {offsets = [0, 384], sizes = [2, 384], strides = [1, 1]} : vector<2x768xf32> to vector<2x384xf32>
    %455 = arith.addf %454, %10 : vector<2x384xf32>
    %456 = vector.extract_strided_slice %255 {offsets = [8, 0], sizes = [2, 384], strides = [1, 1]} : vector<16x384xf32> to vector<2x384xf32>
    %457 = vector.broadcast %453 : f32 to vector<2x384xf32>
    %458 = arith.mulf %457, %455 : vector<2x384xf32>
    %cst_94 = arith.constant 1.000000e+00 : f32
    %459 = arith.subf %cst_94, %453 : f32
    %460 = vector.broadcast %459 : f32 to vector<2x384xf32>
    %461 = arith.mulf %460, %456 : vector<2x384xf32>
    %462 = arith.addf %458, %461 : vector<2x384xf32>
    %463 = vector.extract_strided_slice %452 {offsets = [0, 0], sizes = [2, 384], strides = [1, 1]} : vector<2x768xf32> to vector<2x384xf32>
    %464 = vector.extract_strided_slice %462 {offsets = [0, 0], sizes = [2, 128], strides = [1, 1]} : vector<2x384xf32> to vector<2x128xf32>
    %465 = vector.extract_strided_slice %463 {offsets = [0, 0], sizes = [2, 128], strides = [1, 1]} : vector<2x384xf32> to vector<2x128xf32>
    %466 = arith.addf %464, %465 : vector<2x128xf32>
    %467 = arith.negf %466 : vector<2x128xf32>
    %468 = math.exp %467 : vector<2x128xf32>
    %cst_95 = arith.constant 1.000000e+00 : f32
    %469 = vector.broadcast %cst_95 : f32 to vector<2x128xf32>
    %470 = arith.addf %469, %468 : vector<2x128xf32>
    %471 = arith.divf %469, %470 : vector<2x128xf32>
    %472 = vector.extract_strided_slice %462 {offsets = [0, 128], sizes = [2, 128], strides = [1, 1]} : vector<2x384xf32> to vector<2x128xf32>
    %473 = vector.extract_strided_slice %463 {offsets = [0, 128], sizes = [2, 128], strides = [1, 1]} : vector<2x384xf32> to vector<2x128xf32>
    %474 = arith.addf %472, %473 : vector<2x128xf32>
    %475 = arith.negf %474 : vector<2x128xf32>
    %476 = math.exp %475 : vector<2x128xf32>
    %cst_96 = arith.constant 1.000000e+00 : f32
    %477 = vector.broadcast %cst_96 : f32 to vector<2x128xf32>
    %478 = arith.addf %477, %476 : vector<2x128xf32>
    %479 = arith.divf %477, %478 : vector<2x128xf32>
    %480 = vector.extract_strided_slice %462 {offsets = [0, 256], sizes = [2, 128], strides = [1, 1]} : vector<2x384xf32> to vector<2x128xf32>
    %481 = vector.extract_strided_slice %463 {offsets = [0, 256], sizes = [2, 128], strides = [1, 1]} : vector<2x384xf32> to vector<2x128xf32>
    %482 = arith.addf %481, %7 : vector<2x128xf32>
    %483 = arith.mulf %471, %482 : vector<2x128xf32>
    %484 = arith.addf %480, %483 : vector<2x128xf32>
    %485 = math.tanh %484 : vector<2x128xf32>
    %cst_97 = arith.constant 1.000000e+00 : f32
    %486 = vector.broadcast %cst_97 : f32 to vector<2x128xf32>
    %487 = arith.subf %486, %479 : vector<2x128xf32>
    %488 = arith.mulf %487, %485 : vector<2x128xf32>
    %489 = arith.mulf %479, %450 : vector<2x128xf32>
    %490 = arith.addf %488, %489 : vector<2x128xf32>
    %c10 = arith.constant 10 : index
    %c0_98 = arith.constant 0 : index
    %491 = vector.load %arg15[%c10, %c0_98] : memref<16x128xf32, #tpu.memory_space<vmem>>, vector<2x128xf32>
    tpu.vector_store %arg15[%c10, %c0_98], %490 {strides = array<i32>} : memref<16x128xf32, #tpu.memory_space<vmem>>, vector<2x128xf32>,
    %cst_99 = arith.constant dense<0.000000e+00> : vector<2x768xf32>
    %492 = tpu.matmul %490, %1, %cst_99 {dimension_numbers = #tpu.dot_dimension_numbers<[1], [0], [0], [1], [0, 0, 1, 1], [], []>} : vector<2x128xf32>, vector<128x768xf32>, vector<2x768xf32> -> vector<2x768xf32>
    %c5 = arith.constant 5 : index
    %493 = memref.load %arg0[%c5] : memref<8xf32, #tpu.memory_space<smem>>
    %494 = vector.extract_strided_slice %492 {offsets = [0, 384], sizes = [2, 384], strides = [1, 1]} : vector<2x768xf32> to vector<2x384xf32>
    %495 = arith.addf %494, %10 : vector<2x384xf32>
    %496 = vector.extract_strided_slice %255 {offsets = [10, 0], sizes = [2, 384], strides = [1, 1]} : vector<16x384xf32> to vector<2x384xf32>
    %497 = vector.broadcast %493 : f32 to vector<2x384xf32>
    %498 = arith.mulf %497, %495 : vector<2x384xf32>
    %cst_100 = arith.constant 1.000000e+00 : f32
    %499 = arith.subf %cst_100, %493 : f32
    %500 = vector.broadcast %499 : f32 to vector<2x384xf32>
    %501 = arith.mulf %500, %496 : vector<2x384xf32>
    %502 = arith.addf %498, %501 : vector<2x384xf32>
    %503 = vector.extract_strided_slice %492 {offsets = [0, 0], sizes = [2, 384], strides = [1, 1]} : vector<2x768xf32> to vector<2x384xf32>
    %504 = vector.extract_strided_slice %502 {offsets = [0, 0], sizes = [2, 128], strides = [1, 1]} : vector<2x384xf32> to vector<2x128xf32>
    %505 = vector.extract_strided_slice %503 {offsets = [0, 0], sizes = [2, 128], strides = [1, 1]} : vector<2x384xf32> to vector<2x128xf32>
    %506 = arith.addf %504, %505 : vector<2x128xf32>
    %507 = arith.negf %506 : vector<2x128xf32>
    %508 = math.exp %507 : vector<2x128xf32>
    %cst_101 = arith.constant 1.000000e+00 : f32
    %509 = vector.broadcast %cst_101 : f32 to vector<2x128xf32>
    %510 = arith.addf %509, %508 : vector<2x128xf32>
    %511 = arith.divf %509, %510 : vector<2x128xf32>
    %512 = vector.extract_strided_slice %502 {offsets = [0, 128], sizes = [2, 128], strides = [1, 1]} : vector<2x384xf32> to vector<2x128xf32>
    %513 = vector.extract_strided_slice %503 {offsets = [0, 128], sizes = [2, 128], strides = [1, 1]} : vector<2x384xf32> to vector<2x128xf32>
    %514 = arith.addf %512, %513 : vector<2x128xf32>
    %515 = arith.negf %514 : vector<2x128xf32>
    %516 = math.exp %515 : vector<2x128xf32>
    %cst_102 = arith.constant 1.000000e+00 : f32
    %517 = vector.broadcast %cst_102 : f32 to vector<2x128xf32>
    %518 = arith.addf %517, %516 : vector<2x128xf32>
    %519 = arith.divf %517, %518 : vector<2x128xf32>
    %520 = vector.extract_strided_slice %502 {offsets = [0, 256], sizes = [2, 128], strides = [1, 1]} : vector<2x384xf32> to vector<2x128xf32>
    %521 = vector.extract_strided_slice %503 {offsets = [0, 256], sizes = [2, 128], strides = [1, 1]} : vector<2x384xf32> to vector<2x128xf32>
    %522 = arith.addf %521, %7 : vector<2x128xf32>
    %523 = arith.mulf %511, %522 : vector<2x128xf32>
    %524 = arith.addf %520, %523 : vector<2x128xf32>
    %525 = math.tanh %524 : vector<2x128xf32>
    %cst_103 = arith.constant 1.000000e+00 : f32
    %526 = vector.broadcast %cst_103 : f32 to vector<2x128xf32>
    %527 = arith.subf %526, %519 : vector<2x128xf32>
    %528 = arith.mulf %527, %525 : vector<2x128xf32>
    %529 = arith.mulf %519, %490 : vector<2x128xf32>
    %530 = arith.addf %528, %529 : vector<2x128xf32>
    %c12 = arith.constant 12 : index
    %c0_104 = arith.constant 0 : index
    %531 = vector.load %arg15[%c12, %c0_104] : memref<16x128xf32, #tpu.memory_space<vmem>>, vector<2x128xf32>
    tpu.vector_store %arg15[%c12, %c0_104], %530 {strides = array<i32>} : memref<16x128xf32, #tpu.memory_space<vmem>>, vector<2x128xf32>,
    %cst_105 = arith.constant dense<0.000000e+00> : vector<2x768xf32>
    %532 = tpu.matmul %530, %1, %cst_105 {dimension_numbers = #tpu.dot_dimension_numbers<[1], [0], [0], [1], [0, 0, 1, 1], [], []>} : vector<2x128xf32>, vector<128x768xf32>, vector<2x768xf32> -> vector<2x768xf32>
    %c6_106 = arith.constant 6 : index
    %533 = memref.load %arg0[%c6_106] : memref<8xf32, #tpu.memory_space<smem>>
    %534 = vector.extract_strided_slice %532 {offsets = [0, 384], sizes = [2, 384], strides = [1, 1]} : vector<2x768xf32> to vector<2x384xf32>
    %535 = arith.addf %534, %10 : vector<2x384xf32>
    %536 = vector.extract_strided_slice %255 {offsets = [12, 0], sizes = [2, 384], strides = [1, 1]} : vector<16x384xf32> to vector<2x384xf32>
    %537 = vector.broadcast %533 : f32 to vector<2x384xf32>
    %538 = arith.mulf %537, %535 : vector<2x384xf32>
    %cst_107 = arith.constant 1.000000e+00 : f32
    %539 = arith.subf %cst_107, %533 : f32
    %540 = vector.broadcast %539 : f32 to vector<2x384xf32>
    %541 = arith.mulf %540, %536 : vector<2x384xf32>
    %542 = arith.addf %538, %541 : vector<2x384xf32>
    %543 = vector.extract_strided_slice %532 {offsets = [0, 0], sizes = [2, 384], strides = [1, 1]} : vector<2x768xf32> to vector<2x384xf32>
    %544 = vector.extract_strided_slice %542 {offsets = [0, 0], sizes = [2, 128], strides = [1, 1]} : vector<2x384xf32> to vector<2x128xf32>
    %545 = vector.extract_strided_slice %543 {offsets = [0, 0], sizes = [2, 128], strides = [1, 1]} : vector<2x384xf32> to vector<2x128xf32>
    %546 = arith.addf %544, %545 : vector<2x128xf32>
    %547 = arith.negf %546 : vector<2x128xf32>
    %548 = math.exp %547 : vector<2x128xf32>
    %cst_108 = arith.constant 1.000000e+00 : f32
    %549 = vector.broadcast %cst_108 : f32 to vector<2x128xf32>
    %550 = arith.addf %549, %548 : vector<2x128xf32>
    %551 = arith.divf %549, %550 : vector<2x128xf32>
    %552 = vector.extract_strided_slice %542 {offsets = [0, 128], sizes = [2, 128], strides = [1, 1]} : vector<2x384xf32> to vector<2x128xf32>
    %553 = vector.extract_strided_slice %543 {offsets = [0, 128], sizes = [2, 128], strides = [1, 1]} : vector<2x384xf32> to vector<2x128xf32>
    %554 = arith.addf %552, %553 : vector<2x128xf32>
    %555 = arith.negf %554 : vector<2x128xf32>
    %556 = math.exp %555 : vector<2x128xf32>
    %cst_109 = arith.constant 1.000000e+00 : f32
    %557 = vector.broadcast %cst_109 : f32 to vector<2x128xf32>
    %558 = arith.addf %557, %556 : vector<2x128xf32>
    %559 = arith.divf %557, %558 : vector<2x128xf32>
    %560 = vector.extract_strided_slice %542 {offsets = [0, 256], sizes = [2, 128], strides = [1, 1]} : vector<2x384xf32> to vector<2x128xf32>
    %561 = vector.extract_strided_slice %543 {offsets = [0, 256], sizes = [2, 128], strides = [1, 1]} : vector<2x384xf32> to vector<2x128xf32>
    %562 = arith.addf %561, %7 : vector<2x128xf32>
    %563 = arith.mulf %551, %562 : vector<2x128xf32>
    %564 = arith.addf %560, %563 : vector<2x128xf32>
    %565 = math.tanh %564 : vector<2x128xf32>
    %cst_110 = arith.constant 1.000000e+00 : f32
    %566 = vector.broadcast %cst_110 : f32 to vector<2x128xf32>
    %567 = arith.subf %566, %559 : vector<2x128xf32>
    %568 = arith.mulf %567, %565 : vector<2x128xf32>
    %569 = arith.mulf %559, %530 : vector<2x128xf32>
    %570 = arith.addf %568, %569 : vector<2x128xf32>
    %c14 = arith.constant 14 : index
    %c0_111 = arith.constant 0 : index
    %571 = vector.load %arg15[%c14, %c0_111] : memref<16x128xf32, #tpu.memory_space<vmem>>, vector<2x128xf32>
    tpu.vector_store %arg15[%c14, %c0_111], %570 {strides = array<i32>} : memref<16x128xf32, #tpu.memory_space<vmem>>, vector<2x128xf32>,
    %c0_112 = arith.constant 0 : index
    %c0_113 = arith.constant 0 : index
    %572 = vector.load %arg15[%c0_112, %c0_113] : memref<16x128xf32, #tpu.memory_space<vmem>>, vector<16x128xf32>
    %c0_114 = arith.constant 0 : index
    %c0_115 = arith.constant 0 : index
    %573 = vector.load %arg12[%c0_114, %c0_115] : memref<128x2xf32, #tpu.memory_space<vmem>>, vector<128x2xf32>
    %cst_116 = arith.constant dense<0.000000e+00> : vector<16x2xf32>
    %574 = tpu.matmul %572, %573, %cst_116 {dimension_numbers = #tpu.dot_dimension_numbers<[1], [0], [0], [1], [0, 0, 1, 1], [], []>} : vector<16x128xf32>, vector<128x2xf32>, vector<16x2xf32> -> vector<16x2xf32>
    %c0_117 = arith.constant 0 : index
    %c0_118 = arith.constant 0 : index
    %575 = vector.load %arg13[%c0_117, %c0_118] : memref<1x2xf32, #tpu.memory_space<vmem>>, vector<1x2xf32>
    %576 = vector.broadcast %575 : vector<1x2xf32> to vector<16x2xf32>
    %577 = arith.addf %574, %576 : vector<16x2xf32>
    %c0_119 = arith.constant 0 : index
    %c0_120 = arith.constant 0 : index
    %578 = vector.load %arg14[%c0_119, %c0_120] : memref<16x2xf32, #tpu.memory_space<vmem>>, vector<16x2xf32>
    tpu.vector_store %arg14[%c0_119, %c0_120], %577 {strides = array<i32>} : memref<16x2xf32, #tpu.memory_space<vmem>>, vector<16x2xf32>,
    return
  }
}

</mosaic_0001>

<bundles_post_ra>
// kernel: tpu_custom_call.1
= control target key start
LH: loop header
LB: loop body
LE: loop exit
PB: predicated region body
PF: predicated region fallthrough
CT: control target
= control target key end

     0   :  { %19 = vsyncpa [#allocation5], 0  ;;  %s7541_s0 = inlined_call_operand.vmem [shape: f32[8], index: 0, kind: input, shape index: {}]   ;;  %s7542_s1 = inlined_call_operand.vmem [shape: f32[16,2], index: 1, kind: input, shape index: {}]   ;;  %s7543_s2 = inlined_call_operand.vmem [shape: f32[16,2], index: 2, kind: input, shape index: {}]   ;;  %s7544_s3 = inlined_call_operand.vmem [shape: f32[2,384], index: 3, kind: input, shape index: {}]   ;;  %s7545_s4 = inlined_call_operand.hbm [shape: f32[128,384], index: 4, kind: input, shape index: {}]   ;;  %s7546_s5 = inlined_call_operand.vmem [shape: f32[1,384], index: 5, kind: input, shape index: {}]   ;;  %s7547_s6 = inlined_call_operand.vmem [shape: f32[1,128], index: 6, kind: input, shape index: {}]   ;;  %s7548_s7 = inlined_call_operand.vmem [shape: f32[2,384], index: 7, kind: input, shape index: {}]   ;;  %s7549_s8 = inlined_call_operand.hbm [shape: f32[128,768], index: 8, kind: input, shape index: {}]   ;;  %s7550_s9 = inlined_call_operand.vmem [shape: f32[1,384], index: 9, kind: input, shape index: {}]   ;;  %s7551_s10 = inlined_call_operand.vmem [shape: f32[1,128], index: 10, kind: input, shape index: {}]   ;;  %s7552_s11 = inlined_call_operand.vmem [shape: f32[1,384], index: 11, kind: input, shape index: {}]   ;;  %s7553_s12 = inlined_call_operand.vmem [shape: f32[128,2], index: 12, kind: input, shape index: {}]   ;;  %s7554_s13 = inlined_call_operand.vmem [shape: f32[1,2], index: 13, kind: input, shape index: {}]   ;;  %s7555_s14 = inlined_call_operand.vmem [shape: f32[16,2], index: 14, kind: output, shape index: {}]  }
   0x1   :  { %20 = vsyncpa [#allocation4], 0  ;;  %s28_s15 = sshll.u32 %s7541_s0, 4  ;;  %s29_s15 = int_to_ptr.vmem [resolvable:$true] %s28_s15 }
   0x2   :  { %21 = vsyncpa [#allocation8], 0  ;;  %s5163_s16 = scalar_lea.vmem %s29_s15, 16  ;;  %p5168_p1 = scmp.lt.s32.totalorder %s29_s15, %s29_s15 }
   0x3   :  { %p5164_p0 = scmp.ne.s32.totalorder %s29_s15, %s5163_s16  ;;  %p5169_p2 = scmp.lt.s32.totalorder %s5163_s16, %s5163_s16 }
   0x5   :  { %p5170_p3 = por %p5169_p2, %p5168_p1 }
   0x7   :  { %p5171_p4 = pnand %p5170_p3, %p5164_p0 }
   0x9   :  { %5174 = shalt.err (!%p5171_p4)
}
   0xa   :  { %s5221_s17 = smov [#allocation3]   ;;  %s5222_s18 = smov [#allocation6]  }
   0xb   :  { %31 = dma.vmem_to_smem %s29_s15, 16, %s5221_s17, [#allocation5]  }
   0xc   :  { %s43_s19 = sshll.u32 %s5222_s18, 4  ;;  %s44_s19 = int_to_ptr.vmem [resolvable:$true] %s43_s19 }
   0xd   :  { %s5183_s20 = scalar_lea.vmem %s44_s19, 6144  ;;  %p5188_p6 = scmp.lt.s32.totalorder %s44_s19, %s44_s19 }
   0xe   :  { %p5184_p5 = scmp.ne.s32.totalorder %s44_s19, %s5183_s20  ;;  %p5189_p7 = scmp.lt.s32.totalorder %s5183_s20, %s5183_s20 }
  0x10   :  { %p5190_p8 = por %p5189_p7, %p5188_p6 }
  0x12   :  { %p5191_p9 = pnand %p5190_p8, %p5184_p5 }
  0x14   :  { %5194 = shalt.err (!%p5191_p9)
}
  0x15   :  { %s5223_s0 = smov 384   ;;  %s5224_s21 = smov 24  }
  0x16   :  { %49 = dma.hbm_to_vmem [thread:$0]  %s7545_s4, 6144, %s44_s19, [#allocation4], %s5223_s0, %s5223_s0, %s5224_s21  }
  0x17   :  { %s5225_s24 = smov [#allocation7]  }
  0x18   :  { %s61_s25 = sshll.u32 %s5225_s24, 4  ;;  %s62_s25 = int_to_ptr.vmem [resolvable:$true] %s61_s25 }
  0x19   :  { %s5203_s26 = scalar_lea.vmem %s62_s25, 12288  ;;  %p5208_p11 = scmp.lt.s32.totalorder %s62_s25, %s62_s25 }
  0x1a   :  { %p5204_p10 = scmp.ne.s32.totalorder %s62_s25, %s5203_s26  ;;  %p5209_p12 = scmp.lt.s32.totalorder %s5203_s26, %s5203_s26 }
  0x1c   :  { %p5210_p13 = por %p5209_p12, %p5208_p11 }
  0x1e   :  { %p5211_p0 = pnand %p5210_p13, %p5204_p10 }
  0x20   :  { %5214 = shalt.err (!%p5211_p0)
}
  0x21   :  { %s5226_s27 = smov 768   ;;  %s5227_s28 = smov 48  }
  0x22   :  { %67 = dma.hbm_to_vmem [thread:$0]  %s7549_s8, 12288, %s62_s25, [#allocation8], %s5226_s27, %s5226_s27, %s5227_s28  }
  0x23   :  { %5215 = dma.done.wait [#allocation5], 16  }
  0x24   :  { %5216 = vsyncadd [#allocation5], 4294967280 }
  0x25   :  { %5217 = dma.done.wait [#allocation4], 6144  }
  0x26   :  { %5218 = vsyncadd [#allocation4], 4294961152 }
  0x27   :  { %5219 = dma.done.wait [#allocation8], 12288  }
  0x28   :  { %5220 = vsyncadd [#allocation8], 4294955008 }
  0x29   :  { %87 = sfence }
  0x2a   :  { %v248_v0 = vlaneseq  ;;  %v5228_v1 = vmov 1983009808   ;;  %v7556_v3 = vmov 0.0   ;;  %v263_v4 = vld [vmem:[%s7542_s1] sm:$0xff]  ;;  %vm300_vm0 = vcmask 15360   ;;  %v5335_v14 = vld [vmem:[#allocation6 + $0x168] sm:$0xff] }
  0x2b   :  { %v286_v2 = vunpack.c.l.s4 %v5228_v1  ;;  %378 = vmatprep.mubr.f32.mxu0 %v7556_v3  ;;  %v265_v6 = vld [vmem:[%s7544_s3] sm:$0x3f]  ;;  %4507 = vmatprep.mubr.msk.f32.mxu1 %vm300_vm0, %v263_v4  ;;  %vm307_vm1 = vcmask 1041408   ;;  %v264_v15 = vld [vmem:[%s7542_s1 + $0x8] sm:$0xff]  ;;  %v5352_v19 = vld [vmem:[#allocation6 + $0x140] sm:$0xff]  ;;  %vm5230_vm2 = vmmov 0  }
  0x2c   :  { %v5319_v5 = vshrl.u32 %v248_v0, 7  ;;  %v284_v8 = vcombine.high %v265_v6, %v265_v6  ;;  %v5331_v13 = vld [vmem:[#allocation6 + $0x170] sm:$0xff]  ;;  %v5342_v16 = vld [vmem:[#allocation6 + $0x158] sm:$0xff]  ;;  %v5360_v21 = vld [vmem:[#allocation6 + $0x128] sm:$0xff]  ;;  %s2578_s29 = sld [smem:[#allocation3]] }
  0x2d   :  { %v287_v7 = vunpack.c.0.s8 %v286_v2  ;;  %7850 = vst [vmem:[#allocation13_spill] sm:$0xff] %v5331_v13  ;;  %v5345_v17 = vld [vmem:[#allocation6 + $0x178] sm:$0xff]  ;;  %v5349_v18 = vld [vmem:[#allocation6 + $0x150] sm:$0xff]  ;;  %v5363_v22 = vld [vmem:[#allocation6 + $0x160] sm:$0xff]  ;;  %s4327_s16 = sld [smem:[#allocation3 + $0x2]] }
  0x2e   :  { %v5356_v20 = vld [vmem:[#allocation6 + $0x138] sm:$0xff]  ;;  %v5366_v23 = vld [vmem:[#allocation6 + $0x120] sm:$0xff]  ;;  %v5370_v24 = vld [vmem:[#allocation6 + $0x110] sm:$0xff]  ;;  %v5576_v62 = vsub.s32 2, %v5319_v5  ;;  %v5583_v1 = vsub.s32 0, %v5319_v5  ;;  %s4330_s17 = sld [smem:[#allocation3 + $0x3]] }
  0x2f   :  { %v5326_v9 = vsub.s32 %v287_v7, %v5319_v5  ;;  %v5373_v25 = vld [vmem:[#allocation6 + $0x148] sm:$0xff]  ;;  %v5380_v27 = vld [vmem:[#allocation6 + $0xf8] sm:$0xff]  ;;  %v5383_v28 = vld [vmem:[#allocation6 + $0x130] sm:$0xff]  ;;  %v5588_v7 = vsub.s32 1, %v5319_v5  ;;  %s4336_s0 = sld [smem:[#allocation3 + $0x5]] }
  0x30   :  { %v5376_v26 = vld [vmem:[#allocation6 + $0x108] sm:$0xff]  ;;  %v5386_v29 = vld [vmem:[#allocation6 + $0xf0] sm:$0xff]  ;;  %v5390_v30 = vld [vmem:[#allocation6 + $0xe0] sm:$0xff]  ;;  %7857 = vst [vmem:[#allocation20_spill] sm:$0xff] %v5576_v62 }
  0x31   :  { %7849 = vst [vmem:[#allocation12_spill] sm:$0xff] %v5326_v9  ;;  %v291_v10 = vrot.slane %v265_v6, %v5326_v9  ;;  %v298_v11 = vrot.slane %v284_v8, %v5326_v9  ;;  %v5393_v31 = vld [vmem:[#allocation6 + $0x118] sm:$0xff]  ;;  %v5400_v33 = vld [vmem:[#allocation6 + $0xc8] sm:$0xff]  ;;  %v5403_v34 = vld [vmem:[#allocation6 + $0x100] sm:$0xff] }
  0x32   :  { %v5396_v32 = vld [vmem:[#allocation6 + $0xd8] sm:$0xff]  ;;  %v5406_v35 = vld [vmem:[#allocation6 + $0xc0] sm:$0xff]  ;;  %v5410_v36 = vld [vmem:[#allocation6 + $0xb0] sm:$0xff]  ;;  %7858 = vst [vmem:[#allocation21_spill] sm:$0xff] %v5583_v1  ;;  %s2586_s15 = ssub.f32 1.0, %s2578_s29 }
  0x33   :  { %v299_v12 = vcombine.high %v291_v10, %v291_v10  ;;  %4505 = vmatprep.subr.msk.mxu1 %vm307_vm1, %v298_v11  ;;  %v5413_v37 = vld [vmem:[#allocation6 + $0xe8] sm:$0xff]  ;;  %v5420_v39 = vld [vmem:[#allocation6 + $0x98] sm:$0xff]  ;;  %v5423_v40 = vld [vmem:[#allocation6 + $0xd0] sm:$0xff]  ;;  %7860 = vst [vmem:[#allocation23_spill] sm:$0xff] %v5588_v7  ;;  %s3099_s3 = ssub.f32 1.0, %s4327_s16 }
  0x34   :  { %4506 = vmatpush3.msk.msra.mxu1 %vm307_vm1, %v298_v11  ;;  %v5416_v38 = vld [vmem:[#allocation6 + $0xa8] sm:$0xff]  ;;  %v5426_v41 = vld [vmem:[#allocation6 + $0x90] sm:$0xff]  ;;  %v5430_v42 = vld [vmem:[#allocation6 + $0x80] sm:$0xff]  ;;  %s3360_s18 = ssub.f32 1.0, %s4330_s17 }
  0x35   :  { %4285 = vmatprep.subr.msk.mxu0 %vm307_vm1, %v299_v12  ;;  %4510 = vmatprep.subr.mxu1 %v7556_v3  ;;  %v5433_v43 = vld [vmem:[#allocation6 + $0xb8] sm:$0xff]  ;;  %v5440_v45 = vld [vmem:[#allocation6 + $0x68] sm:$0xff]  ;;  %v5443_v46 = vld [vmem:[#allocation6 + $0xa0] sm:$0xff]  ;;  %s3873_s21 = ssub.f32 1.0, %s4336_s0 }
  0x36   :  { %4286 = vmatpush1.msk.msra.mxu0 %vm307_vm1, %v291_v10  ;;  %4508 = vmatmul.mubr.msk.f32.vlgmr.msra.gmra.mxu1 %vm300_vm0, %v264_v15  ;;  %v5436_v44 = vld [vmem:[#allocation6 + $0x78] sm:$0xff]  ;;  %v5446_v47 = vld [vmem:[#allocation6 + $0x60] sm:$0xff]  ;;  %v5450_v48 = vld [vmem:[#allocation6 + $0x50] sm:$0xff] }
  0x37   :  { %4287 = vmatmul.mubr.msk.f32.vlgmr.msra.gmra.mxu0 %vm300_vm0, %v263_v4  ;;  %466 = vmatprep.subr.mxu0 %v5331_v13  ;;  %v5453_v49 = vld [vmem:[#allocation6 + $0x88] sm:$0xff]  ;;  %v5460_v51 = vld [vmem:[#allocation6 + $0x38] sm:$0xff]  ;;  %v5463_v52 = vld [vmem:[#allocation6 + $0x70] sm:$0xff] }
  0x38   :  { %467 = vmatpush1.msra.mxu0 %v5335_v14  ;;  %384 = vmatprep.mubr.f32.mxu0 %v7556_v3  ;;  %v5456_v50 = vld [vmem:[#allocation6 + $0x48] sm:$0xff]  ;;  %v5466_v53 = vld [vmem:[#allocation6 + $0x30] sm:$0xff]  ;;  %v5470_v54 = vld [vmem:[#allocation6 + $0x20] sm:$0xff] }
  0x39   :  { %468 = vmatprep.subr.mxu0 %v5342_v16  ;;  %4511 = vmatpush3.msra.mxu1 %v5345_v17  ;;  %7851 = vst [vmem:[#allocation14_spill] sm:$0xff] %v5470_v54  ;;  %v5473_v55 = vld [vmem:[#allocation6 + $0x58] sm:$0xff]  ;;  %v5480_v57 = vld [vmem:[#allocation6 + $0x8] sm:$0xff]  ;;  %v5483_v58 = vld [vmem:[#allocation6 + $0x40] sm:$0xff] }
  0x3a   :  { %469 = vmatpush1.msra.mxu0 %v5349_v18  ;;  %4512 = vmatprep.subr.mxu1 %v7556_v3  ;;  %v5476_v56 = vld [vmem:[#allocation6 + $0x18] sm:$0xff]  ;;  %7853 = vst [vmem:[#allocation16_spill] sm:$0xff] %v5480_v57  ;;  %v5486_v59 = vld [vmem:[#allocation6] sm:$0xff]  ;;  %v5491_v60 = vld [vmem:[#allocation6 + $0x28] sm:$0xff] }
  0x3b   :  { %470 = vmatprep.subr.mxu0 %v5352_v19  ;;  %4288 = vmatmul.mubr.msk.f32.gmra.mxu0 %vm300_vm0, %v264_v15  ;;  %7852 = vst [vmem:[#allocation15_spill] sm:$0xff] %v5476_v56  ;;  %7854 = vst [vmem:[#allocation17_spill] sm:$0xff] %v5486_v59  ;;  %v5497_v61 = vld [vmem:[#allocation6 + $0x10] sm:$0xff] }
  0x3c   :  { %471 = vmatpush1.msra.mxu0 %v5356_v20  ;;  %530 = vmatprep.mubr.f32.mxu0 %v7556_v3  ;;  %7855 = vst [vmem:[#allocation18_spill] sm:$0xff] %v5491_v60  ;;  %7856 = vst [vmem:[#allocation19_spill] sm:$0xff] %v5497_v61  ;;  %v266_v63 = vld [vmem:[%s7546_s5] sm:$0x7] }
  0x3d   :  { %472 = vmatprep.subr.mxu0 %v5360_v21  ;;  %4513 = vmatpush3.msra.mxu1 %v5363_v22  ;;  %v279_v0 = vrot.slane %v266_v63, %v5576_v62  ;;  %v271_v10 = vrot.slane %v266_v63, %v5583_v1  ;;  %v275_v12 = vrot.slane %v266_v63, %v5588_v7 }
  0x3e   :  { %473 = vmatpush1.msra.mxu0 %v5366_v23  ;;  %4514 = vmatprep.subr.mxu1 %v7556_v3 }
  0x3f   :  { %474 = vmatprep.subr.mxu0 %v5370_v24  ;;  %4515 = vmatpush3.msra.mxu1 %v5373_v25 }
  0x40   :  { %475 = vmatpush1.msra.mxu0 %v5376_v26  ;;  %4516 = vmatprep.subr.mxu1 %v7556_v3 }
  0x41   :  { %476 = vmatprep.subr.mxu0 %v5380_v27  ;;  %4517 = vmatpush3.msra.mxu1 %v5383_v28 }
  0x42   :  { %477 = vmatpush1.msra.mxu0 %v5386_v29  ;;  %4518 = vmatprep.subr.mxu1 %v7556_v3 }
  0x43   :  { %478 = vmatprep.subr.mxu0 %v5390_v30  ;;  %4519 = vmatpush3.msra.mxu1 %v5393_v31 }
  0x44   :  { %479 = vmatpush1.msra.mxu0 %v5396_v32  ;;  %4520 = vmatprep.subr.mxu1 %v7556_v3 }
  0x45   :  { %480 = vmatprep.subr.mxu0 %v5400_v33  ;;  %4521 = vmatpush3.msra.mxu1 %v5403_v34 }
  0x46   :  { %481 = vmatpush1.msra.mxu0 %v5406_v35  ;;  %4522 = vmatprep.subr.mxu1 %v7556_v3 }
  0x47   :  { %482 = vmatprep.subr.mxu0 %v5410_v36  ;;  %4523 = vmatpush3.msra.mxu1 %v5413_v37 }
  0x48   :  { %483 = vmatpush1.msra.mxu0 %v5416_v38  ;;  %4524 = vmatprep.subr.mxu1 %v7556_v3 }
  0x49   :  { %484 = vmatprep.subr.mxu0 %v5420_v39  ;;  %4525 = vmatpush3.msra.mxu1 %v5423_v40 }
  0x4a   :  { %485 = vmatpush1.msra.mxu0 %v5426_v41  ;;  %4526 = vmatprep.subr.mxu1 %v7556_v3 }
  0x4b   :  { %486 = vmatprep.subr.mxu0 %v5430_v42  ;;  %4527 = vmatpush3.msra.mxu1 %v5433_v43 }
  0x4c   :  { %487 = vmatpush1.msra.mxu0 %v5436_v44  ;;  %4528 = vmatprep.subr.mxu1 %v7556_v3 }
  0x4d   :  { %488 = vmatprep.subr.mxu0 %v5440_v45  ;;  %4529 = vmatpush3.msra.mxu1 %v5443_v46 }
  0x4e   :  { %489 = vmatpush1.msra.mxu0 %v5446_v47  ;;  %4530 = vmatprep.subr.mxu1 %v7556_v3 }
  0x4f   :  { %490 = vmatprep.subr.mxu0 %v5450_v48  ;;  %4531 = vmatpush3.msra.mxu1 %v5453_v49 }
  0x50   :  { %491 = vmatpush1.msra.mxu0 %v5456_v50  ;;  %4532 = vmatprep.subr.mxu1 %v7556_v3 }
  0x51   :  { %492 = vmatprep.subr.mxu0 %v5460_v51  ;;  %4533 = vmatpush3.msra.mxu1 %v5463_v52 }
  0x52   :  { %493 = vmatpush1.msra.mxu0 %v5466_v53  ;;  %4534 = vmatprep.subr.mxu1 %v7556_v3 }
  0x53   :  { %494 = vmatprep.subr.mxu0 %v5470_v54  ;;  %4535 = vmatpush3.msra.mxu1 %v5473_v55 }
  0x54   :  { %495 = vmatpush1.msra.mxu0 %v5476_v56  ;;  %4536 = vmatprep.subr.mxu1 %v7556_v3 }
  0x55   :  { %496 = vmatprep.subr.mxu0 %v5480_v57  ;;  %4537 = vmatpush3.msra.mxu1 %v5483_v58 }
  0x56   :  { %497 = vmatpush1.msra.mxu0 %v5486_v59  ;;  %4538 = vmatprep.subr.mxu1 %v7556_v3 }
  0x57   :  { %531 = vmatmul.mubr.f32.vlgmr.msra.gmra.mxu0 %v7556_v3  ;;  %4539 = vmatpush3.msra.mxu1 %v5491_v60 }
  0x58   :  { %4540 = vmatprep.subr.mxu1 %v7556_v3  ;;  %4542 = vmatprep.mubr.msk.f32.mxu1 %vm5230_vm2, %v7556_v3 }
  0x59   :  { %4541 = vmatpush3.msra.mxu1 %v5497_v61  ;;  %629 = vmatprep.subr.mxu0 %v5331_v13 }
  0x5a   :  { %4543 = vmatmul.mubr.f32.vlgmr.msra.gmra.mxu1 %v7556_v3  ;;  %4545 = vmatprep.subr.mxu1 %v7556_v3 }
  0x5b   :  { %630 = vmatpush1.msra.mxu0 %v5335_v14  ;;  %4546 = vmatpush3.msra.mxu1 %v5345_v17 }
  0x5c   :  { %631 = vmatprep.subr.mxu0 %v5342_v16  ;;  %4547 = vmatprep.subr.mxu1 %v7556_v3 }
  0x5d   :  { %632 = vmatpush1.msra.mxu0 %v5349_v18  ;;  %4548 = vmatpush3.msra.mxu1 %v5363_v22 }
  0x5e   :  { %633 = vmatprep.subr.mxu0 %v5352_v19  ;;  %4549 = vmatprep.subr.mxu1 %v7556_v3 }
  0x5f   :  { %634 = vmatpush1.msra.mxu0 %v5356_v20  ;;  %4550 = vmatpush3.msra.mxu1 %v5373_v25 }
  0x60   :  { %635 = vmatprep.subr.mxu0 %v5360_v21  ;;  %4551 = vmatprep.subr.mxu1 %v7556_v3 }
  0x61   :  { %636 = vmatpush1.msra.mxu0 %v5366_v23  ;;  %4552 = vmatpush3.msra.mxu1 %v5383_v28 }
  0x62   :  { %637 = vmatprep.subr.mxu0 %v5370_v24  ;;  %4553 = vmatprep.subr.mxu1 %v7556_v3 }
  0x63   :  { %638 = vmatpush1.msra.mxu0 %v5376_v26  ;;  %4554 = vmatpush3.msra.mxu1 %v5393_v31 }
  0x64   :  { %639 = vmatprep.subr.mxu0 %v5380_v27  ;;  %4555 = vmatprep.subr.mxu1 %v7556_v3 }
  0x65   :  { %640 = vmatpush1.msra.mxu0 %v5386_v29  ;;  %4556 = vmatpush3.msra.mxu1 %v5403_v34 }
  0x66   :  { %641 = vmatprep.subr.mxu0 %v5390_v30  ;;  %4557 = vmatprep.subr.mxu1 %v7556_v3 }
  0x67   :  { %642 = vmatpush1.msra.mxu0 %v5396_v32  ;;  %4558 = vmatpush3.msra.mxu1 %v5413_v37 }
  0x68   :  { %643 = vmatprep.subr.mxu0 %v5400_v33  ;;  %4559 = vmatprep.subr.mxu1 %v7556_v3 }
  0x69   :  { %644 = vmatpush1.msra.mxu0 %v5406_v35  ;;  %4560 = vmatpush3.msra.mxu1 %v5423_v40 }
  0x6a   :  { %645 = vmatprep.subr.mxu0 %v5410_v36  ;;  %4561 = vmatprep.subr.mxu1 %v7556_v3 }
  0x6b   :  { %646 = vmatpush1.msra.mxu0 %v5416_v38  ;;  %4562 = vmatpush3.msra.mxu1 %v5433_v43 }
  0x6c   :  { %647 = vmatprep.subr.mxu0 %v5420_v39  ;;  %4563 = vmatprep.subr.mxu1 %v7556_v3 }
  0x6d   :  { %648 = vmatpush1.msra.mxu0 %v5426_v41  ;;  %4564 = vmatpush3.msra.mxu1 %v5443_v46 }
  0x6e   :  { %649 = vmatprep.subr.mxu0 %v5430_v42  ;;  %4565 = vmatprep.subr.mxu1 %v7556_v3 }
  0x6f   :  { %650 = vmatpush1.msra.mxu0 %v5436_v44  ;;  %4566 = vmatpush3.msra.mxu1 %v5453_v49 }
  0x70   :  { %651 = vmatprep.subr.mxu0 %v5440_v45  ;;  %4567 = vmatprep.subr.mxu1 %v7556_v3 }
  0x71   :  { %652 = vmatpush1.msra.mxu0 %v5446_v47  ;;  %4568 = vmatpush3.msra.mxu1 %v5463_v52 }
  0x72   :  { %653 = vmatprep.subr.mxu0 %v5450_v48  ;;  %4569 = vmatprep.subr.mxu1 %v7556_v3 }
  0x73   :  { %654 = vmatpush1.msra.mxu0 %v5456_v50  ;;  %4570 = vmatpush3.msra.mxu1 %v5473_v55 }
  0x74   :  { %655 = vmatprep.subr.mxu0 %v5460_v51  ;;  %4571 = vmatprep.subr.mxu1 %v7556_v3 }
  0x75   :  { %656 = vmatpush1.msra.mxu0 %v5466_v53  ;;  %4572 = vmatpush3.msra.mxu1 %v5483_v58 }
  0x76   :  { %657 = vmatprep.subr.mxu0 %v5470_v54  ;;  %4573 = vmatprep.subr.mxu1 %v7556_v3 }
  0x77   :  { %658 = vmatpush1.msra.mxu0 %v5476_v56  ;;  %4574 = vmatpush3.msra.mxu1 %v5491_v60 }
  0x78   :  { %659 = vmatprep.subr.mxu0 %v5480_v57  ;;  %4575 = vmatprep.subr.mxu1 %v7556_v3 }
  0x79   :  { %660 = vmatpush1.msra.mxu0 %v5486_v59  ;;  %693 = vmatprep.mubr.f32.mxu0 %v7556_v3 }
  0x7a   :  { %4576 = vmatpush3.msra.mxu1 %v5497_v61  ;;  %4577 = vmatprep.mubr.msk.f32.mxu1 %vm5230_vm2, %v7556_v3 }
  0x7b   :  { %807 = vmatprep.subr.mxu0 %v5331_v13  ;;  %4580 = vmatprep.subr.mxu1 %v7556_v3 }
  0xf6   :  { %v4509_v2 = vpop.f32.mrf.mxu1 }
  0xf7   :  { %v380_v4 = vpop.f32.mrf.mxu0  ;;  %v5585_v6 = vadd.f32 %v4509_v2, %v279_v0 }
  0xf8   :  { %v5596_v9 = vadd.f32 %v380_v4, %v271_v10 }
  0xf9   :  { %7859 = vst [vmem:[#allocation22_spill] sm:$0xff] %v5585_v6  ;;  %v382_v8 = vpop.f32.mrf.mxu0  ;;  %v457_v6 = vpop.f32.mrf.mxu1 }
  0xfa   :  { %v5599_v57 = vadd.f32 %v382_v8, %v275_v12 }
  0xfb   :  { %v386_v11 = vpop.f32.mrf.mxu0 }
  0xfc   :  { %v5592_v15 = vadd.f32 %v386_v11, %v271_v10 }
  0xfd   :  { %v388_v3 = vpop.f32.mrf.mxu0 }
  0xfe   :  { %7861 = vst [vmem:[#allocation24_spill] sm:$0xff] %v5592_v15  ;;  %v5594_v62 = vadd.f32 %v388_v3, %v275_v12  ;;  %v5608_v12 = vadd.f32 %v457_v6, %v279_v0  ;;  %v7863_v0 = vmov 0.0   ;;  %v7864_v6 = vld [vmem:[#allocation16_spill] sm:$0xff] }
 0x100   :  { %7862 = vst [vmem:[#allocation25_spill] sm:$0xff] %v5594_v62 }
 0x117   :  { %v532_v13 = vpop.f32.mrf.mxu0 }
 0x118   :  { %v607_v2 = vadd.f32 %v532_v13, %v5596_v9  ;;  %v5605_v13 = vld [vmem:[%s7547_s6] ss:$0 sm:$0xff] }
 0x119   :  { %v534_v59 = vpop.f32.mrf.mxu0 }
 0x11a   :  { %v4292_v61 = vmul.f32 -1.442695, %v607_v2  ;;  %v603_v5 = vpop.f32.mrf.mxu1  ;;  %v614_v63 = vadd.f32 %v534_v59, %v5599_v57 }
 0x11b   :  { %v621_v2 = vadd.f32 %v5605_v13, %v603_v5  ;;  %v7865_v5 = vld [vmem:[#allocation17_spill] sm:$0xff] }
 0x11c   :  { %4847 = vpow2.f32 %v4292_v61  ;;  %v4544_v1 = vpop.f32.mrf.mxu1  ;;  %v4293_v11 = vmul.f32 -1.442695, %v614_v63 }
 0x11e   :  { %4849 = vpow2.f32 %v4293_v11 }
 0x129   :  { %v4848_v7 = vpop.eup %4847 }
 0x12a   :  { %v611_v3 = vadd.f32 1.0, %v4848_v7 }
 0x12b   :  { %v4850_v4 = vpop.eup %4849 }
 0x12c   :  { %4851 = vrcp.f32 %v611_v3  ;;  %v618_v10 = vadd.f32 1.0, %v4850_v4  ;;  %v7866_v4 = vld [vmem:[#allocation19_spill] sm:$0xff] }
 0x12e   :  { %4853 = vrcp.f32 %v618_v10  ;;  %v7867_v10 = vld [vmem:[#allocation13_spill] sm:$0xff] }
 0x139   :  { %v4852_v8 = vpop.eup %4851 }
 0x13a   :  { %v622_v61 = vmul.f32 %v4852_v8, %v621_v2 }
 0x13b   :  { %v4854_v1 = vpop.eup %4853 }
 0x13c   :  { %v623_v59 = vadd.f32 %v622_v61, %v5608_v12  ;;  %v625_v7 = vsub.f32 1.0, %v4854_v1  ;;  %v627_v3 = vmul.f32 0.0, %v4854_v1 }
 0x13e   :  { %4855 = vtanh.f32 %v623_v59 }
 0x14b   :  { %v4856_v63 = vpop.eup %4855 }
 0x14c   :  { %v626_v11 = vmul.f32 %v4856_v63, %v625_v7 }
 0x14e   :  { %v5611_v62 = vadd.f32 %v627_v3, %v626_v11 }
 0x150   :  { %694 = vmatmul.mubr.f32.vlgmr.msra.gmra.mxu0 %v5611_v62  ;;  %4578 = vmatmul.mubr.f32.vlgmr.msra.gmra.mxu1 %v5611_v62 }
 0x151   :  { %808 = vmatpush1.msra.mxu0 %v5335_v14  ;;  %4581 = vmatpush3.msra.mxu1 %v5345_v17 }
 0x152   :  { %809 = vmatprep.subr.mxu0 %v5342_v16  ;;  %4582 = vmatprep.subr.mxu1 %v7863_v0 }
 0x153   :  { %810 = vmatpush1.msra.mxu0 %v5349_v18  ;;  %4583 = vmatpush3.msra.mxu1 %v5363_v22 }
 0x154   :  { %811 = vmatprep.subr.mxu0 %v5352_v19  ;;  %4584 = vmatprep.subr.mxu1 %v7863_v0 }
 0x155   :  { %812 = vmatpush1.msra.mxu0 %v5356_v20  ;;  %4585 = vmatpush3.msra.mxu1 %v5373_v25 }
 0x156   :  { %813 = vmatprep.subr.mxu0 %v5360_v21  ;;  %4586 = vmatprep.subr.mxu1 %v7863_v0 }
 0x157   :  { %814 = vmatpush1.msra.mxu0 %v5366_v23  ;;  %4587 = vmatpush3.msra.mxu1 %v5383_v28 }
 0x158   :  { %815 = vmatprep.subr.mxu0 %v5370_v24  ;;  %4588 = vmatprep.subr.mxu1 %v7863_v0 }
 0x159   :  { %816 = vmatpush1.msra.mxu0 %v5376_v26  ;;  %4589 = vmatpush3.msra.mxu1 %v5393_v31 }
 0x15a   :  { %817 = vmatprep.subr.mxu0 %v5380_v27  ;;  %4590 = vmatprep.subr.mxu1 %v7863_v0 }
 0x15b   :  { %818 = vmatpush1.msra.mxu0 %v5386_v29  ;;  %4591 = vmatpush3.msra.mxu1 %v5403_v34 }
 0x15c   :  { %819 = vmatprep.subr.mxu0 %v5390_v30  ;;  %4592 = vmatprep.subr.mxu1 %v7863_v0 }
 0x15d   :  { %820 = vmatpush1.msra.mxu0 %v5396_v32  ;;  %4593 = vmatpush3.msra.mxu1 %v5413_v37 }
 0x15e   :  { %821 = vmatprep.subr.mxu0 %v5400_v33  ;;  %4594 = vmatprep.subr.mxu1 %v7863_v0 }
 0x15f   :  { %822 = vmatpush1.msra.mxu0 %v5406_v35  ;;  %4595 = vmatpush3.msra.mxu1 %v5423_v40 }
 0x160   :  { %823 = vmatprep.subr.mxu0 %v5410_v36  ;;  %4596 = vmatprep.subr.mxu1 %v7863_v0 }
 0x161   :  { %824 = vmatpush1.msra.mxu0 %v5416_v38  ;;  %4597 = vmatpush3.msra.mxu1 %v5433_v43 }
 0x162   :  { %825 = vmatprep.subr.mxu0 %v5420_v39  ;;  %4598 = vmatprep.subr.mxu1 %v7863_v0 }
 0x163   :  { %826 = vmatpush1.msra.mxu0 %v5426_v41  ;;  %4599 = vmatpush3.msra.mxu1 %v5443_v46 }
 0x164   :  { %827 = vmatprep.subr.mxu0 %v5430_v42  ;;  %4600 = vmatprep.subr.mxu1 %v7863_v0 }
 0x165   :  { %828 = vmatpush1.msra.mxu0 %v5436_v44  ;;  %4601 = vmatpush3.msra.mxu1 %v5453_v49 }
 0x166   :  { %829 = vmatprep.subr.mxu0 %v5440_v45  ;;  %4602 = vmatprep.subr.mxu1 %v7863_v0 }
 0x167   :  { %830 = vmatpush1.msra.mxu0 %v5446_v47  ;;  %4603 = vmatpush3.msra.mxu1 %v5463_v52 }
 0x168   :  { %831 = vmatprep.subr.mxu0 %v5450_v48  ;;  %4604 = vmatprep.subr.mxu1 %v7863_v0 }
 0x169   :  { %832 = vmatpush1.msra.mxu0 %v5456_v50  ;;  %4605 = vmatpush3.msra.mxu1 %v5473_v55 }
 0x16a   :  { %833 = vmatprep.subr.mxu0 %v5460_v51  ;;  %4606 = vmatprep.subr.mxu1 %v7863_v0 }
 0x16b   :  { %834 = vmatpush1.msra.mxu0 %v5466_v53  ;;  %4607 = vmatpush3.msra.mxu1 %v5483_v58 }
 0x16c   :  { %835 = vmatprep.subr.mxu0 %v5470_v54  ;;  %4608 = vmatprep.subr.mxu1 %v7863_v0 }
 0x16d   :  { %836 = vmatpush1.msra.mxu0 %v5476_v56  ;;  %4609 = vmatpush3.msra.mxu1 %v5491_v60 }
 0x16e   :  { %837 = vmatprep.subr.mxu0 %v7864_v6  ;;  %4610 = vmatprep.subr.mxu1 %v7863_v0 }
 0x16f   :  { %838 = vmatpush1.msra.mxu0 %v7865_v5  ;;  %871 = vmatprep.mubr.f32.mxu0 %v7863_v0 }
 0x170   :  { %4611 = vmatpush3.msra.mxu1 %v7866_v4  ;;  %4612 = vmatprep.mubr.msk.f32.mxu1 %vm5230_vm2, %v7863_v0 }
 0x171   :  { %984 = vmatprep.subr.mxu0 %v7867_v10  ;;  %4615 = vmatprep.subr.mxu1 %v7863_v0 }
 0x210   :  { %v695_v2 = vpop.f32.mrf.mxu0  ;;  %v766_v8 = vpop.f32.mrf.mxu1 }
 0x211   :  { %v771_v61 = vrot.slane %v695_v2, 6  ;;  %v790_v6 = vadd.f32 %v5605_v13, %v766_v8  ;;  %v7874_v8 = vld [vmem:[#allocation13_spill] sm:$0xff] }
 0x212   :  { %v697_v59 = vpop.f32.mrf.mxu0  ;;  %v4579_v1 = vpop.f32.mrf.mxu1 }
 0x213   :  { %v773_v7 = vadd.f32 %v771_v61, %v5596_v9  ;;  %v781_v11 = vrot.slane %v697_v59, 6  ;;  %v792_v56 = vrot.slane %v790_v6, 6  ;;  %v800_v1 = vrot.slane %v5611_v62, 6  ;;  %v7871_v62 = vld [vmem:[#allocation16_spill] sm:$0xff]  ;;  %v7872_v6 = vld [vmem:[#allocation17_spill] sm:$0xff] }
 0x215   :  { %v4294_v63 = vmul.f32 -1.442695, %v773_v7  ;;  %v783_v3 = vadd.f32 %v781_v11, %v5599_v57 }
 0x217   :  { %4857 = vpow2.f32 %v4294_v63  ;;  %v4295_v15 = vmul.f32 -1.442695, %v783_v3 }
 0x219   :  { %4859 = vpow2.f32 %v4295_v15 }
 0x224   :  { %v4858_v4 = vpop.eup %4857 }
 0x225   :  { %v777_v5 = vadd.f32 1.0, %v4858_v4 }
 0x226   :  { %v4860_v10 = vpop.eup %4859 }
 0x227   :  { %4861 = vrcp.f32 %v777_v5  ;;  %v787_v60 = vadd.f32 1.0, %v4860_v10  ;;  %v7873_v10 = vld [vmem:[#allocation19_spill] sm:$0xff] }
 0x229   :  { %4863 = vrcp.f32 %v787_v60  ;;  %v7870_v60 = vld [vmem:[#allocation18_spill] sm:$0xff] }
 0x234   :  { %v4862_v2 = vpop.eup %4861 }
 0x235   :  { %v794_v54 = vmul.f32 %v4862_v2, %v792_v56  ;;  %v7869_v56 = vld [vmem:[#allocation15_spill] sm:$0xff] }
 0x236   :  { %v4864_v59 = vpop.eup %4863 }
 0x237   :  { %v795_v61 = vadd.f32 %v794_v54, %v5608_v12  ;;  %v797_v7 = vsub.f32 1.0, %v4864_v59  ;;  %v802_v11 = vmul.f32 %v4864_v59, %v800_v1  ;;  %v7868_v54 = vld [vmem:[#allocation14_spill] sm:$0xff] }
 0x239   :  { %4865 = vtanh.f32 %v795_v61 }
 0x246   :  { %v4866_v63 = vpop.eup %4865 }
 0x247   :  { %v798_v15 = vmul.f32 %v4866_v63, %v797_v7 }
 0x249   :  { %v5687_v4 = vadd.f32 %v802_v11, %v798_v15 }
 0x24b   :  { %v805_v5 = vrot.slane %v5687_v4, 2 }
 0x24d   :  { %872 = vmatmul.mubr.f32.vlgmr.msra.gmra.mxu0 %v805_v5  ;;  %4613 = vmatmul.mubr.f32.vlgmr.msra.gmra.mxu1 %v805_v5 }
 0x24e   :  { %985 = vmatpush1.msra.mxu0 %v5335_v14  ;;  %4616 = vmatpush3.msra.mxu1 %v5345_v17 }
 0x24f   :  { %986 = vmatprep.subr.mxu0 %v5342_v16  ;;  %4617 = vmatprep.subr.mxu1 %v7863_v0 }
 0x250   :  { %987 = vmatpush1.msra.mxu0 %v5349_v18  ;;  %4618 = vmatpush3.msra.mxu1 %v5363_v22 }
 0x251   :  { %988 = vmatprep.subr.mxu0 %v5352_v19  ;;  %4619 = vmatprep.subr.mxu1 %v7863_v0 }
 0x252   :  { %989 = vmatpush1.msra.mxu0 %v5356_v20  ;;  %4620 = vmatpush3.msra.mxu1 %v5373_v25 }
 0x253   :  { %990 = vmatprep.subr.mxu0 %v5360_v21  ;;  %4621 = vmatprep.subr.mxu1 %v7863_v0 }
 0x254   :  { %991 = vmatpush1.msra.mxu0 %v5366_v23  ;;  %4622 = vmatpush3.msra.mxu1 %v5383_v28 }
 0x255   :  { %992 = vmatprep.subr.mxu0 %v5370_v24  ;;  %4623 = vmatprep.subr.mxu1 %v7863_v0 }
 0x256   :  { %993 = vmatpush1.msra.mxu0 %v5376_v26  ;;  %4624 = vmatpush3.msra.mxu1 %v5393_v31 }
 0x257   :  { %994 = vmatprep.subr.mxu0 %v5380_v27  ;;  %4625 = vmatprep.subr.mxu1 %v7863_v0 }
 0x258   :  { %995 = vmatpush1.msra.mxu0 %v5386_v29  ;;  %4626 = vmatpush3.msra.mxu1 %v5403_v34 }
 0x259   :  { %996 = vmatprep.subr.mxu0 %v5390_v30  ;;  %4627 = vmatprep.subr.mxu1 %v7863_v0 }
 0x25a   :  { %997 = vmatpush1.msra.mxu0 %v5396_v32  ;;  %4628 = vmatpush3.msra.mxu1 %v5413_v37 }
 0x25b   :  { %998 = vmatprep.subr.mxu0 %v5400_v33  ;;  %4629 = vmatprep.subr.mxu1 %v7863_v0 }
 0x25c   :  { %999 = vmatpush1.msra.mxu0 %v5406_v35  ;;  %4630 = vmatpush3.msra.mxu1 %v5423_v40 }
 0x25d   :  { %1000 = vmatprep.subr.mxu0 %v5410_v36  ;;  %4631 = vmatprep.subr.mxu1 %v7863_v0 }
 0x25e   :  { %1001 = vmatpush1.msra.mxu0 %v5416_v38  ;;  %4632 = vmatpush3.msra.mxu1 %v5433_v43 }
 0x25f   :  { %1002 = vmatprep.subr.mxu0 %v5420_v39  ;;  %4633 = vmatprep.subr.mxu1 %v7863_v0 }
 0x260   :  { %1003 = vmatpush1.msra.mxu0 %v5426_v41  ;;  %4634 = vmatpush3.msra.mxu1 %v5443_v46 }
 0x261   :  { %1004 = vmatprep.subr.mxu0 %v5430_v42  ;;  %4635 = vmatprep.subr.mxu1 %v7863_v0 }
 0x262   :  { %1005 = vmatpush1.msra.mxu0 %v5436_v44  ;;  %4636 = vmatpush3.msra.mxu1 %v5453_v49 }
 0x263   :  { %1006 = vmatprep.subr.mxu0 %v5440_v45  ;;  %4637 = vmatprep.subr.mxu1 %v7863_v0 }
 0x264   :  { %1007 = vmatpush1.msra.mxu0 %v5446_v47  ;;  %4638 = vmatpush3.msra.mxu1 %v5463_v52 }
 0x265   :  { %1008 = vmatprep.subr.mxu0 %v5450_v48  ;;  %4639 = vmatprep.subr.mxu1 %v7863_v0 }
 0x266   :  { %1009 = vmatpush1.msra.mxu0 %v5456_v50  ;;  %4640 = vmatpush3.msra.mxu1 %v5473_v55 }
 0x267   :  { %1010 = vmatprep.subr.mxu0 %v5460_v51  ;;  %4641 = vmatprep.subr.mxu1 %v7863_v0 }
 0x268   :  { %1011 = vmatpush1.msra.mxu0 %v5466_v53  ;;  %4642 = vmatpush3.msra.mxu1 %v5483_v58 }
 0x269   :  { %1012 = vmatprep.subr.mxu0 %v7868_v54  ;;  %4643 = vmatprep.subr.mxu1 %v7863_v0 }
 0x26a   :  { %1013 = vmatpush1.msra.mxu0 %v7869_v56  ;;  %4644 = vmatpush3.msra.mxu1 %v7870_v60 }
 0x26b   :  { %1014 = vmatprep.subr.mxu0 %v7871_v62  ;;  %4645 = vmatprep.subr.mxu1 %v7863_v0 }
 0x26c   :  { %1015 = vmatpush1.msra.mxu0 %v7872_v6  ;;  %1048 = vmatprep.mubr.f32.mxu0 %v7863_v0 }
 0x26d   :  { %4646 = vmatpush3.msra.mxu1 %v7873_v10  ;;  %4647 = vmatprep.mubr.msk.f32.mxu1 %vm5230_vm2, %v7863_v0 }
 0x26e   :  { %1161 = vmatprep.subr.mxu0 %v7874_v8  ;;  %4650 = vmatprep.subr.mxu1 %v7863_v0 }
 0x30d   :  { %v873_v3 = vpop.f32.mrf.mxu0  ;;  %v944_v2 = vpop.f32.mrf.mxu1 }
 0x30e   :  { %v949_v61 = vrot.slane %v873_v3, 4  ;;  %v968_v62 = vadd.f32 %v5605_v13, %v944_v2 }
 0x30f   :  { %v875_v59 = vpop.f32.mrf.mxu0  ;;  %v4614_v1 = vpop.f32.mrf.mxu1 }
 0x310   :  { %v951_v7 = vadd.f32 %v949_v61, %v5596_v9  ;;  %v959_v15 = vrot.slane %v875_v59, 4  ;;  %v970_v56 = vrot.slane %v968_v62, 4  ;;  %v977_v1 = vrot.slane %v5687_v4, 6 }
 0x312   :  { %v4296_v63 = vmul.f32 -1.442695, %v951_v7  ;;  %v961_v11 = vadd.f32 %v959_v15, %v5599_v57 }
 0x314   :  { %4867 = vpow2.f32 %v4296_v63  ;;  %v4297_v5 = vmul.f32 -1.442695, %v961_v11 }
 0x316   :  { %4869 = vpow2.f32 %v4297_v5  ;;  %v5841_v5 = vld [vmem:[#allocation6 + $0x168] sm:$0xff] }
 0x321   :  { %v4868_v10 = vpop.eup %4867 }
 0x322   :  { %v955_v6 = vadd.f32 1.0, %v4868_v10 }
 0x323   :  { %v4870_v8 = vpop.eup %4869 }
 0x324   :  { %4871 = vrcp.f32 %v955_v6  ;;  %v965_v60 = vadd.f32 1.0, %v4870_v8 }
 0x326   :  { %4873 = vrcp.f32 %v965_v60 }
 0x331   :  { %v4872_v3 = vpop.eup %4871 }
 0x332   :  { %v972_v54 = vmul.f32 %v4872_v3, %v970_v56  ;;  %v5847_v3 = vld [vmem:[#allocation6 + $0x158] sm:$0xff] }
 0x333   :  { %v4874_v59 = vpop.eup %4873 }
 0x334   :  { %v973_v61 = vadd.f32 %v972_v54, %v5608_v12  ;;  %v975_v7 = vsub.f32 1.0, %v4874_v59  ;;  %v979_v11 = vmul.f32 %v4874_v59, %v977_v1  ;;  %v5854_v59 = vld [vmem:[#allocation6 + $0x160] sm:$0xff] }
 0x335   :  { %v5857_v1 = vld [vmem:[#allocation6 + $0x140] sm:$0xff] }
 0x336   :  { %4875 = vtanh.f32 %v973_v61  ;;  %v5851_v61 = vld [vmem:[#allocation6 + $0x150] sm:$0xff] }
 0x343   :  { %v4876_v63 = vpop.eup %4875 }
 0x344   :  { %v976_v15 = vmul.f32 %v4876_v63, %v975_v7  ;;  %v5861_v7 = vld [vmem:[#allocation6 + $0x138] sm:$0xff]  ;;  %v5864_v63 = vld [vmem:[#allocation6 + $0x148] sm:$0xff] }
 0x346   :  { %v5762_v10 = vadd.f32 %v979_v11, %v976_v15  ;;  %v5867_v15 = vld [vmem:[#allocation6 + $0x128] sm:$0xff]  ;;  %v5871_v11 = vld [vmem:[#allocation6 + $0x120] sm:$0xff] }
 0x348   :  { %v982_v6 = vrot.slane %v5762_v10, 4  ;;  %v1154_v54 = vrot.slane %v5762_v10, 6  ;;  %v5874_v10 = vld [vmem:[#allocation6 + $0x130] sm:$0xff] }
 0x34a   :  { %1049 = vmatmul.mubr.f32.vlgmr.msra.gmra.mxu0 %v982_v6  ;;  %4648 = vmatmul.mubr.f32.vlgmr.msra.gmra.mxu1 %v982_v6  ;;  %v5877_v6 = vld [vmem:[#allocation6 + $0x110] sm:$0xff] }
 0x34b   :  { %1162 = vmatpush1.msra.mxu0 %v5335_v14  ;;  %4651 = vmatpush3.msra.mxu1 %v5345_v17  ;;  %v7875_v14 = vld [vmem:[#allocation14_spill] sm:$0xff] }
 0x34c   :  { %1163 = vmatprep.subr.mxu0 %v5342_v16  ;;  %4652 = vmatprep.subr.mxu1 %v7863_v0  ;;  %v7876_v16 = vld [vmem:[#allocation15_spill] sm:$0xff]  ;;  %v7877_v17 = vld [vmem:[#allocation18_spill] sm:$0xff] }
 0x34d   :  { %1164 = vmatpush1.msra.mxu0 %v5349_v18  ;;  %4653 = vmatpush3.msra.mxu1 %v5363_v22  ;;  %v7878_v18 = vld [vmem:[#allocation16_spill] sm:$0xff] }
 0x34e   :  { %1165 = vmatprep.subr.mxu0 %v5352_v19  ;;  %4654 = vmatprep.subr.mxu1 %v7863_v0  ;;  %v7879_v19 = vld [vmem:[#allocation17_spill] sm:$0xff] }
 0x34f   :  { %1166 = vmatpush1.msra.mxu0 %v5356_v20  ;;  %4655 = vmatpush3.msra.mxu1 %v5373_v25  ;;  %v7880_v20 = vld [vmem:[#allocation19_spill] sm:$0xff] }
 0x350   :  { %1167 = vmatprep.subr.mxu0 %v5360_v21  ;;  %4656 = vmatprep.subr.mxu1 %v7863_v0  ;;  %v7881_v21 = vld [vmem:[#allocation13_spill] sm:$0xff] }
 0x351   :  { %1168 = vmatpush1.msra.mxu0 %v5366_v23  ;;  %4657 = vmatpush3.msra.mxu1 %v5383_v28 }
 0x352   :  { %1169 = vmatprep.subr.mxu0 %v5370_v24  ;;  %4658 = vmatprep.subr.mxu1 %v7863_v0 }
 0x353   :  { %1170 = vmatpush1.msra.mxu0 %v5376_v26  ;;  %4659 = vmatpush3.msra.mxu1 %v5393_v31 }
 0x354   :  { %1171 = vmatprep.subr.mxu0 %v5380_v27  ;;  %4660 = vmatprep.subr.mxu1 %v7863_v0 }
 0x355   :  { %1172 = vmatpush1.msra.mxu0 %v5386_v29  ;;  %4661 = vmatpush3.msra.mxu1 %v5403_v34 }
 0x356   :  { %1173 = vmatprep.subr.mxu0 %v5390_v30  ;;  %4662 = vmatprep.subr.mxu1 %v7863_v0 }
 0x357   :  { %1174 = vmatpush1.msra.mxu0 %v5396_v32  ;;  %4663 = vmatpush3.msra.mxu1 %v5413_v37 }
 0x358   :  { %1175 = vmatprep.subr.mxu0 %v5400_v33  ;;  %4664 = vmatprep.subr.mxu1 %v7863_v0 }
 0x359   :  { %1176 = vmatpush1.msra.mxu0 %v5406_v35  ;;  %4665 = vmatpush3.msra.mxu1 %v5423_v40 }
 0x35a   :  { %1177 = vmatprep.subr.mxu0 %v5410_v36  ;;  %4666 = vmatprep.subr.mxu1 %v7863_v0 }
 0x35b   :  { %1178 = vmatpush1.msra.mxu0 %v5416_v38  ;;  %4667 = vmatpush3.msra.mxu1 %v5433_v43 }
 0x35c   :  { %1179 = vmatprep.subr.mxu0 %v5420_v39  ;;  %4668 = vmatprep.subr.mxu1 %v7863_v0 }
 0x35d   :  { %1180 = vmatpush1.msra.mxu0 %v5426_v41  ;;  %4669 = vmatpush3.msra.mxu1 %v5443_v46 }
 0x35e   :  { %1181 = vmatprep.subr.mxu0 %v5430_v42  ;;  %4670 = vmatprep.subr.mxu1 %v7863_v0 }
 0x35f   :  { %1182 = vmatpush1.msra.mxu0 %v5436_v44  ;;  %4671 = vmatpush3.msra.mxu1 %v5453_v49 }
 0x360   :  { %1183 = vmatprep.subr.mxu0 %v5440_v45  ;;  %4672 = vmatprep.subr.mxu1 %v7863_v0 }
 0x361   :  { %1184 = vmatpush1.msra.mxu0 %v5446_v47  ;;  %4673 = vmatpush3.msra.mxu1 %v5463_v52 }
 0x362   :  { %1185 = vmatprep.subr.mxu0 %v5450_v48  ;;  %4674 = vmatprep.subr.mxu1 %v7863_v0 }
 0x363   :  { %1186 = vmatpush1.msra.mxu0 %v5456_v50  ;;  %4675 = vmatpush3.msra.mxu1 %v5473_v55 }
 0x364   :  { %1187 = vmatprep.subr.mxu0 %v5460_v51  ;;  %4676 = vmatprep.subr.mxu1 %v7863_v0 }
 0x365   :  { %1188 = vmatpush1.msra.mxu0 %v5466_v53  ;;  %4677 = vmatpush3.msra.mxu1 %v5483_v58 }
 0x366   :  { %1189 = vmatprep.subr.mxu0 %v7875_v14  ;;  %4678 = vmatprep.subr.mxu1 %v7863_v0 }
 0x367   :  { %1190 = vmatpush1.msra.mxu0 %v7876_v16  ;;  %4679 = vmatpush3.msra.mxu1 %v7877_v17 }
 0x368   :  { %1191 = vmatprep.subr.mxu0 %v7878_v18  ;;  %4680 = vmatprep.subr.mxu1 %v7863_v0 }
 0x369   :  { %1192 = vmatpush1.msra.mxu0 %v7879_v19  ;;  %1225 = vmatprep.mubr.f32.mxu0 %v7863_v0 }
 0x36a   :  { %4681 = vmatpush3.msra.mxu1 %v7880_v20  ;;  %4682 = vmatprep.mubr.msk.f32.mxu1 %vm5230_vm2, %v7863_v0 }
 0x36b   :  { %1324 = vmatprep.subr.mxu0 %v7881_v21  ;;  %4685 = vmatprep.subr.mxu1 %v7863_v0  ;;  %v5881_v21 = vld [vmem:[#allocation6 + $0x108] sm:$0xff] }
 0x40a   :  { %v1050_v22 = vpop.f32.mrf.mxu0  ;;  %v1121_v23 = vpop.f32.mrf.mxu1 }
 0x40b   :  { %v1126_v24 = vrot.slane %v1050_v22, 2  ;;  %v1145_v35 = vadd.f32 %v5605_v13, %v1121_v23  ;;  %v5884_v22 = vld [vmem:[#allocation6 + $0x118] sm:$0xff] }
 0x40c   :  { %v1052_v25 = vpop.f32.mrf.mxu0  ;;  %v4649_v26 = vpop.f32.mrf.mxu1  ;;  %v5887_v23 = vld [vmem:[#allocation6 + $0xf8] sm:$0xff] }
 0x40d   :  { %v1128_v27 = vadd.f32 %v1126_v24, %v5596_v9  ;;  %v1136_v29 = vrot.slane %v1052_v25, 2  ;;  %v1147_v38 = vrot.slane %v1145_v35, 2  ;;  %v5891_v24 = vld [vmem:[#allocation6 + $0xf0] sm:$0xff]  ;;  %v5894_v25 = vld [vmem:[#allocation6 + $0x100] sm:$0xff] }
 0x40e   :  { %v5897_v26 = vld [vmem:[#allocation6 + $0xe0] sm:$0xff] }
 0x40f   :  { %v4298_v28 = vmul.f32 -1.442695, %v1128_v27  ;;  %v1138_v30 = vadd.f32 %v1136_v29, %v5599_v57  ;;  %v5901_v27 = vld [vmem:[#allocation6 + $0xd8] sm:$0xff]  ;;  %v5909_v29 = vld [vmem:[#allocation6 + $0xc0] sm:$0xff] }
 0x411   :  { %4877 = vpow2.f32 %v4298_v28  ;;  %v4299_v31 = vmul.f32 -1.442695, %v1138_v30  ;;  %v5905_v28 = vld [vmem:[#allocation6 + $0xc8] sm:$0xff]  ;;  %v5913_v30 = vld [vmem:[#allocation6 + $0xb0] sm:$0xff] }
 0x413   :  { %4879 = vpow2.f32 %v4299_v31  ;;  %v5917_v31 = vld [vmem:[#allocation6 + $0xa8] sm:$0xff] }
 0x41e   :  { %v4878_v32 = vpop.eup %4877 }
 0x41f   :  { %v1132_v33 = vadd.f32 1.0, %v4878_v32  ;;  %v5925_v32 = vld [vmem:[#allocation6 + $0x90] sm:$0xff] }
 0x420   :  { %v4880_v34 = vpop.eup %4879 }
 0x421   :  { %4881 = vrcp.f32 %v1132_v33  ;;  %v1142_v36 = vadd.f32 1.0, %v4880_v34 }
 0x423   :  { %4883 = vrcp.f32 %v1142_v36 }
 0x42e   :  { %v4882_v39 = vpop.eup %4881 }
 0x42f   :  { %v1149_v41 = vmul.f32 %v4882_v39, %v1147_v38  ;;  %v5994_v39 = vld [vmem:[#allocation6 + $0xe8] sm:$0xff] }
 0x430   :  { %v4884_v4 = vpop.eup %4883 }
 0x431   :  { %v1150_v9 = vadd.f32 %v1149_v41, %v5608_v12  ;;  %v1152_v57 = vsub.f32 1.0, %v4884_v4  ;;  %v1156_v62 = vmul.f32 %v4884_v4, %v1154_v54  ;;  %v5844_v12 = vld [vmem:[#allocation6 + $0x178] sm:$0xff]  ;;  %v6000_v41 = vld [vmem:[#allocation6 + $0xd0] sm:$0xff]  ;;  %v6012_v4 = vld [vmem:[#allocation6 + $0xa0] sm:$0xff] }
 0x432   :  { %v6015_v54 = vld [vmem:[#allocation6 + $0x80] sm:$0xff] }
 0x433   :  { %4885 = vtanh.f32 %v1150_v9  ;;  %v6006_v9 = vld [vmem:[#allocation6 + $0xb8] sm:$0xff] }
 0x440   :  { %v4886_v56 = vpop.eup %4885 }
 0x441   :  { %v1153_v60 = vmul.f32 %v4886_v56, %v1152_v57  ;;  %v6019_v57 = vld [vmem:[#allocation6 + $0x78] sm:$0xff]  ;;  %v6022_v56 = vld [vmem:[#allocation6 + $0x88] sm:$0xff] }
 0x443   :  { %v1157_v8 = vadd.f32 %v1156_v62, %v1153_v60  ;;  %v6025_v60 = vld [vmem:[#allocation6 + $0x68] sm:$0xff]  ;;  %v6029_v62 = vld [vmem:[#allocation6 + $0x60] sm:$0xff] }
 0x445   :  { %v5837_v2 = vrot.slane %v1157_v8, 6  ;;  %v6032_v8 = vld [vmem:[#allocation6 + $0x70] sm:$0xff] }
 0x447   :  { %1226 = vmatmul.mubr.f32.vlgmr.msra.gmra.mxu0 %v5837_v2  ;;  %4683 = vmatmul.mubr.f32.vlgmr.msra.gmra.mxu1 %v5837_v2 }
 0x448   :  { %1325 = vmatpush1.msra.mxu0 %v5841_v5  ;;  %4686 = vmatpush3.msra.mxu1 %v5844_v12 }
 0x449   :  { %1326 = vmatprep.subr.mxu0 %v5847_v3  ;;  %4687 = vmatprep.subr.mxu1 %v7863_v0 }
 0x44a   :  { %1327 = vmatpush1.msra.mxu0 %v5851_v61  ;;  %4688 = vmatpush3.msra.mxu1 %v5854_v59 }
 0x44b   :  { %1328 = vmatprep.subr.mxu0 %v5857_v1  ;;  %4689 = vmatprep.subr.mxu1 %v7863_v0 }
 0x44c   :  { %1329 = vmatpush1.msra.mxu0 %v5861_v7  ;;  %4690 = vmatpush3.msra.mxu1 %v5864_v63 }
 0x44d   :  { %1330 = vmatprep.subr.mxu0 %v5867_v15  ;;  %4691 = vmatprep.subr.mxu1 %v7863_v0 }
 0x44e   :  { %1331 = vmatpush1.msra.mxu0 %v5871_v11  ;;  %4692 = vmatpush3.msra.mxu1 %v5874_v10 }
 0x44f   :  { %1332 = vmatprep.subr.mxu0 %v5877_v6  ;;  %4693 = vmatprep.subr.mxu1 %v7863_v0 }
 0x450   :  { %1333 = vmatpush1.msra.mxu0 %v5881_v21  ;;  %4694 = vmatpush3.msra.mxu1 %v5884_v22 }
 0x451   :  { %1334 = vmatprep.subr.mxu0 %v5887_v23  ;;  %4695 = vmatprep.subr.mxu1 %v7863_v0 }
 0x452   :  { %1335 = vmatpush1.msra.mxu0 %v5891_v24  ;;  %4696 = vmatpush3.msra.mxu1 %v5894_v25 }
 0x453   :  { %1336 = vmatprep.subr.mxu0 %v5897_v26  ;;  %4697 = vmatprep.subr.mxu1 %v7863_v0 }
 0x454   :  { %1337 = vmatpush1.msra.mxu0 %v5901_v27  ;;  %4698 = vmatpush3.msra.mxu1 %v5413_v37  ;;  %v5921_v37 = vld [vmem:[#allocation6 + $0x98] sm:$0xff] }
 0x455   :  { %1338 = vmatprep.subr.mxu0 %v5905_v28  ;;  %4699 = vmatprep.subr.mxu1 %v7863_v0 }
 0x456   :  { %1339 = vmatpush1.msra.mxu0 %v5909_v29  ;;  %4700 = vmatpush3.msra.mxu1 %v5423_v40  ;;  %v5956_v40 = vld [vmem:[#allocation6 + $0x170] sm:$0xff] }
 0x457   :  { %1340 = vmatprep.subr.mxu0 %v5913_v30  ;;  %4701 = vmatprep.subr.mxu1 %v7863_v0 }
 0x458   :  { %1341 = vmatpush1.msra.mxu0 %v5917_v31  ;;  %4702 = vmatpush3.msra.mxu1 %v5433_v43 }
 0x459   :  { %1342 = vmatprep.subr.mxu0 %v5921_v37  ;;  %4703 = vmatprep.subr.mxu1 %v7863_v0 }
 0x45a   :  { %1343 = vmatpush1.msra.mxu0 %v5925_v32  ;;  %4704 = vmatpush3.msra.mxu1 %v5443_v46 }
 0x45b   :  { %1344 = vmatprep.subr.mxu0 %v5430_v42  ;;  %4705 = vmatprep.subr.mxu1 %v7863_v0 }
 0x45c   :  { %1345 = vmatpush1.msra.mxu0 %v5436_v44  ;;  %4706 = vmatpush3.msra.mxu1 %v5453_v49  ;;  %v7882_v44 = vld [vmem:[#allocation24_spill] sm:$0xff]  ;;  %v7883_v49 = vld [vmem:[#allocation25_spill] sm:$0xff] }
 0x45d   :  { %1346 = vmatprep.subr.mxu0 %v5440_v45  ;;  %4707 = vmatprep.subr.mxu1 %v7863_v0 }
 0x45e   :  { %1347 = vmatpush1.msra.mxu0 %v5446_v47  ;;  %4708 = vmatpush3.msra.mxu1 %v5463_v52 }
 0x45f   :  { %1348 = vmatprep.subr.mxu0 %v5450_v48  ;;  %4709 = vmatprep.subr.mxu1 %v7863_v0 }
 0x460   :  { %1349 = vmatpush1.msra.mxu0 %v5456_v50  ;;  %4710 = vmatpush3.msra.mxu1 %v5473_v55 }
 0x461   :  { %1350 = vmatprep.subr.mxu0 %v5460_v51  ;;  %4711 = vmatprep.subr.mxu1 %v7863_v0 }
 0x462   :  { %1351 = vmatpush1.msra.mxu0 %v5466_v53  ;;  %4712 = vmatpush3.msra.mxu1 %v5483_v58 }
 0x463   :  { %1352 = vmatprep.subr.mxu0 %v7875_v14  ;;  %4713 = vmatprep.subr.mxu1 %v7863_v0 }
 0x464   :  { %1353 = vmatpush1.msra.mxu0 %v7876_v16  ;;  %4714 = vmatpush3.msra.mxu1 %v7877_v17 }
 0x465   :  { %1354 = vmatprep.subr.mxu0 %v7878_v18  ;;  %4715 = vmatprep.subr.mxu1 %v7863_v0  ;;  %v7884_v18 = vld [vmem:[#allocation22_spill] sm:$0xff] }
 0x466   :  { %1355 = vmatpush1.msra.mxu0 %v7879_v19  ;;  %1388 = vmatprep.mubr.f32.mxu0 %v7863_v0 }
 0x467   :  { %4716 = vmatpush3.msra.mxu1 %v7880_v20  ;;  %4717 = vmatprep.mubr.msk.f32.mxu1 %vm5230_vm2, %v7863_v0 }
 0x468   :  { %1502 = vmatprep.subr.mxu0 %v5956_v40  ;;  %4720 = vmatprep.subr.mxu1 %v7863_v0 }
 0x507   :  { %v1227_v42 = vpop.f32.mrf.mxu0  ;;  %v1298_v43 = vpop.f32.mrf.mxu1 }
 0x508   :  { %v1302_v45 = vadd.f32 %v1227_v42, %v7882_v44  ;;  %v1316_v14 = vadd.f32 %v5605_v13, %v1298_v43  ;;  %v6039_v42 = vld [vmem:[#allocation6 + $0x48] sm:$0xff]  ;;  %v6042_v43 = vld [vmem:[#allocation6 + $0x58] sm:$0xff] }
 0x509   :  { %v4684_v46 = vpop.f32.mrf.mxu1  ;;  %v1229_v48 = vpop.f32.mrf.mxu0 }
 0x50a   :  { %v4300_v47 = vmul.f32 -1.442695, %v1302_v45  ;;  %v1309_v50 = vadd.f32 %v1229_v48, %v7883_v49  ;;  %v6045_v45 = vld [vmem:[#allocation6 + $0x38] sm:$0xff]  ;;  %v6049_v46 = vld [vmem:[#allocation6 + $0x30] sm:$0xff]  ;;  %v6055_v48 = vld [vmem:[#allocation6 + $0x20] sm:$0xff] }
 0x50b   :  { %7885 = vst [vmem:[#allocation14_spill] sm:$0xff] %v6055_v48 }
 0x50c   :  { %4887 = vpow2.f32 %v4300_v47  ;;  %v4301_v51 = vmul.f32 -1.442695, %v1309_v50  ;;  %v6052_v47 = vld [vmem:[#allocation6 + $0x40] sm:$0xff]  ;;  %v6059_v50 = vld [vmem:[#allocation6 + $0x18] sm:$0xff] }
 0x50d   :  { %7886 = vst [vmem:[#allocation15_spill] sm:$0xff] %v6059_v50 }
 0x50e   :  { %4889 = vpow2.f32 %v4301_v51  ;;  %v6062_v51 = vld [vmem:[#allocation6 + $0x28] sm:$0xff] }
 0x50f   :  { %7887 = vst [vmem:[#allocation18_spill] sm:$0xff] %v6062_v51 }
 0x519   :  { %v4888_v52 = vpop.eup %4887 }
 0x51a   :  { %v1306_v53 = vadd.f32 1.0, %v4888_v52  ;;  %v6065_v52 = vld [vmem:[#allocation6 + $0x8] sm:$0xff] }
 0x51b   :  { %v4890_v55 = vpop.eup %4889  ;;  %7888 = vst [vmem:[#allocation16_spill] sm:$0xff] %v6065_v52 }
 0x51c   :  { %4891 = vrcp.f32 %v1306_v53  ;;  %v1313_v58 = vadd.f32 1.0, %v4890_v55  ;;  %v6069_v53 = vld [vmem:[#allocation6] sm:$0xff]  ;;  %v6073_v55 = vld [vmem:[#allocation6 + $0x10] sm:$0xff] }
 0x51d   :  { %7889 = vst [vmem:[#allocation17_spill] sm:$0xff] %v6069_v53  ;;  %7890 = vst [vmem:[#allocation19_spill] sm:$0xff] %v6073_v55 }
 0x51e   :  { %4893 = vrcp.f32 %v1313_v58 }
 0x529   :  { %v4892_v16 = vpop.eup %4891 }
 0x52a   :  { %v1317_v17 = vmul.f32 %v4892_v16, %v1316_v14 }
 0x52b   :  { %v4894_v20 = vpop.eup %4893 }
 0x52c   :  { %v1318_v19 = vadd.f32 %v1317_v17, %v7884_v18  ;;  %v1320_v33 = vsub.f32 1.0, %v4894_v20  ;;  %v1322_v36 = vmul.f32 %v4894_v20, %v5837_v2  ;;  %v6035_v2 = vld [vmem:[#allocation6 + $0x50] sm:$0xff] }
 0x52e   :  { %4895 = vtanh.f32 %v1318_v19 }
 0x53b   :  { %v4896_v34 = vpop.eup %4895 }
 0x53c   :  { %v1321_v35 = vmul.f32 %v4896_v34, %v1320_v33 }
 0x53e   :  { %v5965_v38 = vadd.f32 %v1322_v36, %v1321_v35 }
 0x540   :  { %1389 = vmatmul.mubr.f32.vlgmr.msra.gmra.mxu0 %v5965_v38  ;;  %4718 = vmatmul.mubr.f32.vlgmr.msra.gmra.mxu1 %v5965_v38 }
 0x541   :  { %1503 = vmatpush1.msra.mxu0 %v5841_v5  ;;  %4721 = vmatpush3.msra.mxu1 %v5844_v12 }
 0x542   :  { %1504 = vmatprep.subr.mxu0 %v5847_v3  ;;  %4722 = vmatprep.subr.mxu1 %v7863_v0 }
 0x543   :  { %1505 = vmatpush1.msra.mxu0 %v5851_v61  ;;  %4723 = vmatpush3.msra.mxu1 %v5854_v59 }
 0x544   :  { %1506 = vmatprep.subr.mxu0 %v5857_v1  ;;  %4724 = vmatprep.subr.mxu1 %v7863_v0 }
 0x545   :  { %1507 = vmatpush1.msra.mxu0 %v5861_v7  ;;  %4725 = vmatpush3.msra.mxu1 %v5864_v63 }
 0x546   :  { %1508 = vmatprep.subr.mxu0 %v5867_v15  ;;  %4726 = vmatprep.subr.mxu1 %v7863_v0 }
 0x547   :  { %1509 = vmatpush1.msra.mxu0 %v5871_v11  ;;  %4727 = vmatpush3.msra.mxu1 %v5874_v10 }
 0x548   :  { %1510 = vmatprep.subr.mxu0 %v5877_v6  ;;  %4728 = vmatprep.subr.mxu1 %v7863_v0 }
 0x549   :  { %1511 = vmatpush1.msra.mxu0 %v5881_v21  ;;  %4729 = vmatpush3.msra.mxu1 %v5884_v22 }
 0x54a   :  { %1512 = vmatprep.subr.mxu0 %v5887_v23  ;;  %4730 = vmatprep.subr.mxu1 %v7863_v0 }
 0x54b   :  { %1513 = vmatpush1.msra.mxu0 %v5891_v24  ;;  %4731 = vmatpush3.msra.mxu1 %v5894_v25 }
 0x54c   :  { %1514 = vmatprep.subr.mxu0 %v5897_v26  ;;  %4732 = vmatprep.subr.mxu1 %v7863_v0 }
 0x54d   :  { %1515 = vmatpush1.msra.mxu0 %v5901_v27  ;;  %4733 = vmatpush3.msra.mxu1 %v5994_v39 }
 0x54e   :  { %1516 = vmatprep.subr.mxu0 %v5905_v28  ;;  %4734 = vmatprep.subr.mxu1 %v7863_v0 }
 0x54f   :  { %1517 = vmatpush1.msra.mxu0 %v5909_v29  ;;  %4735 = vmatpush3.msra.mxu1 %v6000_v41 }
 0x550   :  { %1518 = vmatprep.subr.mxu0 %v5913_v30  ;;  %4736 = vmatprep.subr.mxu1 %v7863_v0 }
 0x551   :  { %1519 = vmatpush1.msra.mxu0 %v5917_v31  ;;  %4737 = vmatpush3.msra.mxu1 %v6006_v9 }
 0x552   :  { %1520 = vmatprep.subr.mxu0 %v5921_v37  ;;  %4738 = vmatprep.subr.mxu1 %v7863_v0 }
 0x553   :  { %1521 = vmatpush1.msra.mxu0 %v5925_v32  ;;  %4739 = vmatpush3.msra.mxu1 %v6012_v4 }
 0x554   :  { %1522 = vmatprep.subr.mxu0 %v6015_v54  ;;  %4740 = vmatprep.subr.mxu1 %v7863_v0 }
 0x555   :  { %1523 = vmatpush1.msra.mxu0 %v6019_v57  ;;  %4741 = vmatpush3.msra.mxu1 %v6022_v56 }
 0x556   :  { %1524 = vmatprep.subr.mxu0 %v6025_v60  ;;  %4742 = vmatprep.subr.mxu1 %v7863_v0 }
 0x557   :  { %1525 = vmatpush1.msra.mxu0 %v6029_v62  ;;  %4743 = vmatpush3.msra.mxu1 %v6032_v8 }
 0x558   :  { %1526 = vmatprep.subr.mxu0 %v6035_v2  ;;  %4744 = vmatprep.subr.mxu1 %v7863_v0 }
 0x559   :  { %1527 = vmatpush1.msra.mxu0 %v6039_v42  ;;  %4745 = vmatpush3.msra.mxu1 %v6042_v43 }
 0x55a   :  { %1528 = vmatprep.subr.mxu0 %v6045_v45  ;;  %4746 = vmatprep.subr.mxu1 %v7863_v0 }
 0x55b   :  { %1529 = vmatpush1.msra.mxu0 %v6049_v46  ;;  %4747 = vmatpush3.msra.mxu1 %v6052_v47 }
 0x55c   :  { %1530 = vmatprep.subr.mxu0 %v6055_v48  ;;  %4748 = vmatprep.subr.mxu1 %v7863_v0 }
 0x55d   :  { %1531 = vmatpush1.msra.mxu0 %v6059_v50  ;;  %4749 = vmatpush3.msra.mxu1 %v6062_v51 }
 0x55e   :  { %1532 = vmatprep.subr.mxu0 %v6065_v52  ;;  %4750 = vmatprep.subr.mxu1 %v7863_v0 }
 0x55f   :  { %1533 = vmatpush1.msra.mxu0 %v6069_v53  ;;  %1566 = vmatprep.mubr.f32.mxu0 %v7863_v0 }
 0x560   :  { %4751 = vmatpush3.msra.mxu1 %v6073_v55  ;;  %4752 = vmatprep.mubr.msk.f32.mxu1 %vm5230_vm2, %v7863_v0 }
 0x561   :  { %1679 = vmatprep.subr.mxu0 %v5956_v40  ;;  %4755 = vmatprep.subr.mxu1 %v7863_v0 }
 0x600   :  { %v1390_v58 = vpop.f32.mrf.mxu0  ;;  %v1461_v14 = vpop.f32.mrf.mxu1 }
 0x601   :  { %v1466_v16 = vrot.slane %v1390_v58, 6  ;;  %v1485_v52 = vadd.f32 %v5605_v13, %v1461_v14  ;;  %v7891_v13 = vld [vmem:[#allocation14_spill] sm:$0xff]  ;;  %v6206_v14 = vld [vmem:[#allocation7 + $0x2e0] sm:$0xff] }
 0x602   :  { %v1392_v17 = vpop.f32.mrf.mxu0  ;;  %v4719_v19 = vpop.f32.mrf.mxu1 }
 0x603   :  { %v1468_v20 = vadd.f32 %v1466_v16, %v7882_v44  ;;  %v1476_v34 = vrot.slane %v1392_v17, 6  ;;  %v1487_v50 = vrot.slane %v1485_v52, 6  ;;  %v1495_v19 = vrot.slane %v5965_v38, 6  ;;  %v6204_v52 = vld [vmem:[#allocation7 + $0x2d0] sm:$0xff] }
 0x605   :  { %v4302_v33 = vmul.f32 -1.442695, %v1468_v20  ;;  %v1478_v35 = vadd.f32 %v1476_v34, %v7883_v49 }
 0x607   :  { %4897 = vpow2.f32 %v4302_v33  ;;  %v4303_v36 = vmul.f32 -1.442695, %v1478_v35 }
 0x609   :  { %4899 = vpow2.f32 %v4303_v36  ;;  %v6210_v36 = vld [vmem:[#allocation7 + $0x2a8] sm:$0xff] }
 0x614   :  { %v4898_v55 = vpop.eup %4897 }
 0x615   :  { %v1472_v53 = vadd.f32 1.0, %v4898_v55 }
 0x616   :  { %v4900_v40 = vpop.eup %4899 }
 0x617   :  { %4901 = vrcp.f32 %v1472_v53  ;;  %v1482_v51 = vadd.f32 1.0, %v4900_v40  ;;  %v6212_v40 = vld [vmem:[#allocation7 + $0x2b8] sm:$0xff] }
 0x619   :  { %4903 = vrcp.f32 %v1482_v51  ;;  %v6200_v51 = vld [vmem:[#allocation7 + $0x2e8] sm:$0xff] }
 0x61a   :  { %7899 = vst [vmem:[#allocation24_spill] sm:$0xff] %v6200_v51 }
 0x624   :  { %v4902_v58 = vpop.eup %4901 }
 0x625   :  { %v1489_v48 = vmul.f32 %v4902_v58, %v1487_v50  ;;  %v6198_v50 = vld [vmem:[#allocation7 + $0x2d8] sm:$0xff]  ;;  %v6216_v58 = vld [vmem:[#allocation7 + $0x2a0] sm:$0xff] }
 0x626   :  { %v4904_v17 = vpop.eup %4903  ;;  %7898 = vst [vmem:[#allocation13_spill] sm:$0xff] %v6198_v50 }
 0x627   :  { %v1490_v16 = vadd.f32 %v1489_v48, %v7884_v18  ;;  %v1492_v20 = vsub.f32 1.0, %v4904_v17  ;;  %v1497_v35 = vmul.f32 %v4904_v17, %v1495_v19  ;;  %v6222_v17 = vld [vmem:[#allocation7 + $0x278] sm:$0xff]  ;;  %v6224_v19 = vld [vmem:[#allocation7 + $0x288] sm:$0xff] }
 0x629   :  { %4905 = vtanh.f32 %v1490_v16  ;;  %v6218_v16 = vld [vmem:[#allocation7 + $0x2b0] sm:$0xff] }
 0x636   :  { %v4906_v33 = vpop.eup %4905 }
 0x637   :  { %v1493_v34 = vmul.f32 %v4906_v33, %v1492_v20  ;;  %v6228_v20 = vld [vmem:[#allocation7 + $0x270] sm:$0xff]  ;;  %v6230_v33 = vld [vmem:[#allocation7 + $0x280] sm:$0xff] }
 0x639   :  { %v6085_v55 = vadd.f32 %v1497_v35, %v1493_v34  ;;  %v6234_v34 = vld [vmem:[#allocation7 + $0x248] sm:$0xff]  ;;  %v6236_v35 = vld [vmem:[#allocation7 + $0x258] sm:$0xff] }
 0x63b   :  { %v1500_v53 = vrot.slane %v6085_v55, 2 }
 0x63d   :  { %1567 = vmatmul.mubr.f32.vlgmr.msra.gmra.mxu0 %v1500_v53  ;;  %4753 = vmatmul.mubr.f32.vlgmr.msra.gmra.mxu1 %v1500_v53  ;;  %v6242_v53 = vld [vmem:[#allocation7 + $0x250] sm:$0xff] }
 0x63e   :  { %1680 = vmatpush1.msra.mxu0 %v5841_v5  ;;  %4756 = vmatpush3.msra.mxu1 %v5844_v12  ;;  %v7892_v5 = vld [vmem:[#allocation15_spill] sm:$0xff]  ;;  %v7893_v12 = vld [vmem:[#allocation18_spill] sm:$0xff] }
 0x63f   :  { %1681 = vmatprep.subr.mxu0 %v5847_v3  ;;  %4757 = vmatprep.subr.mxu1 %v7863_v0  ;;  %v7894_v3 = vld [vmem:[#allocation16_spill] sm:$0xff] }
 0x640   :  { %1682 = vmatpush1.msra.mxu0 %v5851_v61  ;;  %4758 = vmatpush3.msra.mxu1 %v5854_v59  ;;  %v7895_v61 = vld [vmem:[#allocation17_spill] sm:$0xff]  ;;  %v7896_v59 = vld [vmem:[#allocation19_spill] sm:$0xff] }
 0x641   :  { %1683 = vmatprep.subr.mxu0 %v5857_v1  ;;  %4759 = vmatprep.subr.mxu1 %v7863_v0 }
 0x642   :  { %1684 = vmatpush1.msra.mxu0 %v5861_v7  ;;  %4760 = vmatpush3.msra.mxu1 %v5864_v63 }
 0x643   :  { %1685 = vmatprep.subr.mxu0 %v5867_v15  ;;  %4761 = vmatprep.subr.mxu1 %v7863_v0 }
 0x644   :  { %1686 = vmatpush1.msra.mxu0 %v5871_v11  ;;  %4762 = vmatpush3.msra.mxu1 %v5874_v10 }
 0x645   :  { %1687 = vmatprep.subr.mxu0 %v5877_v6  ;;  %4763 = vmatprep.subr.mxu1 %v7863_v0 }
 0x646   :  { %1688 = vmatpush1.msra.mxu0 %v5881_v21  ;;  %4764 = vmatpush3.msra.mxu1 %v5884_v22 }
 0x647   :  { %1689 = vmatprep.subr.mxu0 %v5887_v23  ;;  %4765 = vmatprep.subr.mxu1 %v7863_v0 }
 0x648   :  { %1690 = vmatpush1.msra.mxu0 %v5891_v24  ;;  %4766 = vmatpush3.msra.mxu1 %v5894_v25 }
 0x649   :  { %1691 = vmatprep.subr.mxu0 %v5897_v26  ;;  %4767 = vmatprep.subr.mxu1 %v7863_v0 }
 0x64a   :  { %1692 = vmatpush1.msra.mxu0 %v5901_v27  ;;  %4768 = vmatpush3.msra.mxu1 %v5994_v39  ;;  %v6158_v27 = vld [vmem:[%s7547_s6] ss:$0 sm:$0xff]  ;;  %v1672_v39 = vrot.slane %v6085_v55, 6  ;;  %v6240_v55 = vld [vmem:[#allocation7 + $0x240] sm:$0xff] }
 0x64b   :  { %1693 = vmatprep.subr.mxu0 %v5905_v28  ;;  %4769 = vmatprep.subr.mxu1 %v7863_v0 }
 0x64c   :  { %1694 = vmatpush1.msra.mxu0 %v5909_v29  ;;  %4770 = vmatpush3.msra.mxu1 %v6000_v41 }
 0x64d   :  { %1695 = vmatprep.subr.mxu0 %v5913_v30  ;;  %4771 = vmatprep.subr.mxu1 %v7863_v0 }
 0x64e   :  { %1696 = vmatpush1.msra.mxu0 %v5917_v31  ;;  %4772 = vmatpush3.msra.mxu1 %v6006_v9 }
 0x64f   :  { %1697 = vmatprep.subr.mxu0 %v5921_v37  ;;  %4773 = vmatprep.subr.mxu1 %v7863_v0 }
 0x650   :  { %1698 = vmatpush1.msra.mxu0 %v5925_v32  ;;  %4774 = vmatpush3.msra.mxu1 %v6012_v4 }
 0x651   :  { %1699 = vmatprep.subr.mxu0 %v6015_v54  ;;  %4775 = vmatprep.subr.mxu1 %v7863_v0 }
 0x652   :  { %1700 = vmatpush1.msra.mxu0 %v6019_v57  ;;  %4776 = vmatpush3.msra.mxu1 %v6022_v56 }
 0x653   :  { %1701 = vmatprep.subr.mxu0 %v6025_v60  ;;  %4777 = vmatprep.subr.mxu1 %v7863_v0  ;;  %v1855_v60 = vld [vmem:[%s7548_s7] sm:$0x3f]  ;;  %s4339_s7 = sld [smem:[#allocation3 + $0x6]] }
 0x654   :  { %1702 = vmatpush1.msra.mxu0 %v6029_v62  ;;  %4778 = vmatpush3.msra.mxu1 %v6032_v8  ;;  %v7897_v62 = vld [vmem:[#allocation12_spill] sm:$0xff] }
 0x655   :  { %1703 = vmatprep.subr.mxu0 %v6035_v2  ;;  %4779 = vmatprep.subr.mxu1 %v7863_v0  ;;  %v1881_v8 = vrot.slane %v1855_v60, %v7897_v62 }
 0x656   :  { %1704 = vmatpush1.msra.mxu0 %v6039_v42  ;;  %4780 = vmatpush3.msra.mxu1 %v6042_v43  ;;  %v1874_v42 = vcombine.high %v1855_v60, %v1855_v60  ;;  %v6338_v60 = vld [vmem:[#allocation7 + $0x98] sm:$0xff] }
 0x657   :  { %1705 = vmatprep.subr.mxu0 %v6045_v45  ;;  %4781 = vmatprep.subr.mxu1 %v7863_v0  ;;  %v1889_v2 = vcombine.high %v1881_v8, %v1881_v8  ;;  %v1853_v45 = vld [vmem:[%s7543_s2] sm:$0xff]  ;;  %7927 = vst [vmem:[#allocation44_spill] sm:$0xff] %v6338_v60 }
 0x658   :  { %1706 = vmatpush1.msra.mxu0 %v6049_v46  ;;  %4782 = vmatpush3.msra.mxu1 %v6052_v47  ;;  %v1888_v43 = vrot.slane %v1874_v42, %v7897_v62  ;;  %v1854_v46 = vld [vmem:[%s7543_s2 + $0x8] sm:$0xff]  ;;  %v6342_v62 = vld [vmem:[#allocation7 + $0xa8] sm:$0xff] }
 0x659   :  { %1707 = vmatprep.subr.mxu0 %v7891_v13  ;;  %4783 = vmatprep.subr.mxu1 %v7863_v0  ;;  %v5056_v47 = vld [vmem:[%s7542_s1 + $0x8] sm:$0xff]  ;;  %7928 = vst [vmem:[#allocation45_spill] sm:$0xff] %v6342_v62  ;;  %v6350_v42 = vld [vmem:[#allocation7 + $0x68] sm:$0xff]  ;;  %s4134_s25 = ssub.f32 1.0, %s4339_s7 }
 0x65a   :  { %1708 = vmatpush1.msra.mxu0 %v7892_v5  ;;  %4784 = vmatpush3.msra.mxu1 %v7893_v12  ;;  %v2054_v48 = vrot.slane %v5056_v47, 6  ;;  %v6246_v13 = vld [vmem:[#allocation7 + $0x218] sm:$0xff]  ;;  %v6248_v5 = vld [vmem:[#allocation7 + $0x228] sm:$0xff]  ;;  %v6252_v12 = vld [vmem:[#allocation7 + $0x210] sm:$0xff]  ;;  %7931 = vst [vmem:[#allocation48_spill] sm:$0xff] %v6350_v42 }
 0x65b   :  { %1709 = vmatprep.subr.mxu0 %v7894_v3  ;;  %4785 = vmatprep.subr.mxu1 %v7863_v0  ;;  %v6254_v3 = vld [vmem:[#allocation7 + $0x220] sm:$0xff]  ;;  %v6362_v47 = vld [vmem:[#allocation7 + $0x38] sm:$0xff] }
 0x65c   :  { %1710 = vmatpush1.msra.mxu0 %v7895_v61  ;;  %1743 = vmatprep.mubr.f32.mxu0 %v7863_v0  ;;  %7900 = vst [vmem:[#allocation25_spill] sm:$0xff] %v6254_v3  ;;  %v6258_v61 = vld [vmem:[#allocation7 + $0x1e8] sm:$0xff]  ;;  %7935 = vst [vmem:[#allocation52_spill] sm:$0xff] %v6362_v47 }
 0x65d   :  { %4786 = vmatpush3.msra.mxu1 %v7896_v59  ;;  %4787 = vmatprep.mubr.msk.f32.mxu1 %vm5230_vm2, %v7863_v0  ;;  %v6260_v59 = vld [vmem:[#allocation7 + $0x1f8] sm:$0xff] }
 0x65e   :  { %4308 = vmatprep.subr.msk.mxu0 %vm307_vm1, %v1889_v2  ;;  %4790 = vmatprep.subr.msk.mxu1 %vm307_vm1, %v1888_v43  ;;  %7901 = vst [vmem:[#allocation22_spill] sm:$0xff] %v6260_v59 }
 0x6fd   :  { %v1568_v1 = vpop.f32.mrf.mxu0  ;;  %v1639_v7 = vpop.f32.mrf.mxu1 }
 0x6fe   :  { %v1644_v63 = vrot.slane %v1568_v1, 4  ;;  %v1663_v28 = vadd.f32 %v6158_v27, %v1639_v7  ;;  %v6264_v1 = vld [vmem:[#allocation7 + $0x1e0] sm:$0xff]  ;;  %v6266_v7 = vld [vmem:[#allocation7 + $0x1f0] sm:$0xff] }
 0x6ff   :  { %v1570_v15 = vpop.f32.mrf.mxu0  ;;  %v4754_v11 = vpop.f32.mrf.mxu1  ;;  %7902 = vst [vmem:[#allocation14_spill] sm:$0xff] %v6266_v7 }
 0x700   :  { %v1646_v10 = vadd.f32 %v1644_v63, %v7882_v44  ;;  %v1654_v21 = vrot.slane %v1570_v15, 4  ;;  %v1665_v30 = vrot.slane %v1663_v28, 4  ;;  %v6270_v63 = vld [vmem:[#allocation7 + $0x1b8] sm:$0xff]  ;;  %v6272_v15 = vld [vmem:[#allocation7 + $0x1c8] sm:$0xff]  ;;  %v6276_v11 = vld [vmem:[#allocation7 + $0x1b0] sm:$0xff] }
 0x701   :  { %7903 = vst [vmem:[#allocation15_spill] sm:$0xff] %v6270_v63  ;;  %7904 = vst [vmem:[#allocation18_spill] sm:$0xff] %v6272_v15  ;;  %v6300_v28 = vld [vmem:[#allocation7 + $0x160] sm:$0xff] }
 0x702   :  { %v4304_v6 = vmul.f32 -1.442695, %v1646_v10  ;;  %v1656_v22 = vadd.f32 %v1654_v21, %v7883_v49  ;;  %7905 = vst [vmem:[#allocation16_spill] sm:$0xff] %v6276_v11  ;;  %v6278_v10 = vld [vmem:[#allocation7 + $0x1c0] sm:$0xff]  ;;  %v6284_v21 = vld [vmem:[#allocation7 + $0x198] sm:$0xff]  ;;  %7914 = vst [vmem:[#allocation31_spill] sm:$0xff] %v6300_v28 }
 0x703   :  { %7906 = vst [vmem:[#allocation17_spill] sm:$0xff] %v6278_v10  ;;  %7908 = vst [vmem:[#allocation12_spill] sm:$0xff] %v6284_v21 }
 0x704   :  { %4907 = vpow2.f32 %v4304_v6  ;;  %v4305_v23 = vmul.f32 -1.442695, %v1656_v22  ;;  %v6280_v6 = vld [vmem:[#allocation7 + $0x188] sm:$0xff]  ;;  %v6286_v22 = vld [vmem:[#allocation7 + $0x180] sm:$0xff] }
 0x705   :  { %7907 = vst [vmem:[#allocation19_spill] sm:$0xff] %v6280_v6  ;;  %7909 = vst [vmem:[#allocation26_spill] sm:$0xff] %v6286_v22 }
 0x706   :  { %4909 = vpow2.f32 %v4305_v23  ;;  %v6288_v23 = vld [vmem:[#allocation7 + $0x190] sm:$0xff] }
 0x707   :  { %7910 = vst [vmem:[#allocation27_spill] sm:$0xff] %v6288_v23 }
 0x711   :  { %v4908_v24 = vpop.eup %4907 }
 0x712   :  { %v1650_v25 = vadd.f32 1.0, %v4908_v24  ;;  %v6292_v24 = vld [vmem:[#allocation7 + $0x158] sm:$0xff] }
 0x713   :  { %v4910_v26 = vpop.eup %4909  ;;  %7911 = vst [vmem:[#allocation28_spill] sm:$0xff] %v6292_v24 }
 0x714   :  { %4911 = vrcp.f32 %v1650_v25  ;;  %v1660_v29 = vadd.f32 1.0, %v4910_v26  ;;  %v6294_v25 = vld [vmem:[#allocation7 + $0x168] sm:$0xff]  ;;  %v6296_v26 = vld [vmem:[#allocation7 + $0x150] sm:$0xff] }
 0x715   :  { %7912 = vst [vmem:[#allocation29_spill] sm:$0xff] %v6294_v25  ;;  %7913 = vst [vmem:[#allocation30_spill] sm:$0xff] %v6296_v26 }
 0x716   :  { %4913 = vrcp.f32 %v1660_v29  ;;  %v6302_v29 = vld [vmem:[#allocation7 + $0x128] sm:$0xff] }
 0x717   :  { %7915 = vst [vmem:[#allocation32_spill] sm:$0xff] %v6302_v29 }
 0x721   :  { %v4912_v31 = vpop.eup %4911 }
 0x722   :  { %v1667_v37 = vmul.f32 %v4912_v31, %v1665_v30  ;;  %v6306_v30 = vld [vmem:[#allocation7 + $0x138] sm:$0xff]  ;;  %v6308_v31 = vld [vmem:[#allocation7 + $0x120] sm:$0xff] }
 0x723   :  { %v4914_v38 = vpop.eup %4913  ;;  %7916 = vst [vmem:[#allocation33_spill] sm:$0xff] %v6306_v30  ;;  %7917 = vst [vmem:[#allocation34_spill] sm:$0xff] %v6308_v31 }
 0x724   :  { %v1668_v32 = vadd.f32 %v1667_v37, %v7884_v18  ;;  %v1670_v41 = vsub.f32 1.0, %v4914_v38  ;;  %v1674_v54 = vmul.f32 %v4914_v38, %v1672_v39  ;;  %v6312_v37 = vld [vmem:[#allocation7 + $0x130] sm:$0xff]  ;;  %v6318_v38 = vld [vmem:[#allocation7 + $0x108] sm:$0xff] }
 0x725   :  { %7918 = vst [vmem:[#allocation35_spill] sm:$0xff] %v6312_v37  ;;  %7920 = vst [vmem:[#allocation37_spill] sm:$0xff] %v6318_v38  ;;  %v6320_v39 = vld [vmem:[#allocation7 + $0xf0] sm:$0xff] }
 0x726   :  { %4915 = vtanh.f32 %v1668_v32  ;;  %v6314_v32 = vld [vmem:[#allocation7 + $0xf8] sm:$0xff]  ;;  %7921 = vst [vmem:[#allocation38_spill] sm:$0xff] %v6320_v39 }
 0x727   :  { %7919 = vst [vmem:[#allocation36_spill] sm:$0xff] %v6314_v32 }
 0x733   :  { %v4916_v9 = vpop.eup %4915 }
 0x734   :  { %v1671_v4 = vmul.f32 %v4916_v9, %v1670_v41  ;;  %v6324_v41 = vld [vmem:[#allocation7 + $0x100] sm:$0xff]  ;;  %v6326_v9 = vld [vmem:[#allocation7 + $0xc8] sm:$0xff] }
 0x735   :  { %7922 = vst [vmem:[#allocation39_spill] sm:$0xff] %v6324_v41  ;;  %7923 = vst [vmem:[#allocation40_spill] sm:$0xff] %v6326_v9 }
 0x736   :  { %v6163_v57 = vadd.f32 %v1674_v54, %v1671_v4  ;;  %v6330_v4 = vld [vmem:[#allocation7 + $0xd8] sm:$0xff]  ;;  %v6332_v54 = vld [vmem:[#allocation7 + $0xc0] sm:$0xff] }
 0x737   :  { %7924 = vst [vmem:[#allocation41_spill] sm:$0xff] %v6330_v4  ;;  %7925 = vst [vmem:[#allocation42_spill] sm:$0xff] %v6332_v54 }
 0x738   :  { %v1677_v56 = vrot.slane %v6163_v57, 4 }
 0x73a   :  { %1744 = vmatmul.mubr.f32.vlgmr.msra.gmra.mxu0 %v1677_v56  ;;  %4788 = vmatmul.mubr.f32.vlgmr.msra.gmra.mxu1 %v1677_v56  ;;  %v6336_v56 = vld [vmem:[#allocation7 + $0xd0] sm:$0xff] }
 0x73b   :  { %1966 = vmatprep.mubr.f32.mxu0 %v7863_v0  ;;  %4309 = vmatpush1.msk.msra.mxu0 %vm307_vm1, %v1881_v8  ;;  %7926 = vst [vmem:[#allocation43_spill] sm:$0xff] %v6336_v56 }
 0x73c   :  { %4791 = vmatpush3.msk.msra.mxu1 %vm307_vm1, %v1888_v43  ;;  %4792 = vmatprep.mubr.msk.f32.mxu1 %vm300_vm0, %v1853_v45 }
 0x73d   :  { %4315 = vmatprep.subr.msk.mxu1 %vm307_vm1, %v1889_v2  ;;  %4795 = vmatprep.subr.mxu0 %v7863_v0  ;;  %v6348_v2 = vld [vmem:[#allocation7 + $0xa0] sm:$0xff] }
 0x73e   :  { %4310 = vmatmul.mubr.msk.f32.vlgmr.msra.gmra.mxu0 %vm300_vm0, %v1853_v45  ;;  %4793 = vmatmul.mubr.msk.f32.vlgmr.msra.gmra.mxu1 %vm300_vm0, %v1854_v46  ;;  %7930 = vst [vmem:[#allocation47_spill] sm:$0xff] %v6348_v2  ;;  %v6356_v45 = vld [vmem:[#allocation7 + $0x60] sm:$0xff] }
 0x73f   :  { %1972 = vmatprep.mubr.f32.mxu0 %v7863_v0  ;;  %2121 = vmatprep.mubr.f32.mxu1 %v7863_v0  ;;  %7933 = vst [vmem:[#allocation50_spill] sm:$0xff] %v6356_v45 }
 0x740   :  { %4316 = vmatpush1.msk.msra.mxu1 %vm307_vm1, %v1881_v8  ;;  %4796 = vmatpush3.msk.msra.mxu0 %vm307_vm1, %v1888_v43  ;;  %v6344_v8 = vld [vmem:[#allocation7 + $0x90] sm:$0xff]  ;;  %v6354_v43 = vld [vmem:[#allocation7 + $0x78] sm:$0xff] }
 0x741   :  { %2201 = vmatprep.subr.mxu1 %v6198_v50  ;;  %2272 = vmatprep.subr.mxu0 %v6200_v51  ;;  %7929 = vst [vmem:[#allocation46_spill] sm:$0xff] %v6344_v8  ;;  %7932 = vst [vmem:[#allocation49_spill] sm:$0xff] %v6354_v43 }
 0x742   :  { %4311 = vmatmul.mubr.msk.f32.gmra.mxu0 %vm300_vm0, %v1854_v46  ;;  %4317 = vmatmul.mubr.msk.f32.vlgmr.msra.gmra.mxu1 %vm300_vm0, %v2054_v48  ;;  %v6360_v46 = vld [vmem:[#allocation7 + $0x70] sm:$0xff] }
 0x743   :  { %4797 = vmatprep.mubr.msk.f32.mxu0 %vm5230_vm2, %v7863_v0  ;;  %2202 = vmatpush1.msra.mxu1 %v6204_v52  ;;  %7934 = vst [vmem:[#allocation51_spill] sm:$0xff] %v6360_v46 }
 0x744   :  { %2203 = vmatprep.subr.mxu1 %v6210_v36  ;;  %2265 = vmatprep.mubr.f32.mxu1 %v7863_v0 }
 0x745   :  { %2204 = vmatpush1.msra.mxu1 %v6216_v58 }
 0x746   :  { %4798 = vmatmul.mubr.msk.f32.vlgmr.msra.gmra.mxu0 %vm300_vm0, %v2054_v48  ;;  %2205 = vmatprep.subr.mxu1 %v6222_v17  ;;  %v6366_v48 = vld [vmem:[#allocation7 + $0x48] sm:$0xff] }
 0x747   :  { %2273 = vmatpush1.msra.mxu0 %v6206_v14  ;;  %2206 = vmatpush1.msra.mxu1 %v6228_v20  ;;  %7936 = vst [vmem:[#allocation53_spill] sm:$0xff] %v6366_v48 }
 0x748   :  { %2274 = vmatprep.subr.mxu0 %v6212_v40  ;;  %2207 = vmatprep.subr.mxu1 %v6234_v34 }
 0x749   :  { %2275 = vmatpush1.msra.mxu0 %v6218_v16  ;;  %2208 = vmatpush1.msra.mxu1 %v6240_v55 }
 0x74a   :  { %2276 = vmatprep.subr.mxu0 %v6224_v19  ;;  %2209 = vmatprep.subr.mxu1 %v6246_v13 }
 0x74b   :  { %2277 = vmatpush1.msra.mxu0 %v6230_v33  ;;  %2210 = vmatpush1.msra.mxu1 %v6252_v12 }
 0x74c   :  { %2278 = vmatprep.subr.mxu0 %v6236_v35  ;;  %2211 = vmatprep.subr.mxu1 %v6258_v61 }
 0x74d   :  { %2279 = vmatpush1.msra.mxu0 %v6242_v53  ;;  %2212 = vmatpush1.msra.mxu1 %v6264_v1 }
 0x74e   :  { %2280 = vmatprep.subr.mxu0 %v6248_v5  ;;  %2213 = vmatprep.subr.mxu1 %v6270_v63 }
 0x74f   :  { %2281 = vmatpush1.msra.mxu0 %v6254_v3  ;;  %2214 = vmatpush1.msra.mxu1 %v6276_v11 }
 0x750   :  { %2282 = vmatprep.subr.mxu0 %v6260_v59  ;;  %2215 = vmatprep.subr.mxu1 %v6280_v6 }
 0x751   :  { %2283 = vmatpush1.msra.mxu0 %v6266_v7  ;;  %2216 = vmatpush1.msra.mxu1 %v6286_v22 }
 0x752   :  { %2284 = vmatprep.subr.mxu0 %v6272_v15  ;;  %2217 = vmatprep.subr.mxu1 %v6292_v24 }
 0x753   :  { %2285 = vmatpush1.msra.mxu0 %v6278_v10  ;;  %2218 = vmatpush1.msra.mxu1 %v6296_v26 }
 0x754   :  { %2286 = vmatprep.subr.mxu0 %v6284_v21  ;;  %2219 = vmatprep.subr.mxu1 %v6302_v29 }
 0x755   :  { %2287 = vmatpush1.msra.mxu0 %v6288_v23  ;;  %2220 = vmatpush1.msra.mxu1 %v6308_v31 }
 0x756   :  { %2288 = vmatprep.subr.mxu0 %v6294_v25  ;;  %2221 = vmatprep.subr.mxu1 %v6314_v32 }
 0x757   :  { %2289 = vmatpush1.msra.mxu0 %v6300_v28  ;;  %2222 = vmatpush1.msra.mxu1 %v6320_v39 }
 0x758   :  { %2290 = vmatprep.subr.mxu0 %v6306_v30  ;;  %2223 = vmatprep.subr.mxu1 %v6326_v9 }
 0x759   :  { %2291 = vmatpush1.msra.mxu0 %v6312_v37  ;;  %2224 = vmatpush1.msra.mxu1 %v6332_v54 }
 0x75a   :  { %2292 = vmatprep.subr.mxu0 %v6318_v38  ;;  %2225 = vmatprep.subr.mxu1 %v6338_v60  ;;  %v6372_v60 = vld [vmem:[#allocation7 + $0x40] sm:$0xff] }
 0x75b   :  { %2293 = vmatpush1.msra.mxu0 %v6324_v41  ;;  %2226 = vmatpush1.msra.mxu1 %v6344_v8  ;;  %7938 = vst [vmem:[#allocation55_spill] sm:$0xff] %v6372_v60  ;;  %v6378_v8 = vld [vmem:[#allocation7 + $0x18] sm:$0xff] }
 0x75c   :  { %2294 = vmatprep.subr.mxu0 %v6330_v4  ;;  %2227 = vmatprep.subr.mxu1 %v6350_v42  ;;  %7940 = vst [vmem:[#allocation57_spill] sm:$0xff] %v6378_v8  ;;  %v6384_v42 = vld [vmem:[#allocation7 + $0x10] sm:$0xff] }
 0x75d   :  { %2295 = vmatpush1.msra.mxu0 %v6336_v56  ;;  %v6368_v56 = vld [vmem:[#allocation7 + $0x30] sm:$0xff]  ;;  %2228 = vmatpush1.msra.mxu1 %v6356_v45  ;;  %7942 = vst [vmem:[#allocation59_spill] sm:$0xff] %v6384_v42 }
 0x75e   :  { %2296 = vmatprep.subr.mxu0 %v6342_v62  ;;  %7937 = vst [vmem:[#allocation54_spill] sm:$0xff] %v6368_v56  ;;  %v6374_v62 = vld [vmem:[#allocation7 + $0x8] sm:$0xff]  ;;  %2229 = vmatprep.subr.mxu1 %v6362_v47 }
 0x75f   :  { %2297 = vmatpush1.msra.mxu0 %v6348_v2  ;;  %7939 = vst [vmem:[#allocation56_spill] sm:$0xff] %v6374_v62  ;;  %v6380_v2 = vld [vmem:[#allocation7] sm:$0xff]  ;;  %2230 = vmatpush1.msra.mxu1 %v6368_v56 }
 0x760   :  { %2298 = vmatprep.subr.mxu0 %v6354_v43  ;;  %7941 = vst [vmem:[#allocation58_spill] sm:$0xff] %v6380_v2  ;;  %2231 = vmatprep.subr.mxu1 %v6374_v62 }
 0x761   :  { %2299 = vmatpush1.msra.mxu0 %v6360_v46  ;;  %2232 = vmatpush1.msra.mxu1 %v6380_v2 }
 0x762   :  { %2300 = vmatprep.subr.mxu0 %v6366_v48  ;;  %2336 = vmatprep.mubr.f32.mxu0 %v7863_v0 }
 0x763   :  { %2301 = vmatpush1.msra.mxu0 %v6372_v60  ;;  %2365 = vmatprep.subr.mxu1 %v6198_v50 }
 0x764   :  { %2302 = vmatprep.subr.mxu0 %v6378_v8 }
 0x765   :  { %2303 = vmatpush1.msra.mxu0 %v6384_v42 }
 0x766   :  { %2436 = vmatprep.subr.mxu0 %v6200_v51 }
 0x7fa   :  { %v1745_v56 = vpop.f32.mrf.mxu0  ;;  %v1816_v48 = vpop.f32.mrf.mxu1 }
 0x7fb   :  { %v1821_v47 = vrot.slane %v1745_v56, 2  ;;  %v1840_v51 = vadd.f32 %v6158_v27, %v1816_v48  ;;  %v7943_v27 = vld [vmem:[#allocation40_spill] sm:$0xff] }
 0x7fc   :  { %v1747_v60 = vpop.f32.mrf.mxu0  ;;  %v4789_v46 = vpop.f32.mrf.mxu1 }
 0x7fd   :  { %v1823_v62 = vadd.f32 %v1821_v47, %v7882_v44  ;;  %v1831_v45 = vrot.slane %v1747_v60, 2  ;;  %v1842_v4 = vrot.slane %v1840_v51, 2  ;;  %v7946_v51 = vld [vmem:[#allocation43_spill] sm:$0xff]  ;;  %v7949_v46 = vld [vmem:[#allocation44_spill] sm:$0xff]  ;;  %v7950_v47 = vld [vmem:[#allocation45_spill] sm:$0xff] }
 0x7fe   :  { %v1968_v48 = vpop.f32.mrf.mxu0 }
 0x7ff   :  { %v4306_v8 = vmul.f32 -1.442695, %v1823_v62  ;;  %v1833_v2 = vadd.f32 %v1831_v45, %v7883_v49  ;;  %v1849_v62 = vrot.slane %v6163_v57, 6  ;;  %v7944_v57 = vld [vmem:[#allocation41_spill] sm:$0xff] }
 0x801   :  { %4917 = vpow2.f32 %v4306_v8  ;;  %v4307_v43 = vmul.f32 -1.442695, %v1833_v2 }
 0x803   :  { %4919 = vpow2.f32 %v4307_v43 }
 0x80e   :  { %v4918_v42 = vpop.eup %4917 }
 0x80f   :  { %v1827_v0 = vadd.f32 1.0, %v4918_v42 }
 0x810   :  { %v4920_v50 = vpop.eup %4919 }
 0x811   :  { %4921 = vrcp.f32 %v1827_v0  ;;  %v1837_v54 = vadd.f32 1.0, %v4920_v50  ;;  %v7945_v50 = vld [vmem:[#allocation42_spill] sm:$0xff] }
 0x813   :  { %4923 = vrcp.f32 %v1837_v54  ;;  %v7948_v54 = vld [vmem:[#allocation21_spill] sm:$0xff] }
 0x81e   :  { %v4922_v56 = vpop.eup %4921 }
 0x81f   :  { %v1844_v9 = vmul.f32 %v4922_v56, %v1842_v4  ;;  %v7951_v56 = vld [vmem:[#allocation46_spill] sm:$0xff] }
 0x820   :  { %v4924_v60 = vpop.eup %4923 }
 0x821   :  { %v1845_v44 = vadd.f32 %v1844_v9, %v7884_v18  ;;  %v1847_v49 = vsub.f32 1.0, %v4924_v60  ;;  %v1851_v43 = vmul.f32 %v4924_v60, %v1849_v62  ;;  %v1856_v18 = vld [vmem:[%s7550_s9] sm:$0x7]  ;;  %v7947_v9 = vld [vmem:[#allocation20_spill] sm:$0xff]  ;;  %v7953_v60 = vld [vmem:[#allocation23_spill] sm:$0xff] }
 0x822   :  { %v1869_v4 = vrot.slane %v1856_v18, %v7947_v9  ;;  %v1861_v45 = vrot.slane %v1856_v18, %v7948_v54  ;;  %v1865_v62 = vrot.slane %v1856_v18, %v7953_v60  ;;  %v7957_v9 = vld [vmem:[#allocation50_spill] sm:$0xff]  ;;  %v7958_v54 = vld [vmem:[#allocation51_spill] sm:$0xff] }
 0x823   :  { %4925 = vtanh.f32 %v1845_v44  ;;  %v7952_v44 = vld [vmem:[#allocation47_spill] sm:$0xff]  ;;  %v7963_v60 = vld [vmem:[#allocation54_spill] sm:$0xff] }
 0x830   :  { %v4926_v8 = vpop.eup %4925 }
 0x831   :  { %v1848_v2 = vmul.f32 %v4926_v8, %v1847_v49  ;;  %v6460_v49 = vadd.f32 %v1968_v48, %v1861_v45  ;;  %v7955_v8 = vld [vmem:[#allocation48_spill] sm:$0xff] }
 0x833   :  { %v1852_v42 = vadd.f32 %v1851_v43, %v1848_v2  ;;  %7954 = vst [vmem:[#allocation44_spill] sm:$0xff] %v6460_v49  ;;  %v7956_v2 = vld [vmem:[#allocation49_spill] sm:$0xff]  ;;  %v4794_v43 = vpop.f32.mrf.mxu1  ;;  %v7964_v49 = vld [vmem:[#allocation55_spill] sm:$0xff] }
 0x835   :  { %v6400_v0 = vrot.slane %v1852_v42, 6  ;;  %v1970_v42 = vpop.f32.mrf.mxu0  ;;  %v2045_v18 = vpop.f32.mrf.mxu1 }
 0x837   :  { %2266 = vmatmul.mubr.f32.vlgmr.msra.gmra.mxu1 %v6400_v0  ;;  %2337 = vmatmul.mubr.f32.vlgmr.msra.gmra.mxu0 %v6400_v0  ;;  %v1974_v48 = vpop.f32.mrf.mxu0 }
 0x838   :  { %2366 = vmatpush1.msra.mxu1 %v6204_v52  ;;  %2437 = vmatpush1.msra.mxu0 %v6206_v14 }
 0x839   :  { %2367 = vmatprep.subr.mxu1 %v6210_v36  ;;  %2438 = vmatprep.subr.mxu0 %v6212_v40 }
 0x83a   :  { %2368 = vmatpush1.msra.mxu1 %v6216_v58  ;;  %2439 = vmatpush1.msra.mxu0 %v6218_v16 }
 0x83b   :  { %2369 = vmatprep.subr.mxu1 %v6222_v17  ;;  %2440 = vmatprep.subr.mxu0 %v6224_v19 }
 0x83c   :  { %2370 = vmatpush1.msra.mxu1 %v6228_v20  ;;  %2441 = vmatpush1.msra.mxu0 %v6230_v33 }
 0x83d   :  { %2371 = vmatprep.subr.mxu1 %v6234_v34  ;;  %2442 = vmatprep.subr.mxu0 %v6236_v35 }
 0x83e   :  { %2372 = vmatpush1.msra.mxu1 %v6240_v55  ;;  %2443 = vmatpush1.msra.mxu0 %v6242_v53 }
 0x83f   :  { %2373 = vmatprep.subr.mxu1 %v6246_v13  ;;  %2444 = vmatprep.subr.mxu0 %v6248_v5 }
 0x840   :  { %2374 = vmatpush1.msra.mxu1 %v6252_v12  ;;  %2445 = vmatpush1.msra.mxu0 %v6254_v3 }
 0x841   :  { %2375 = vmatprep.subr.mxu1 %v6258_v61  ;;  %2446 = vmatprep.subr.mxu0 %v6260_v59 }
 0x842   :  { %2376 = vmatpush1.msra.mxu1 %v6264_v1  ;;  %2447 = vmatpush1.msra.mxu0 %v6266_v7  ;;  %v6493_v7 = vld [vmem:[%s7551_s10] ss:$0 sm:$0xff] }
 0x843   :  { %2377 = vmatprep.subr.mxu1 %v6270_v63  ;;  %2448 = vmatprep.subr.mxu0 %v6272_v15 }
 0x844   :  { %2378 = vmatpush1.msra.mxu1 %v6276_v11  ;;  %2449 = vmatpush1.msra.mxu0 %v6278_v10 }
 0x845   :  { %2379 = vmatprep.subr.mxu1 %v6280_v6  ;;  %2450 = vmatprep.subr.mxu0 %v6284_v21 }
 0x846   :  { %2380 = vmatpush1.msra.mxu1 %v6286_v22  ;;  %2451 = vmatpush1.msra.mxu0 %v6288_v23 }
 0x847   :  { %2381 = vmatprep.subr.mxu1 %v6292_v24  ;;  %2452 = vmatprep.subr.mxu0 %v6294_v25 }
 0x848   :  { %2382 = vmatpush1.msra.mxu1 %v6296_v26  ;;  %2453 = vmatpush1.msra.mxu0 %v6300_v28 }
 0x849   :  { %2383 = vmatprep.subr.mxu1 %v6302_v29  ;;  %2454 = vmatprep.subr.mxu0 %v6306_v30 }
 0x84a   :  { %2384 = vmatpush1.msra.mxu1 %v6308_v31  ;;  %2455 = vmatpush1.msra.mxu0 %v6312_v37 }
 0x84b   :  { %2385 = vmatprep.subr.mxu1 %v6314_v32  ;;  %2456 = vmatprep.subr.mxu0 %v6318_v38  ;;  %v6477_v38 = vadd.f32 %v1974_v48, %v1861_v45  ;;  %v2123_v48 = vpop.f32.mrf.mxu1 }
 0x84c   :  { %2386 = vmatpush1.msra.mxu1 %v6320_v39  ;;  %2457 = vmatpush1.msra.mxu0 %v6324_v41  ;;  %v7966_v41 = vld [vmem:[#allocation56_spill] sm:$0xff]  ;;  %v2124_v30 = vadd.f32 %v2123_v48, %v1861_v45  ;;  %v6501_v48 = vld [vmem:[#allocation7 + $0x2c8] sm:$0xff] }
 0x84d   :  { %2387 = vmatprep.subr.mxu1 %v7943_v27  ;;  %2458 = vmatprep.subr.mxu0 %v7944_v57  ;;  %v7961_v57 = vld [vmem:[#allocation52_spill] sm:$0xff]  ;;  %7967 = vst [vmem:[#allocation63_spill] sm:$0xff] %v6477_v38  ;;  %v2125_v38 = vpop.f32.mrf.mxu1 }
 0x84e   :  { %2388 = vmatpush1.msra.mxu1 %v7945_v50  ;;  %2459 = vmatpush1.msra.mxu0 %v7946_v51  ;;  %v6468_v51 = vadd.f32 %v1970_v42, %v1865_v62  ;;  %v7969_v42 = vld [vmem:[#allocation57_spill] sm:$0xff] }
 0x84f   :  { %2389 = vmatprep.subr.mxu1 %v7949_v46  ;;  %2460 = vmatprep.subr.mxu0 %v7950_v47  ;;  %v6466_v47 = vadd.f32 %v4794_v43, %v1869_v4  ;;  %v1976_v43 = vpop.f32.mrf.mxu0 }
 0x850   :  { %2390 = vmatpush1.msra.mxu1 %v7951_v56  ;;  %2461 = vmatpush1.msra.mxu0 %v7952_v44  ;;  %7960 = vst [vmem:[#allocation61_spill] sm:$0xff] %v6468_v51  ;;  %v7962_v44 = vld [vmem:[#allocation53_spill] sm:$0xff]  ;;  %v6481_v51 = vadd.f32 %v1976_v43, %v1865_v62 }
 0x851   :  { %2391 = vmatprep.subr.mxu1 %v7955_v8  ;;  %2462 = vmatprep.subr.mxu0 %v7956_v2  ;;  %7959 = vst [vmem:[#allocation60_spill] sm:$0xff] %v6466_v47  ;;  %v6474_v2 = vadd.f32 %v2045_v18, %v1869_v4  ;;  %v7968_v47 = vld [vmem:[#allocation58_spill] sm:$0xff]  ;;  %v2194_v37 = vpop.f32.mrf.mxu0  ;;  %v7973_v18 = vld [vmem:[#allocation13_spill] sm:$0xff] }
 0x852   :  { %2392 = vmatpush1.msra.mxu1 %v7957_v9  ;;  %2463 = vmatpush1.msra.mxu0 %v7958_v54  ;;  %7970 = vst [vmem:[#allocation64_spill] sm:$0xff] %v6481_v51  ;;  %v7972_v54 = vld [vmem:[#allocation59_spill] sm:$0xff] }
 0x853   :  { %2393 = vmatprep.subr.mxu1 %v7961_v57  ;;  %2464 = vmatprep.subr.mxu0 %v7962_v44  ;;  %7965 = vst [vmem:[#allocation62_spill] sm:$0xff] %v6474_v2  ;;  %v7971_v44 = vmov 0.0   ;;  %v4799_v2 = vpop.f32.mrf.mxu0 }
 0x854   :  { %2394 = vmatpush1.msra.mxu1 %v7963_v60  ;;  %2465 = vmatpush1.msra.mxu0 %v7964_v49  ;;  %v6487_v49 = vld [vmem:[#allocation7 + $0x2f8] sm:$0xff] }
 0x855   :  { %2395 = vmatprep.subr.mxu1 %v7966_v41  ;;  %2466 = vmatprep.subr.mxu0 %v7969_v42  ;;  %7974 = vst [vmem:[#allocation65_spill] sm:$0xff] %v6487_v49 }
 0x856   :  { %2396 = vmatpush1.msra.mxu1 %v7968_v47  ;;  %2429 = vmatprep.mubr.f32.mxu1 %v7971_v44 }
 0x857   :  { %2467 = vmatpush1.msra.mxu0 %v7972_v54  ;;  %2500 = vmatprep.mubr.f32.mxu0 %v7971_v44  ;;  %v2126_v54 = vadd.f32 %v2125_v38, %v1865_v62 }
 0x858   :  { %2617 = vmatprep.subr.mxu0 %v7973_v18  ;;  %2507 = vmatprep.subr.mxu1 %v6487_v49 }
 0x8f7   :  { %v2267_v42 = vpop.f32.mrf.mxu1  ;;  %v2338_v43 = vpop.f32.mrf.mxu0 }
 0x8f8   :  { %v2342_v51 = vadd.f32 %v2267_v42, %v2124_v30  ;;  %v2356_v30 = vadd.f32 %v6493_v7, %v2338_v43  ;;  %v6521_v43 = vld [vmem:[#allocation7 + $0x260] sm:$0xff] }
 0x8f9   :  { %v2340_v28 = vpop.f32.mrf.mxu0  ;;  %v2269_v23 = vpop.f32.mrf.mxu1 }
 0x8fa   :  { %v4320_v25 = vmul.f32 -1.442695, %v2342_v51  ;;  %v2349_v21 = vadd.f32 %v2269_v23, %v2126_v54  ;;  %v2195_v51 = vadd.f32 %v2194_v37, %v1869_v4  ;;  %v6509_v37 = vld [vmem:[#allocation7 + $0x298] sm:$0xff]  ;;  %v6517_v4 = vld [vmem:[#allocation7 + $0x268] sm:$0xff] }
 0x8fc   :  { %4927 = vpow2.f32 %v4320_v25  ;;  %v4321_v10 = vmul.f32 -1.442695, %v2349_v21 }
 0x8fe   :  { %4929 = vpow2.f32 %v4321_v10 }
 0x909   :  { %v4928_v18 = vpop.eup %4927 }
 0x90a   :  { %v2346_v2 = vadd.f32 1.0, %v4928_v18  ;;  %v6499_v18 = vld [vmem:[#allocation7 + $0x2f0] sm:$0xff] }
 0x90b   :  { %v4930_v15 = vpop.eup %4929 }
 0x90c   :  { %4931 = vrcp.f32 %v2346_v2  ;;  %v2353_v45 = vadd.f32 1.0, %v4930_v15  ;;  %v6506_v15 = vld [vmem:[#allocation7 + $0x2c0] sm:$0xff]  ;;  %v6525_v2 = vld [vmem:[#allocation7 + $0x238] sm:$0xff] }
 0x90e   :  { %4933 = vrcp.f32 %v2353_v45  ;;  %v6529_v45 = vld [vmem:[#allocation7 + $0x230] sm:$0xff] }
 0x919   :  { %v4932_v28 = vpop.eup %4931 }
 0x91a   :  { %v2357_v42 = vmul.f32 %v4932_v28, %v2356_v30  ;;  %v6533_v30 = vld [vmem:[#allocation7 + $0x208] sm:$0xff]  ;;  %v6537_v28 = vld [vmem:[#allocation7 + $0x200] sm:$0xff] }
 0x91b   :  { %v4934_v21 = vpop.eup %4933 }
 0x91c   :  { %v2358_v25 = vadd.f32 %v2357_v42, %v2195_v51  ;;  %v2360_v10 = vsub.f32 1.0, %v4934_v21  ;;  %v2362_v54 = vmul.f32 %v4934_v21, %v6400_v0  ;;  %v6513_v0 = vld [vmem:[#allocation7 + $0x290] sm:$0xff]  ;;  %v6541_v51 = vld [vmem:[#allocation7 + $0x1d8] sm:$0xff]  ;;  %v6553_v21 = vld [vmem:[#allocation7 + $0x1a0] sm:$0xff] }
 0x91d   :  { %v6545_v42 = vld [vmem:[#allocation7 + $0x1d0] sm:$0xff] }
 0x91e   :  { %4935 = vtanh.f32 %v2358_v25  ;;  %v6549_v25 = vld [vmem:[#allocation7 + $0x1a8] sm:$0xff] }
 0x92b   :  { %v4936_v23 = vpop.eup %4935 }
 0x92c   :  { %v2361_v38 = vmul.f32 %v4936_v23, %v2360_v10  ;;  %v6557_v10 = vld [vmem:[#allocation7 + $0x178] sm:$0xff]  ;;  %v6561_v23 = vld [vmem:[#allocation7 + $0x170] sm:$0xff] }
 0x92e   :  { %v6497_v62 = vadd.f32 %v2362_v54, %v2361_v38  ;;  %v6565_v38 = vld [vmem:[#allocation7 + $0x148] sm:$0xff]  ;;  %v6569_v54 = vld [vmem:[#allocation7 + $0x140] sm:$0xff] }
 0x92f   :  { %7975 = vst [vmem:[#allocation66_spill] sm:$0xff] %v6569_v54 }
 0x930   :  { %2364 = vst [vmem:[#allocation2] sm:$0x3] %v6497_v62  ;;  %2430 = vmatmul.mubr.f32.vlgmr.msra.gmra.mxu1 %v6497_v62  ;;  %2501 = vmatmul.mubr.f32.vlgmr.msra.gmra.mxu0 %v6497_v62 }
 0x931   :  { %2508 = vmatpush1.msra.mxu1 %v6499_v18  ;;  %2571 = vmatprep.mubr.f32.mxu1 %v7971_v44 }
 0x932   :  { %2509 = vmatprep.subr.mxu1 %v6501_v48  ;;  %2618 = vmatpush1.msra.mxu0 %v6204_v52 }
 0x933   :  { %2510 = vmatpush1.msra.mxu1 %v6506_v15  ;;  %2619 = vmatprep.subr.mxu0 %v6210_v36 }
 0x934   :  { %2511 = vmatprep.subr.mxu1 %v6509_v37  ;;  %2620 = vmatpush1.msra.mxu0 %v6216_v58 }
 0x935   :  { %2512 = vmatpush1.msra.mxu1 %v6513_v0  ;;  %2621 = vmatprep.subr.mxu0 %v6222_v17 }
 0x936   :  { %2513 = vmatprep.subr.mxu1 %v6517_v4  ;;  %2622 = vmatpush1.msra.mxu0 %v6228_v20 }
 0x937   :  { %2514 = vmatpush1.msra.mxu1 %v6521_v43  ;;  %2623 = vmatprep.subr.mxu0 %v6234_v34 }
 0x938   :  { %2515 = vmatprep.subr.mxu1 %v6525_v2  ;;  %2624 = vmatpush1.msra.mxu0 %v6240_v55 }
 0x939   :  { %2516 = vmatpush1.msra.mxu1 %v6529_v45  ;;  %2625 = vmatprep.subr.mxu0 %v6246_v13 }
 0x93a   :  { %2517 = vmatprep.subr.mxu1 %v6533_v30  ;;  %2626 = vmatpush1.msra.mxu0 %v6252_v12 }
 0x93b   :  { %2518 = vmatpush1.msra.mxu1 %v6537_v28  ;;  %2627 = vmatprep.subr.mxu0 %v6258_v61 }
 0x93c   :  { %2519 = vmatprep.subr.mxu1 %v6541_v51  ;;  %2628 = vmatpush1.msra.mxu0 %v6264_v1 }
 0x93d   :  { %2520 = vmatpush1.msra.mxu1 %v6545_v42  ;;  %2629 = vmatprep.subr.mxu0 %v6270_v63  ;;  %v6573_v63 = vld [vmem:[#allocation7 + $0x118] sm:$0xff] }
 0x93e   :  { %2521 = vmatprep.subr.mxu1 %v6549_v25  ;;  %2630 = vmatpush1.msra.mxu0 %v6276_v11  ;;  %7976 = vst [vmem:[#allocation67_spill] sm:$0xff] %v6573_v63  ;;  %v6577_v11 = vld [vmem:[#allocation7 + $0x110] sm:$0xff] }
 0x93f   :  { %2522 = vmatpush1.msra.mxu1 %v6553_v21  ;;  %2631 = vmatprep.subr.mxu0 %v6280_v6  ;;  %7977 = vst [vmem:[#allocation68_spill] sm:$0xff] %v6577_v11  ;;  %v6581_v6 = vld [vmem:[#allocation7 + $0xe8] sm:$0xff] }
 0x940   :  { %2523 = vmatprep.subr.mxu1 %v6557_v10  ;;  %2632 = vmatpush1.msra.mxu0 %v6286_v22  ;;  %7978 = vst [vmem:[#allocation69_spill] sm:$0xff] %v6581_v6  ;;  %v6585_v22 = vld [vmem:[#allocation7 + $0xe0] sm:$0xff] }
 0x941   :  { %2524 = vmatpush1.msra.mxu1 %v6561_v23  ;;  %2633 = vmatprep.subr.mxu0 %v6292_v24  ;;  %7979 = vst [vmem:[#allocation70_spill] sm:$0xff] %v6585_v22  ;;  %v6589_v24 = vld [vmem:[#allocation7 + $0xb8] sm:$0xff] }
 0x942   :  { %2525 = vmatprep.subr.mxu1 %v6565_v38  ;;  %2634 = vmatpush1.msra.mxu0 %v6296_v26  ;;  %7980 = vst [vmem:[#allocation71_spill] sm:$0xff] %v6589_v24  ;;  %v6593_v26 = vld [vmem:[#allocation7 + $0xb0] sm:$0xff] }
 0x943   :  { %2526 = vmatpush1.msra.mxu1 %v6569_v54  ;;  %2635 = vmatprep.subr.mxu0 %v6302_v29  ;;  %7981 = vst [vmem:[#allocation72_spill] sm:$0xff] %v6593_v26  ;;  %v6597_v29 = vld [vmem:[#allocation7 + $0x88] sm:$0xff] }
 0x944   :  { %2527 = vmatprep.subr.mxu1 %v6573_v63  ;;  %2636 = vmatpush1.msra.mxu0 %v6308_v31  ;;  %7982 = vst [vmem:[#allocation73_spill] sm:$0xff] %v6597_v29  ;;  %v6601_v31 = vld [vmem:[#allocation7 + $0x80] sm:$0xff] }
 0x945   :  { %2528 = vmatpush1.msra.mxu1 %v6577_v11  ;;  %2637 = vmatprep.subr.mxu0 %v6314_v32  ;;  %7983 = vst [vmem:[#allocation74_spill] sm:$0xff] %v6601_v31  ;;  %v6605_v32 = vld [vmem:[#allocation7 + $0x58] sm:$0xff] }
 0x946   :  { %2529 = vmatprep.subr.mxu1 %v6581_v6  ;;  %2638 = vmatpush1.msra.mxu0 %v6320_v39  ;;  %7984 = vst [vmem:[#allocation75_spill] sm:$0xff] %v6605_v32  ;;  %v6609_v39 = vld [vmem:[#allocation7 + $0x50] sm:$0xff] }
 0x947   :  { %2530 = vmatpush1.msra.mxu1 %v6585_v22  ;;  %2639 = vmatprep.subr.mxu0 %v7943_v27  ;;  %7985 = vst [vmem:[#allocation76_spill] sm:$0xff] %v6609_v39  ;;  %v6613_v27 = vld [vmem:[#allocation7 + $0x28] sm:$0xff] }
 0x948   :  { %2531 = vmatprep.subr.mxu1 %v6589_v24  ;;  %2640 = vmatpush1.msra.mxu0 %v7945_v50  ;;  %7986 = vst [vmem:[#allocation77_spill] sm:$0xff] %v6613_v27  ;;  %v6617_v50 = vld [vmem:[#allocation7 + $0x20] sm:$0xff] }
 0x949   :  { %2532 = vmatpush1.msra.mxu1 %v6593_v26  ;;  %2641 = vmatprep.subr.mxu0 %v7949_v46  ;;  %7987 = vst [vmem:[#allocation78_spill] sm:$0xff] %v6617_v50 }
 0x94a   :  { %2533 = vmatprep.subr.mxu1 %v6597_v29  ;;  %2642 = vmatpush1.msra.mxu0 %v7951_v56 }
 0x94b   :  { %2534 = vmatpush1.msra.mxu1 %v6601_v31  ;;  %2643 = vmatprep.subr.mxu0 %v7955_v8  ;;  %v7988_v8 = vld [vmem:[#allocation24_spill] sm:$0xff] }
 0x94c   :  { %2535 = vmatprep.subr.mxu1 %v6605_v32  ;;  %2644 = vmatpush1.msra.mxu0 %v7957_v9  ;;  %v8016_v9 = vld [vmem:[#allocation20_spill] sm:$0xff] }
 0x94d   :  { %2536 = vmatpush1.msra.mxu1 %v6609_v39  ;;  %2645 = vmatprep.subr.mxu0 %v7961_v57  ;;  %v8014_v57 = vld [vmem:[#allocation23_spill] sm:$0xff] }
 0x94e   :  { %2537 = vmatprep.subr.mxu1 %v6613_v27  ;;  %2646 = vmatpush1.msra.mxu0 %v7963_v60 }
 0x94f   :  { %2538 = vmatpush1.msra.mxu1 %v6617_v50  ;;  %2647 = vmatprep.subr.mxu0 %v7966_v41 }
 0x950   :  { %2572 = vmatmul.mubr.f32.vlgmr.msra.gmra.mxu1 %v6497_v62  ;;  %2688 = vmatprep.subr.mxu1 %v7988_v8  ;;  %v7993_v8 = vld [vmem:[#allocation27_spill] sm:$0xff] }
 0x951   :  { %2689 = vmatpush1.msra.mxu1 %v6206_v14  ;;  %2648 = vmatpush1.msra.mxu0 %v7968_v47  ;;  %v7989_v14 = vld [vmem:[#allocation14_spill] sm:$0xff] }
 0x952   :  { %2690 = vmatprep.subr.mxu1 %v6212_v40  ;;  %2681 = vmatprep.mubr.f32.mxu0 %v7971_v44  ;;  %v7990_v40 = vld [vmem:[#allocation18_spill] sm:$0xff] }
 0x953   :  { %2691 = vmatpush1.msra.mxu1 %v6218_v16  ;;  %2752 = vmatprep.mubr.f32.mxu1 %v7971_v44  ;;  %v7991_v16 = vld [vmem:[#allocation17_spill] sm:$0xff] }
 0x954   :  { %2692 = vmatprep.subr.mxu1 %v6224_v19  ;;  %2759 = vmatprep.subr.mxu0 %v6487_v49  ;;  %v7992_v19 = vld [vmem:[#allocation12_spill] sm:$0xff] }
 0x955   :  { %2693 = vmatpush1.msra.mxu1 %v6230_v33  ;;  %v7994_v33 = vld [vmem:[#allocation29_spill] sm:$0xff]  ;;  %v8013_v49 = vld [vmem:[#allocation44_spill] sm:$0xff] }
 0x956   :  { %2694 = vmatprep.subr.mxu1 %v6236_v35  ;;  %v7995_v35 = vld [vmem:[#allocation31_spill] sm:$0xff] }
 0x957   :  { %2695 = vmatpush1.msra.mxu1 %v6242_v53  ;;  %v7996_v53 = vld [vmem:[#allocation33_spill] sm:$0xff] }
 0x958   :  { %2696 = vmatprep.subr.mxu1 %v6248_v5  ;;  %v7997_v5 = vld [vmem:[#allocation35_spill] sm:$0xff] }
 0x959   :  { %2697 = vmatpush1.msra.mxu1 %v6254_v3  ;;  %v7998_v3 = vld [vmem:[#allocation37_spill] sm:$0xff] }
 0x95a   :  { %2698 = vmatprep.subr.mxu1 %v6260_v59  ;;  %v7999_v59 = vld [vmem:[#allocation39_spill] sm:$0xff] }
 0x95b   :  { %2699 = vmatpush1.msra.mxu1 %v7989_v14  ;;  %v8000_v14 = vld [vmem:[#allocation41_spill] sm:$0xff] }
 0x95c   :  { %2700 = vmatprep.subr.mxu1 %v7990_v40  ;;  %v8001_v40 = vld [vmem:[#allocation43_spill] sm:$0xff] }
 0x95d   :  { %2701 = vmatpush1.msra.mxu1 %v7991_v16  ;;  %v8002_v16 = vld [vmem:[#allocation45_spill] sm:$0xff] }
 0x95e   :  { %2702 = vmatprep.subr.mxu1 %v7992_v19  ;;  %v8003_v19 = vld [vmem:[#allocation47_spill] sm:$0xff] }
 0x95f   :  { %2703 = vmatpush1.msra.mxu1 %v7993_v8  ;;  %v8004_v8 = vld [vmem:[#allocation49_spill] sm:$0xff] }
 0x960   :  { %2704 = vmatprep.subr.mxu1 %v7994_v33  ;;  %v8005_v33 = vld [vmem:[#allocation51_spill] sm:$0xff] }
 0x961   :  { %2705 = vmatpush1.msra.mxu1 %v7995_v35  ;;  %v8006_v35 = vld [vmem:[#allocation53_spill] sm:$0xff] }
 0x962   :  { %2706 = vmatprep.subr.mxu1 %v7996_v53  ;;  %v8007_v53 = vld [vmem:[#allocation55_spill] sm:$0xff] }
 0x963   :  { %2707 = vmatpush1.msra.mxu1 %v7997_v5  ;;  %v8008_v5 = vld [vmem:[#allocation57_spill] sm:$0xff] }
 0x964   :  { %2708 = vmatprep.subr.mxu1 %v7998_v3  ;;  %v8009_v3 = vld [vmem:[#allocation59_spill] sm:$0xff] }
 0x965   :  { %2709 = vmatpush1.msra.mxu1 %v7999_v59  ;;  %v8010_v59 = vld [vmem:[#allocation13_spill] sm:$0xff] }
 0x966   :  { %2710 = vmatprep.subr.mxu1 %v8000_v14  ;;  %v2587_v14 = vstv %s2586_s15 }
 0x967   :  { %2711 = vmatpush1.msra.mxu1 %v8001_v40 }
 0x968   :  { %2712 = vmatprep.subr.mxu1 %v8002_v16  ;;  %v246_v16 = vld [vmem:[%s7552_s11] sm:$0x7]  ;;  %s4324_s11 = sld [smem:[#allocation3 + $0x1]] }
 0x969   :  { %2713 = vmatpush1.msra.mxu1 %v8003_v19  ;;  %v8011_v19 = vld [vmem:[#allocation21_spill] sm:$0xff]  ;;  %v6676_v32 = vrot.slane %v246_v16, %v8016_v9 }
 0x96a   :  { %2714 = vmatprep.subr.mxu1 %v8004_v8  ;;  %v6668_v40 = vrot.slane %v246_v16, %v8011_v19  ;;  %v6673_v19 = vrot.slane %v246_v16, %v8014_v57 }
 0x96b   :  { %2715 = vmatpush1.msra.mxu1 %v8005_v33 }
 0x96c   :  { %2716 = vmatprep.subr.mxu1 %v8006_v35  ;;  %8012 = vst [vmem:[#allocation24_spill] sm:$0xff] %v6668_v40  ;;  %v2582_v35 = vstv %s2578_s29  ;;  %8015 = vst [vmem:[#allocation13_spill] sm:$0xff] %v6673_v19 }
 0x96d   :  { %2717 = vmatpush1.msra.mxu1 %v8007_v53 }
 0x96e   :  { %2718 = vmatprep.subr.mxu1 %v8008_v5  ;;  %s2838_s8 = ssub.f32 1.0, %s4324_s11 }
 0x96f   :  { %2719 = vmatpush1.msra.mxu1 %v8009_v3  ;;  %v2588_v3 = vmul.f32 %v2587_v14, %v8013_v49 }
 0x970   :  { %2878 = vmatprep.subr.mxu1 %v8010_v59 }
 0x9f0   :  { %v2502_v8 = vpop.f32.mrf.mxu0  ;;  %v2431_v59 = vpop.f32.mrf.mxu1 }
 0x9f1   :  { %v2608_v57 = vadd.f32 %v6493_v7, %v2502_v8  ;;  %v8035_v8 = vld [vmem:[#allocation75_spill] sm:$0xff] }
 0x9f2   :  { %v2504_v33 = vpop.f32.mrf.mxu0  ;;  %v2433_v39 = vpop.f32.mrf.mxu1 }
 0x9f3   :  { %v2579_v53 = vadd.f32 %v2504_v33, %v6668_v40 }
 0x9f5   :  { %v2583_v5 = vmul.f32 %v2582_v35, %v2579_v53 }
 0x9f7   :  { %v2591_v47 = vadd.f32 %v2588_v3, %v2583_v5  ;;  %v8017_v3 = vld [vmem:[#allocation61_spill] sm:$0xff] }
 0x9f8   :  { %v2589_v5 = vmul.f32 %v2587_v14, %v8017_v3 }
 0x9f9   :  { %v2594_v41 = vadd.f32 %v2591_v47, %v2431_v59 }
 0x9fb   :  { %v4322_v50 = vmul.f32 -1.442695, %v2594_v41 }
 0x9fd   :  { %4937 = vpow2.f32 %v4322_v50 }
 0xa0a   :  { %v4938_v60 = vpop.eup %4937 }
 0xa0b   :  { %v2598_v27 = vadd.f32 1.0, %v4938_v60 }
 0xa0d   :  { %4939 = vrcp.f32 %v2598_v27  ;;  %v8018_v27 = vld [vmem:[#allocation62_spill] sm:$0xff] }
 0xa0e   :  { %v2590_v31 = vmul.f32 %v2587_v14, %v8018_v27  ;;  %v8034_v14 = vld [vmem:[#allocation48_spill] sm:$0xff] }
 0xa10   :  { %v2573_v33 = vpop.f32.mrf.mxu1 }
 0xa11   :  { %v2580_v53 = vadd.f32 %v2573_v33, %v6673_v19 }
 0xa12   :  { %v2575_v40 = vpop.f32.mrf.mxu1 }
 0xa13   :  { %v2584_v49 = vmul.f32 %v2582_v35, %v2580_v53  ;;  %v2581_v41 = vadd.f32 %v2575_v40, %v6676_v32 }
 0xa15   :  { %v2592_v50 = vadd.f32 %v2589_v5, %v2584_v49  ;;  %v2585_v60 = vmul.f32 %v2582_v35, %v2581_v41  ;;  %v8038_v5 = vld [vmem:[#allocation52_spill] sm:$0xff]  ;;  %v8039_v41 = vld [vmem:[#allocation77_spill] sm:$0xff] }
 0xa17   :  { %v2601_v47 = vadd.f32 %v2592_v50, %v2433_v39  ;;  %v2593_v9 = vadd.f32 %v2590_v31, %v2585_v60  ;;  %v8031_v31 = vld [vmem:[#allocation73_spill] sm:$0xff]  ;;  %v8040_v50 = vld [vmem:[#allocation54_spill] sm:$0xff] }
 0xa18   :  { %v6752_v60 = vld [vmem:[#allocation7 + $0x2e8] sm:$0xff] }
 0xa19   :  { %v4323_v59 = vmul.f32 -1.442695, %v2601_v47  ;;  %v8042_v47 = vld [vmem:[#allocation56_spill] sm:$0xff]  ;;  %8043 = vst [vmem:[#allocation21_spill] sm:$0xff] %v6752_v60 }
 0xa1a   :  { %v4940_v56 = vpop.eup %4939 }
 0xa1b   :  { %4941 = vpow2.f32 %v4323_v59  ;;  %v2609_v16 = vmul.f32 %v4940_v56, %v2608_v57  ;;  %v8032_v56 = vld [vmem:[#allocation46_spill] sm:$0xff]  ;;  %v6755_v57 = vld [vmem:[#allocation7 + $0x2e0] sm:$0xff] }
 0xa1c   :  { %8044 = vst [vmem:[#allocation23_spill] sm:$0xff] %v6755_v57  ;;  %v8045_v59 = vld [vmem:[#allocation58_spill] sm:$0xff] }
 0xa1d   :  { %v2610_v29 = vadd.f32 %v2609_v16, %v2593_v9  ;;  %v6759_v9 = vld [vmem:[#allocation7 + $0x2b8] sm:$0xff]  ;;  %v6763_v16 = vld [vmem:[#allocation7 + $0x2b0] sm:$0xff] }
 0xa1e   :  { %8046 = vst [vmem:[#allocation20_spill] sm:$0xff] %v6759_v9  ;;  %8047 = vst [vmem:[#allocation62_spill] sm:$0xff] %v6763_v16 }
 0xa28   :  { %v4942_v33 = vpop.eup %4941 }
 0xa29   :  { %v2605_v19 = vadd.f32 1.0, %v4942_v33  ;;  %v6767_v33 = vld [vmem:[#allocation7 + $0x288] sm:$0xff] }
 0xa2b   :  { %4943 = vrcp.f32 %v2605_v19  ;;  %v8036_v19 = vld [vmem:[#allocation50_spill] sm:$0xff] }
 0xa2c   :  { %4945 = vtanh.f32 %v2610_v29  ;;  %v8030_v29 = vld [vmem:[#allocation42_spill] sm:$0xff] }
 0xa38   :  { %v4944_v53 = vpop.eup %4943 }
 0xa39   :  { %v2612_v3 = vsub.f32 1.0, %v4944_v53  ;;  %v4946_v40 = vpop.eup %4945  ;;  %v2614_v39 = vmul.f32 %v4944_v53, %v6497_v62  ;;  %v8033_v62 = vld [vmem:[#allocation74_spill] sm:$0xff]  ;;  %v8049_v53 = vld [vmem:[#allocation65_spill] sm:$0xff] }
 0xa3b   :  { %v2613_v49 = vmul.f32 %v4946_v40, %v2612_v3  ;;  %v8037_v3 = vld [vmem:[#allocation76_spill] sm:$0xff] }
 0xa3c   :  { %v6771_v40 = vld [vmem:[#allocation7 + $0x280] sm:$0xff] }
 0xa3d   :  { %v6684_v35 = vadd.f32 %v2614_v39, %v2613_v49  ;;  %v6774_v49 = vld [vmem:[#allocation7 + $0x258] sm:$0xff]  ;;  %v6777_v39 = vld [vmem:[#allocation7 + $0x250] sm:$0xff] }
 0xa3f   :  { %2616 = vst [vmem:[#allocation2 + $0x2] sm:$0x3] %v6684_v35  ;;  %2682 = vmatmul.mubr.f32.vlgmr.msra.gmra.mxu0 %v6684_v35  ;;  %2753 = vmatmul.mubr.f32.vlgmr.msra.gmra.mxu1 %v6684_v35 }
 0xa40   :  { %2760 = vmatpush1.msra.mxu0 %v6499_v18  ;;  %2823 = vmatprep.mubr.f32.mxu0 %v7971_v44 }
 0xa41   :  { %2761 = vmatprep.subr.mxu0 %v6501_v48  ;;  %2879 = vmatpush1.msra.mxu1 %v6204_v52  ;;  %v8019_v52 = vld [vmem:[#allocation15_spill] sm:$0xff] }
 0xa42   :  { %2762 = vmatpush1.msra.mxu0 %v6506_v15  ;;  %2880 = vmatprep.subr.mxu1 %v6210_v36  ;;  %v8020_v36 = vld [vmem:[#allocation16_spill] sm:$0xff]  ;;  %8048 = vst [vmem:[#allocation15_spill] sm:$0xff] %v6767_v33 }
 0xa43   :  { %2763 = vmatprep.subr.mxu0 %v6509_v37  ;;  %2881 = vmatpush1.msra.mxu1 %v6216_v58  ;;  %v8021_v58 = vld [vmem:[#allocation19_spill] sm:$0xff]  ;;  %8050 = vst [vmem:[#allocation16_spill] sm:$0xff] %v6771_v40 }
 0xa44   :  { %2764 = vmatpush1.msra.mxu0 %v6513_v0  ;;  %2882 = vmatprep.subr.mxu1 %v6222_v17  ;;  %v8022_v17 = vld [vmem:[#allocation26_spill] sm:$0xff]  ;;  %8051 = vst [vmem:[#allocation19_spill] sm:$0xff] %v6774_v49 }
 0xa45   :  { %2765 = vmatprep.subr.mxu0 %v6517_v4  ;;  %2883 = vmatpush1.msra.mxu1 %v6228_v20  ;;  %v8023_v20 = vld [vmem:[#allocation28_spill] sm:$0xff]  ;;  %8052 = vst [vmem:[#allocation26_spill] sm:$0xff] %v6777_v39 }
 0xa46   :  { %2766 = vmatpush1.msra.mxu0 %v6521_v43  ;;  %2884 = vmatprep.subr.mxu1 %v6234_v34  ;;  %v8024_v34 = vld [vmem:[#allocation30_spill] sm:$0xff] }
 0xa47   :  { %2767 = vmatprep.subr.mxu0 %v6525_v2  ;;  %2885 = vmatpush1.msra.mxu1 %v6240_v55  ;;  %v8025_v55 = vld [vmem:[#allocation32_spill] sm:$0xff] }
 0xa48   :  { %2768 = vmatpush1.msra.mxu0 %v6529_v45  ;;  %2886 = vmatprep.subr.mxu1 %v6246_v13  ;;  %v8026_v13 = vld [vmem:[#allocation34_spill] sm:$0xff] }
 0xa49   :  { %2769 = vmatprep.subr.mxu0 %v6533_v30  ;;  %2887 = vmatpush1.msra.mxu1 %v6252_v12  ;;  %v8027_v12 = vld [vmem:[#allocation36_spill] sm:$0xff] }
 0xa4a   :  { %2770 = vmatpush1.msra.mxu0 %v6537_v28  ;;  %2888 = vmatprep.subr.mxu1 %v6258_v61  ;;  %v8028_v61 = vld [vmem:[#allocation38_spill] sm:$0xff] }
 0xa4b   :  { %2771 = vmatprep.subr.mxu0 %v6541_v51  ;;  %2889 = vmatpush1.msra.mxu1 %v6264_v1  ;;  %v8029_v1 = vld [vmem:[#allocation40_spill] sm:$0xff] }
 0xa4c   :  { %2772 = vmatpush1.msra.mxu0 %v6545_v42  ;;  %2890 = vmatprep.subr.mxu1 %v8019_v52  ;;  %v6780_v52 = vld [vmem:[#allocation7 + $0x228] sm:$0xff] }
 0xa4d   :  { %2773 = vmatprep.subr.mxu0 %v6549_v25  ;;  %2891 = vmatpush1.msra.mxu1 %v8020_v36  ;;  %8053 = vst [vmem:[#allocation28_spill] sm:$0xff] %v6780_v52  ;;  %v8054_v36 = vld [vmem:[#allocation25_spill] sm:$0xff] }
 0xa4e   :  { %2774 = vmatpush1.msra.mxu0 %v6553_v21  ;;  %2892 = vmatprep.subr.mxu1 %v8021_v58  ;;  %v8055_v58 = vld [vmem:[#allocation22_spill] sm:$0xff] }
 0xa4f   :  { %2775 = vmatprep.subr.mxu0 %v6557_v10  ;;  %2893 = vmatpush1.msra.mxu1 %v8022_v17  ;;  %v8056_v17 = vld [vmem:[#allocation14_spill] sm:$0xff] }
 0xa50   :  { %2776 = vmatpush1.msra.mxu0 %v6561_v23  ;;  %2894 = vmatprep.subr.mxu1 %v8023_v20  ;;  %v8057_v20 = vld [vmem:[#allocation18_spill] sm:$0xff] }
 0xa51   :  { %2777 = vmatprep.subr.mxu0 %v6565_v38  ;;  %2895 = vmatpush1.msra.mxu1 %v8024_v34  ;;  %v8058_v34 = vld [vmem:[#allocation17_spill] sm:$0xff] }
 0xa52   :  { %2778 = vmatpush1.msra.mxu0 %v6569_v54  ;;  %2896 = vmatprep.subr.mxu1 %v8025_v55  ;;  %v8059_v55 = vld [vmem:[#allocation12_spill] sm:$0xff] }
 0xa53   :  { %2779 = vmatprep.subr.mxu0 %v6573_v63  ;;  %2897 = vmatpush1.msra.mxu1 %v8026_v13  ;;  %v8060_v13 = vld [vmem:[#allocation27_spill] sm:$0xff] }
 0xa54   :  { %2780 = vmatpush1.msra.mxu0 %v6577_v11  ;;  %2898 = vmatprep.subr.mxu1 %v8027_v12  ;;  %v8061_v12 = vld [vmem:[#allocation29_spill] sm:$0xff] }
 0xa55   :  { %2781 = vmatprep.subr.mxu0 %v6581_v6  ;;  %2899 = vmatpush1.msra.mxu1 %v8028_v61  ;;  %v8062_v61 = vld [vmem:[#allocation31_spill] sm:$0xff] }
 0xa56   :  { %2782 = vmatpush1.msra.mxu0 %v6585_v22  ;;  %2900 = vmatprep.subr.mxu1 %v8029_v1  ;;  %v8063_v1 = vld [vmem:[#allocation33_spill] sm:$0xff] }
 0xa57   :  { %2783 = vmatprep.subr.mxu0 %v6589_v24  ;;  %2901 = vmatpush1.msra.mxu1 %v8030_v29  ;;  %v8064_v29 = vld [vmem:[#allocation35_spill] sm:$0xff] }
 0xa58   :  { %2784 = vmatpush1.msra.mxu0 %v6593_v26  ;;  %2902 = vmatprep.subr.mxu1 %v7949_v46  ;;  %v8041_v46 = vld [vmem:[#allocation78_spill] sm:$0xff] }
 0xa59   :  { %2785 = vmatprep.subr.mxu0 %v8031_v31  ;;  %2903 = vmatpush1.msra.mxu1 %v8032_v56  ;;  %v8065_v56 = vld [vmem:[#allocation37_spill] sm:$0xff] }
 0xa5a   :  { %2786 = vmatpush1.msra.mxu0 %v8033_v62  ;;  %2904 = vmatprep.subr.mxu1 %v8034_v14  ;;  %v8066_v14 = vld [vmem:[#allocation39_spill] sm:$0xff] }
 0xa5b   :  { %2787 = vmatprep.subr.mxu0 %v8035_v8  ;;  %2905 = vmatpush1.msra.mxu1 %v8036_v19  ;;  %v8067_v19 = vld [vmem:[#allocation41_spill] sm:$0xff] }
 0xa5c   :  { %2788 = vmatpush1.msra.mxu0 %v8037_v3  ;;  %2906 = vmatprep.subr.mxu1 %v8038_v5  ;;  %v8068_v5 = vld [vmem:[#allocation43_spill] sm:$0xff] }
 0xa5d   :  { %2789 = vmatprep.subr.mxu0 %v8039_v41  ;;  %2907 = vmatpush1.msra.mxu1 %v8040_v50  ;;  %v8069_v50 = vld [vmem:[#allocation45_spill] sm:$0xff] }
 0xa5e   :  { %2790 = vmatpush1.msra.mxu0 %v8041_v46  ;;  %2908 = vmatprep.subr.mxu1 %v8042_v47  ;;  %v8070_v47 = vld [vmem:[#allocation47_spill] sm:$0xff] }
 0xa5f   :  { %2824 = vmatmul.mubr.f32.vlgmr.msra.gmra.mxu0 %v6684_v35  ;;  %2949 = vmatprep.subr.mxu0 %v6752_v60 }
 0xa60   :  { %2950 = vmatpush1.msra.mxu0 %v6755_v57  ;;  %2909 = vmatpush1.msra.mxu1 %v8045_v59  ;;  %v8071_v59 = vld [vmem:[#allocation49_spill] sm:$0xff] }
 0xa61   :  { %2951 = vmatprep.subr.mxu0 %v6759_v9  ;;  %2942 = vmatprep.mubr.f32.mxu1 %v7971_v44 }
 0xa62   :  { %2952 = vmatpush1.msra.mxu0 %v6763_v16  ;;  %3013 = vmatprep.mubr.f32.mxu0 %v7971_v44 }
 0xa63   :  { %2953 = vmatprep.subr.mxu0 %v6767_v33  ;;  %3020 = vmatprep.subr.mxu1 %v8049_v53 }
 0xa64   :  { %2954 = vmatpush1.msra.mxu0 %v6771_v40 }
 0xa65   :  { %2955 = vmatprep.subr.mxu0 %v6774_v49  ;;  %v8081_v49 = vld [vmem:[#allocation13_spill] sm:$0xff] }
 0xa66   :  { %2956 = vmatpush1.msra.mxu0 %v6777_v39 }
 0xa67   :  { %2957 = vmatprep.subr.mxu0 %v6780_v52 }
 0xa68   :  { %2958 = vmatpush1.msra.mxu0 %v8054_v36  ;;  %v8072_v36 = vld [vmem:[#allocation51_spill] sm:$0xff] }
 0xa69   :  { %2959 = vmatprep.subr.mxu0 %v8055_v58  ;;  %v8073_v58 = vld [vmem:[#allocation53_spill] sm:$0xff] }
 0xa6a   :  { %2960 = vmatpush1.msra.mxu0 %v8056_v17  ;;  %v8074_v17 = vld [vmem:[#allocation55_spill] sm:$0xff] }
 0xa6b   :  { %2961 = vmatprep.subr.mxu0 %v8057_v20  ;;  %v8075_v20 = vld [vmem:[#allocation57_spill] sm:$0xff] }
 0xa6c   :  { %2962 = vmatpush1.msra.mxu0 %v8058_v34  ;;  %v8076_v34 = vld [vmem:[#allocation59_spill] sm:$0xff] }
 0xa6d   :  { %2963 = vmatprep.subr.mxu0 %v8059_v55  ;;  %v6806_v55 = vld [vmem:[#allocation7 + $0x2d8] sm:$0xff] }
 0xa6e   :  { %2964 = vmatpush1.msra.mxu0 %v8060_v13  ;;  %8077 = vst [vmem:[#allocation30_spill] sm:$0xff] %v6806_v55 }
 0xa6f   :  { %2965 = vmatprep.subr.mxu0 %v8061_v12  ;;  %v2839_v12 = vstv %s2838_s8 }
 0xa70   :  { %2966 = vmatpush1.msra.mxu0 %v8062_v61  ;;  %v8078_v61 = vld [vmem:[#allocation44_spill] sm:$0xff] }
 0xa71   :  { %2967 = vmatprep.subr.mxu0 %v8063_v1  ;;  %v2840_v1 = vmul.f32 %v2839_v12, %v8078_v61 }
 0xa72   :  { %2968 = vmatpush1.msra.mxu0 %v8064_v29 }
 0xa73   :  { %2969 = vmatprep.subr.mxu0 %v8065_v56  ;;  %v2834_v56 = vstv %s4324_s11 }
 0xa74   :  { %2970 = vmatpush1.msra.mxu0 %v8066_v14  ;;  %v8079_v14 = vld [vmem:[#allocation24_spill] sm:$0xff] }
 0xa75   :  { %2971 = vmatprep.subr.mxu0 %v8067_v19 }
 0xa76   :  { %2972 = vmatpush1.msra.mxu0 %v8068_v5 }
 0xa77   :  { %2973 = vmatprep.subr.mxu0 %v8069_v50  ;;  %v2846_v50 = vrot.slane %v2840_v1, 2 }
 0xa78   :  { %2974 = vmatpush1.msra.mxu0 %v8070_v47 }
 0xa79   :  { %2975 = vmatprep.subr.mxu0 %v8071_v59 }
 0xa7a   :  { %2976 = vmatpush1.msra.mxu0 %v8072_v36 }
 0xa7b   :  { %2977 = vmatprep.subr.mxu0 %v8073_v58 }
 0xa7c   :  { %2978 = vmatpush1.msra.mxu0 %v8074_v17 }
 0xa7d   :  { %2979 = vmatprep.subr.mxu0 %v8075_v20 }
 0xa7e   :  { %2980 = vmatpush1.msra.mxu0 %v8076_v34 }
 0xa7f   :  { %3139 = vmatprep.subr.mxu0 %v6806_v55  ;;  %v8080_v55 = vld [vmem:[#allocation61_spill] sm:$0xff] }
 0xa80   :  { %v2841_v52 = vmul.f32 %v2839_v12, %v8080_v55 }
 0xa82   :  { %v2847_v33 = vrot.slane %v2841_v52, 2 }
 0xaff   :  { %v2754_v13 = vpop.f32.mrf.mxu1  ;;  %v2683_v59 = vpop.f32.mrf.mxu0 }
 0xb01   :  { %v2756_v29 = vpop.f32.mrf.mxu1  ;;  %v2685_v34 = vpop.f32.mrf.mxu0 }
 0xb02   :  { %v2831_v19 = vadd.f32 %v2756_v29, %v8079_v14 }
 0xb04   :  { %v2835_v5 = vmul.f32 %v2834_v56, %v2831_v19  ;;  %v2842_v19 = vmul.f32 %v2839_v12, %v8018_v27 }
 0xb06   :  { %v2852_v47 = vadd.f32 %v2846_v50, %v2835_v5 }
 0xb08   :  { %v2855_v36 = vadd.f32 %v2852_v47, %v2683_v59  ;;  %v2869_v47 = vadd.f32 %v6493_v7, %v2754_v13  ;;  %v6837_v13 = vld [vmem:[#allocation7 + $0x278] sm:$0xff] }
 0xb0a   :  { %v4325_v58 = vmul.f32 -1.442695, %v2855_v36  ;;  %v2848_v36 = vrot.slane %v2842_v19, 2  ;;  %v6857_v19 = vld [vmem:[#allocation7 + $0x210] sm:$0xff] }
 0xb0c   :  { %4947 = vpow2.f32 %v4325_v58 }
 0xb19   :  { %v4948_v17 = vpop.eup %4947 }
 0xb1a   :  { %v2859_v20 = vadd.f32 1.0, %v4948_v17 }
 0xb1c   :  { %4949 = vrcp.f32 %v2859_v20 }
 0xb1f   :  { %v2825_v39 = vpop.f32.mrf.mxu0 }
 0xb20   :  { %v2832_v61 = vadd.f32 %v2825_v39, %v8081_v49 }
 0xb21   :  { %v2827_v40 = vpop.f32.mrf.mxu0 }
 0xb22   :  { %v2836_v53 = vmul.f32 %v2834_v56, %v2832_v61  ;;  %v2833_v29 = vadd.f32 %v2827_v40, %v6676_v32 }
 0xb24   :  { %v2853_v1 = vadd.f32 %v2847_v33, %v2836_v53  ;;  %v2837_v50 = vmul.f32 %v2834_v56, %v2833_v29  ;;  %v6841_v56 = vld [vmem:[#allocation7 + $0x270] sm:$0xff]  ;;  %v6849_v29 = vld [vmem:[#allocation7 + $0x240] sm:$0xff] }
 0xb26   :  { %v2862_v5 = vadd.f32 %v2853_v1, %v2685_v34  ;;  %v2854_v17 = vadd.f32 %v2848_v36, %v2837_v50  ;;  %v6845_v34 = vld [vmem:[#allocation7 + $0x248] sm:$0xff]  ;;  %v6853_v1 = vld [vmem:[#allocation7 + $0x218] sm:$0xff]  ;;  %v6865_v50 = vld [vmem:[#allocation7 + $0x1e0] sm:$0xff] }
 0xb27   :  { %v6877_v36 = vld [vmem:[#allocation7 + $0x188] sm:$0xff] }
 0xb28   :  { %v4326_v59 = vmul.f32 -1.442695, %v2862_v5  ;;  %v6861_v5 = vld [vmem:[#allocation7 + $0x1e8] sm:$0xff] }
 0xb29   :  { %v4950_v58 = vpop.eup %4949 }
 0xb2a   :  { %4951 = vpow2.f32 %v4326_v59  ;;  %v2870_v20 = vmul.f32 %v4950_v58, %v2869_v47  ;;  %v6869_v47 = vld [vmem:[#allocation7 + $0x1b8] sm:$0xff]  ;;  %v6873_v59 = vld [vmem:[#allocation7 + $0x1b0] sm:$0xff]  ;;  %v6881_v58 = vld [vmem:[#allocation7 + $0x180] sm:$0xff] }
 0xb2c   :  { %v2871_v55 = vadd.f32 %v2870_v20, %v2854_v17  ;;  %v6885_v17 = vld [vmem:[#allocation7 + $0x158] sm:$0xff]  ;;  %v6889_v20 = vld [vmem:[#allocation7 + $0x150] sm:$0xff] }
 0xb37   :  { %v4952_v39 = vpop.eup %4951 }
 0xb38   :  { %v2866_v49 = vadd.f32 1.0, %v4952_v39  ;;  %v6893_v39 = vld [vmem:[#allocation7 + $0x128] sm:$0xff] }
 0xb39   :  { %8082 = vst [vmem:[#allocation32_spill] sm:$0xff] %v6893_v39 }
 0xb3a   :  { %4953 = vrcp.f32 %v2866_v49  ;;  %v6825_v49 = vld [vmem:[#allocation7 + $0x2d0] sm:$0xff] }
 0xb3b   :  { %4955 = vtanh.f32 %v2871_v55  ;;  %v6833_v55 = vld [vmem:[#allocation7 + $0x2a0] sm:$0xff] }
 0xb47   :  { %v4954_v52 = vpop.eup %4953 }
 0xb48   :  { %v2873_v40 = vsub.f32 1.0, %v4954_v52  ;;  %v4956_v33 = vpop.eup %4955  ;;  %v2875_v12 = vmul.f32 %v4954_v52, %v6684_v35  ;;  %v6829_v35 = vld [vmem:[#allocation7 + $0x2a8] sm:$0xff]  ;;  %v6897_v52 = vld [vmem:[#allocation7 + $0x120] sm:$0xff] }
 0xb49   :  { %8083 = vst [vmem:[#allocation34_spill] sm:$0xff] %v6897_v52 }
 0xb4a   :  { %v2874_v53 = vmul.f32 %v4956_v33, %v2873_v40  ;;  %v6901_v40 = vld [vmem:[#allocation7 + $0xf8] sm:$0xff]  ;;  %v6905_v33 = vld [vmem:[#allocation7 + $0xf0] sm:$0xff] }
 0xb4b   :  { %8084 = vst [vmem:[#allocation36_spill] sm:$0xff] %v6901_v40  ;;  %8085 = vst [vmem:[#allocation38_spill] sm:$0xff] %v6905_v33 }
 0xb4c   :  { %v6817_v61 = vadd.f32 %v2875_v12, %v2874_v53  ;;  %v6909_v53 = vld [vmem:[#allocation7 + $0xc8] sm:$0xff]  ;;  %v6913_v12 = vld [vmem:[#allocation7 + $0xc0] sm:$0xff] }
 0xb4d   :  { %8086 = vst [vmem:[#allocation40_spill] sm:$0xff] %v6909_v53  ;;  %8087 = vst [vmem:[#allocation42_spill] sm:$0xff] %v6913_v12 }
 0xb4e   :  { %2877 = vst [vmem:[#allocation2 + $0x4] sm:$0x3] %v6817_v61  ;;  %2943 = vmatmul.mubr.f32.vlgmr.msra.gmra.mxu1 %v6817_v61  ;;  %3014 = vmatmul.mubr.f32.vlgmr.msra.gmra.mxu0 %v6817_v61 }
 0xb4f   :  { %3021 = vmatpush1.msra.mxu1 %v6499_v18  ;;  %3084 = vmatprep.mubr.f32.mxu1 %v7971_v44 }
 0xb50   :  { %3022 = vmatprep.subr.mxu1 %v6501_v48  ;;  %3140 = vmatpush1.msra.mxu0 %v6825_v49 }
 0xb51   :  { %3023 = vmatpush1.msra.mxu1 %v6506_v15  ;;  %3141 = vmatprep.subr.mxu0 %v6829_v35 }
 0xb52   :  { %3024 = vmatprep.subr.mxu1 %v6509_v37  ;;  %3142 = vmatpush1.msra.mxu0 %v6833_v55 }
 0xb53   :  { %3025 = vmatpush1.msra.mxu1 %v6513_v0  ;;  %3143 = vmatprep.subr.mxu0 %v6837_v13 }
 0xb54   :  { %3026 = vmatprep.subr.mxu1 %v6517_v4  ;;  %3144 = vmatpush1.msra.mxu0 %v6841_v56 }
 0xb55   :  { %3027 = vmatpush1.msra.mxu1 %v6521_v43  ;;  %3145 = vmatprep.subr.mxu0 %v6845_v34 }
 0xb56   :  { %3028 = vmatprep.subr.mxu1 %v6525_v2  ;;  %3146 = vmatpush1.msra.mxu0 %v6849_v29 }
 0xb57   :  { %3029 = vmatpush1.msra.mxu1 %v6529_v45  ;;  %3147 = vmatprep.subr.mxu0 %v6853_v1 }
 0xb58   :  { %3030 = vmatprep.subr.mxu1 %v6533_v30  ;;  %3148 = vmatpush1.msra.mxu0 %v6857_v19 }
 0xb59   :  { %3031 = vmatpush1.msra.mxu1 %v6537_v28  ;;  %3149 = vmatprep.subr.mxu0 %v6861_v5 }
 0xb5a   :  { %3032 = vmatprep.subr.mxu1 %v6541_v51  ;;  %3150 = vmatpush1.msra.mxu0 %v6865_v50 }
 0xb5b   :  { %3033 = vmatpush1.msra.mxu1 %v6545_v42  ;;  %3151 = vmatprep.subr.mxu0 %v6869_v47 }
 0xb5c   :  { %3034 = vmatprep.subr.mxu1 %v6549_v25  ;;  %3152 = vmatpush1.msra.mxu0 %v6873_v59 }
 0xb5d   :  { %3035 = vmatpush1.msra.mxu1 %v6553_v21  ;;  %3153 = vmatprep.subr.mxu0 %v6877_v36 }
 0xb5e   :  { %3036 = vmatprep.subr.mxu1 %v6557_v10  ;;  %3154 = vmatpush1.msra.mxu0 %v6881_v58 }
 0xb5f   :  { %3037 = vmatpush1.msra.mxu1 %v6561_v23  ;;  %3155 = vmatprep.subr.mxu0 %v6885_v17 }
 0xb60   :  { %3038 = vmatprep.subr.mxu1 %v6565_v38  ;;  %3156 = vmatpush1.msra.mxu0 %v6889_v20 }
 0xb61   :  { %3039 = vmatpush1.msra.mxu1 %v6569_v54  ;;  %3157 = vmatprep.subr.mxu0 %v6893_v39 }
 0xb62   :  { %3040 = vmatprep.subr.mxu1 %v6573_v63  ;;  %3158 = vmatpush1.msra.mxu0 %v6897_v52  ;;  %v8128_v52 = vld [vmem:[#allocation13_spill] sm:$0xff] }
 0xb63   :  { %3041 = vmatpush1.msra.mxu1 %v6577_v11  ;;  %3159 = vmatprep.subr.mxu0 %v6901_v40  ;;  %v6917_v40 = vld [vmem:[#allocation7 + $0x98] sm:$0xff] }
 0xb64   :  { %3042 = vmatprep.subr.mxu1 %v6581_v6  ;;  %3160 = vmatpush1.msra.mxu0 %v6905_v33  ;;  %8088 = vst [vmem:[#allocation46_spill] sm:$0xff] %v6917_v40  ;;  %v6921_v33 = vld [vmem:[#allocation7 + $0x90] sm:$0xff] }
 0xb65   :  { %3043 = vmatpush1.msra.mxu1 %v6585_v22  ;;  %3161 = vmatprep.subr.mxu0 %v6909_v53  ;;  %8089 = vst [vmem:[#allocation48_spill] sm:$0xff] %v6921_v33  ;;  %v6925_v53 = vld [vmem:[#allocation7 + $0x68] sm:$0xff] }
 0xb66   :  { %3044 = vmatprep.subr.mxu1 %v6589_v24  ;;  %3162 = vmatpush1.msra.mxu0 %v6913_v12  ;;  %8090 = vst [vmem:[#allocation50_spill] sm:$0xff] %v6925_v53  ;;  %v6929_v12 = vld [vmem:[#allocation7 + $0x60] sm:$0xff]  ;;  %v8127_v22 = vld [vmem:[#allocation61_spill] sm:$0xff] }
 0xb67   :  { %3045 = vmatpush1.msra.mxu1 %v6593_v26  ;;  %3163 = vmatprep.subr.mxu0 %v6917_v40  ;;  %8091 = vst [vmem:[#allocation52_spill] sm:$0xff] %v6929_v12  ;;  %v6933_v40 = vld [vmem:[#allocation7 + $0x38] sm:$0xff] }
 0xb68   :  { %3046 = vmatprep.subr.mxu1 %v8031_v31  ;;  %3164 = vmatpush1.msra.mxu0 %v6921_v33  ;;  %8092 = vst [vmem:[#allocation54_spill] sm:$0xff] %v6933_v40  ;;  %v6937_v33 = vld [vmem:[#allocation7 + $0x30] sm:$0xff] }
 0xb69   :  { %3047 = vmatpush1.msra.mxu1 %v8033_v62  ;;  %3165 = vmatprep.subr.mxu0 %v6925_v53  ;;  %8093 = vst [vmem:[#allocation56_spill] sm:$0xff] %v6937_v33  ;;  %v6941_v53 = vld [vmem:[#allocation7 + $0x8] sm:$0xff] }
 0xb6a   :  { %3048 = vmatprep.subr.mxu1 %v8035_v8  ;;  %3166 = vmatpush1.msra.mxu0 %v6929_v12  ;;  %8094 = vst [vmem:[#allocation58_spill] sm:$0xff] %v6941_v53 }
 0xb6b   :  { %3049 = vmatpush1.msra.mxu1 %v8037_v3  ;;  %3167 = vmatprep.subr.mxu0 %v6933_v40  ;;  %v6947_v3 = vld [vmem:[#allocation7] sm:$0xff]  ;;  %v3095_v40 = vstv %s4327_s16 }
 0xb6c   :  { %3050 = vmatprep.subr.mxu1 %v8039_v41  ;;  %3168 = vmatpush1.msra.mxu0 %v6937_v33  ;;  %8095 = vst [vmem:[#allocation25_spill] sm:$0xff] %v6947_v3  ;;  %v8098_v33 = vld [vmem:[#allocation16_spill] sm:$0xff] }
 0xb6d   :  { %3051 = vmatpush1.msra.mxu1 %v8041_v46  ;;  %3169 = vmatprep.subr.mxu0 %v6941_v53  ;;  %v8096_v46 = vld [vmem:[#allocation15_spill] sm:$0xff]  ;;  %v8097_v53 = vld [vmem:[#allocation65_spill] sm:$0xff]  ;;  %v8101_v41 = vld [vmem:[#allocation28_spill] sm:$0xff] }
 0xb6e   :  { %3085 = vmatmul.mubr.f32.vlgmr.msra.gmra.mxu1 %v6817_v61  ;;  %3210 = vmatprep.subr.mxu1 %v6752_v60  ;;  %v8099_v60 = vld [vmem:[#allocation19_spill] sm:$0xff] }
 0xb6f   :  { %3211 = vmatpush1.msra.mxu1 %v6755_v57  ;;  %3170 = vmatpush1.msra.mxu0 %v6947_v3  ;;  %v8100_v57 = vld [vmem:[#allocation26_spill] sm:$0xff]  ;;  %v6960_v3 = vld [vmem:[#allocation7 + $0x220] sm:$0xff] }
 0xb70   :  { %3212 = vmatprep.subr.mxu1 %v6759_v9  ;;  %3203 = vmatprep.mubr.f32.mxu0 %v7971_v44  ;;  %8102 = vst [vmem:[#allocation22_spill] sm:$0xff] %v6960_v3  ;;  %v6963_v9 = vld [vmem:[#allocation7 + $0x1f8] sm:$0xff] }
 0xb71   :  { %3213 = vmatpush1.msra.mxu1 %v6763_v16  ;;  %3274 = vmatprep.mubr.f32.mxu1 %v7971_v44  ;;  %8103 = vst [vmem:[#allocation14_spill] sm:$0xff] %v6963_v9  ;;  %v6966_v16 = vld [vmem:[#allocation7 + $0x1f0] sm:$0xff] }
 0xb72   :  { %3214 = vmatprep.subr.mxu1 %v8096_v46  ;;  %3281 = vmatprep.subr.mxu0 %v8097_v53  ;;  %8104 = vst [vmem:[#allocation18_spill] sm:$0xff] %v6966_v16  ;;  %v6969_v53 = vld [vmem:[#allocation7 + $0x1c8] sm:$0xff] }
 0xb73   :  { %3215 = vmatpush1.msra.mxu1 %v8098_v33  ;;  %8105 = vst [vmem:[#allocation17_spill] sm:$0xff] %v6969_v53  ;;  %v8126_v33 = vld [vmem:[#allocation44_spill] sm:$0xff] }
 0xb74   :  { %3216 = vmatprep.subr.mxu1 %v8099_v60  ;;  %v6972_v60 = vld [vmem:[#allocation7 + $0x1c0] sm:$0xff] }
 0xb75   :  { %3217 = vmatpush1.msra.mxu1 %v8100_v57  ;;  %8106 = vst [vmem:[#allocation12_spill] sm:$0xff] %v6972_v60  ;;  %v3100_v57 = vstv %s3099_s3 }
 0xb76   :  { %3218 = vmatprep.subr.mxu1 %v8101_v41  ;;  %v6975_v41 = vld [vmem:[#allocation7 + $0x198] sm:$0xff]  ;;  %v3102_v6 = vmul.f32 %v3100_v57, %v8127_v22 }
 0xb77   :  { %3219 = vmatpush1.msra.mxu1 %v6960_v3  ;;  %8107 = vst [vmem:[#allocation27_spill] sm:$0xff] %v6975_v41  ;;  %v6978_v3 = vld [vmem:[#allocation7 + $0x190] sm:$0xff] }
 0xb78   :  { %3220 = vmatprep.subr.mxu1 %v6963_v9  ;;  %8108 = vst [vmem:[#allocation29_spill] sm:$0xff] %v6978_v3  ;;  %v6981_v9 = vld [vmem:[#allocation7 + $0x168] sm:$0xff]  ;;  %v3108_v54 = vrot.slane %v3102_v6, 4 }
 0xb79   :  { %3221 = vmatpush1.msra.mxu1 %v6966_v16  ;;  %8109 = vst [vmem:[#allocation31_spill] sm:$0xff] %v6981_v9  ;;  %v6984_v16 = vld [vmem:[#allocation7 + $0x160] sm:$0xff] }
 0xb7a   :  { %3222 = vmatprep.subr.mxu1 %v6969_v53  ;;  %8110 = vst [vmem:[#allocation33_spill] sm:$0xff] %v6984_v16  ;;  %v6987_v53 = vld [vmem:[#allocation7 + $0x138] sm:$0xff] }
 0xb7b   :  { %3223 = vmatpush1.msra.mxu1 %v6972_v60  ;;  %8111 = vst [vmem:[#allocation35_spill] sm:$0xff] %v6987_v53  ;;  %v6990_v60 = vld [vmem:[#allocation7 + $0x130] sm:$0xff] }
 0xb7c   :  { %3224 = vmatprep.subr.mxu1 %v6975_v41  ;;  %8112 = vst [vmem:[#allocation37_spill] sm:$0xff] %v6990_v60  ;;  %v6993_v41 = vld [vmem:[#allocation7 + $0x108] sm:$0xff] }
 0xb7d   :  { %3225 = vmatpush1.msra.mxu1 %v6978_v3  ;;  %8113 = vst [vmem:[#allocation39_spill] sm:$0xff] %v6993_v41  ;;  %v6996_v3 = vld [vmem:[#allocation7 + $0x100] sm:$0xff] }
 0xb7e   :  { %3226 = vmatprep.subr.mxu1 %v6981_v9  ;;  %8114 = vst [vmem:[#allocation41_spill] sm:$0xff] %v6996_v3  ;;  %v6999_v9 = vld [vmem:[#allocation7 + $0xd8] sm:$0xff] }
 0xb7f   :  { %3227 = vmatpush1.msra.mxu1 %v6984_v16  ;;  %8115 = vst [vmem:[#allocation43_spill] sm:$0xff] %v6999_v9  ;;  %v7002_v16 = vld [vmem:[#allocation7 + $0xd0] sm:$0xff] }
 0xb80   :  { %3228 = vmatprep.subr.mxu1 %v6987_v53  ;;  %8116 = vst [vmem:[#allocation45_spill] sm:$0xff] %v7002_v16  ;;  %v7005_v53 = vld [vmem:[#allocation7 + $0xa8] sm:$0xff] }
 0xb81   :  { %3229 = vmatpush1.msra.mxu1 %v6990_v60  ;;  %8117 = vst [vmem:[#allocation47_spill] sm:$0xff] %v7005_v53  ;;  %v7008_v60 = vld [vmem:[#allocation7 + $0xa0] sm:$0xff] }
 0xb82   :  { %3230 = vmatprep.subr.mxu1 %v6993_v41  ;;  %8118 = vst [vmem:[#allocation49_spill] sm:$0xff] %v7008_v60  ;;  %v7011_v41 = vld [vmem:[#allocation7 + $0x78] sm:$0xff] }
 0xb83   :  { %3231 = vmatpush1.msra.mxu1 %v6996_v3  ;;  %8119 = vst [vmem:[#allocation51_spill] sm:$0xff] %v7011_v41  ;;  %v7014_v3 = vld [vmem:[#allocation7 + $0x70] sm:$0xff] }
 0xb84   :  { %3232 = vmatprep.subr.mxu1 %v6999_v9  ;;  %8120 = vst [vmem:[#allocation53_spill] sm:$0xff] %v7014_v3  ;;  %v7017_v9 = vld [vmem:[#allocation7 + $0x48] sm:$0xff] }
 0xb85   :  { %3233 = vmatpush1.msra.mxu1 %v7002_v16  ;;  %8121 = vst [vmem:[#allocation55_spill] sm:$0xff] %v7017_v9  ;;  %v7020_v16 = vld [vmem:[#allocation7 + $0x40] sm:$0xff] }
 0xb86   :  { %3234 = vmatprep.subr.mxu1 %v7005_v53  ;;  %8122 = vst [vmem:[#allocation57_spill] sm:$0xff] %v7020_v16  ;;  %v7023_v53 = vld [vmem:[#allocation7 + $0x18] sm:$0xff] }
 0xb87   :  { %3235 = vmatpush1.msra.mxu1 %v7008_v60  ;;  %8123 = vst [vmem:[#allocation59_spill] sm:$0xff] %v7023_v53  ;;  %v7026_v60 = vld [vmem:[#allocation7 + $0x10] sm:$0xff] }
 0xb88   :  { %3236 = vmatprep.subr.mxu1 %v7011_v41  ;;  %8124 = vst [vmem:[#allocation65_spill] sm:$0xff] %v7026_v60  ;;  %v8125_v41 = vld [vmem:[#allocation30_spill] sm:$0xff] }
 0xb89   :  { %3237 = vmatpush1.msra.mxu1 %v7014_v3 }
 0xb8a   :  { %3238 = vmatprep.subr.mxu1 %v7017_v9  ;;  %v3101_v9 = vmul.f32 %v3100_v57, %v8126_v33 }
 0xb8b   :  { %3239 = vmatpush1.msra.mxu1 %v7020_v16 }
 0xb8c   :  { %3240 = vmatprep.subr.mxu1 %v7023_v53  ;;  %v3107_v8 = vrot.slane %v3101_v9, 4 }
 0xb8d   :  { %3241 = vmatpush1.msra.mxu1 %v7026_v60 }
 0xb8e   :  { %3400 = vmatprep.subr.mxu1 %v8125_v41 }
 0xc0e   :  { %v3015_v3 = vpop.f32.mrf.mxu0  ;;  %v2944_v53 = vpop.f32.mrf.mxu1 }
 0xc10   :  { %v3017_v46 = vpop.f32.mrf.mxu0  ;;  %v2946_v41 = vpop.f32.mrf.mxu1 }
 0xc11   :  { %v3092_v16 = vadd.f32 %v3017_v46, %v8079_v14 }
 0xc13   :  { %v3096_v12 = vmul.f32 %v3095_v40, %v3092_v16 }
 0xc15   :  { %v3113_v62 = vadd.f32 %v3107_v8, %v3096_v12  ;;  %v3103_v8 = vmul.f32 %v3100_v57, %v8018_v27 }
 0xc17   :  { %v3116_v31 = vadd.f32 %v3113_v62, %v2944_v53 }
 0xc19   :  { %v4328_v26 = vmul.f32 -1.442695, %v3116_v31 }
 0xc1b   :  { %4957 = vpow2.f32 %v4328_v26  ;;  %v3130_v26 = vadd.f32 %v6493_v7, %v3015_v3  ;;  %v8129_v7 = vld [vmem:[#allocation66_spill] sm:$0xff]  ;;  %v8149_v3 = vld [vmem:[#allocation76_spill] sm:$0xff] }
 0xc28   :  { %v4958_v60 = vpop.eup %4957 }
 0xc29   :  { %v3120_v24 = vadd.f32 1.0, %v4958_v60 }
 0xc2b   :  { %4959 = vrcp.f32 %v3120_v24  ;;  %v3109_v24 = vrot.slane %v3103_v8, 4  ;;  %v8156_v8 = vld [vmem:[#allocation23_spill] sm:$0xff] }
 0xc2e   :  { %v3086_v11 = vpop.f32.mrf.mxu1 }
 0xc2f   :  { %v3093_v33 = vadd.f32 %v3086_v11, %v8128_v52 }
 0xc30   :  { %v3088_v63 = vpop.f32.mrf.mxu1 }
 0xc31   :  { %v3097_v39 = vmul.f32 %v3095_v40, %v3093_v33  ;;  %v3094_v46 = vadd.f32 %v3088_v63, %v6676_v32  ;;  %v8153_v33 = vld [vmem:[#allocation78_spill] sm:$0xff] }
 0xc33   :  { %v3114_v9 = vadd.f32 %v3108_v54, %v3097_v39  ;;  %v3098_v31 = vmul.f32 %v3095_v40, %v3094_v46  ;;  %v8152_v40 = vld [vmem:[#allocation56_spill] sm:$0xff]  ;;  %v8154_v46 = vld [vmem:[#allocation58_spill] sm:$0xff] }
 0xc35   :  { %v3123_v62 = vadd.f32 %v3114_v9, %v2946_v41  ;;  %v3115_v12 = vadd.f32 %v3109_v24, %v3098_v31  ;;  %v8155_v9 = vld [vmem:[#allocation21_spill] sm:$0xff]  ;;  %v8158_v31 = vld [vmem:[#allocation20_spill] sm:$0xff]  ;;  %v7114_v24 = vld [vmem:[#allocation7 + $0x2f8] sm:$0xff] }
 0xc36   :  { %8161 = vst [vmem:[#allocation66_spill] sm:$0xff] %v7114_v24 }
 0xc37   :  { %v4329_v60 = vmul.f32 -1.442695, %v3123_v62  ;;  %v8157_v62 = vld [vmem:[#allocation25_spill] sm:$0xff] }
 0xc38   :  { %v4960_v16 = vpop.eup %4959 }
 0xc39   :  { %4961 = vpow2.f32 %v4329_v60  ;;  %v3131_v53 = vmul.f32 %v4960_v16, %v3130_v26  ;;  %v8159_v26 = vld [vmem:[#allocation62_spill] sm:$0xff]  ;;  %v8160_v60 = vld [vmem:[#allocation15_spill] sm:$0xff]  ;;  %v8162_v16 = vld [vmem:[#allocation16_spill] sm:$0xff] }
 0xc3b   :  { %v3132_v22 = vadd.f32 %v3131_v53, %v3115_v12  ;;  %v8163_v12 = vld [vmem:[#allocation19_spill] sm:$0xff]  ;;  %v8164_v53 = vld [vmem:[#allocation26_spill] sm:$0xff] }
 0xc46   :  { %v4962_v11 = vpop.eup %4961 }
 0xc47   :  { %v3127_v52 = vadd.f32 1.0, %v4962_v11  ;;  %v8165_v11 = vld [vmem:[#allocation28_spill] sm:$0xff] }
 0xc49   :  { %4963 = vrcp.f32 %v3127_v52  ;;  %v8151_v52 = vld [vmem:[#allocation77_spill] sm:$0xff] }
 0xc4a   :  { %4965 = vtanh.f32 %v3132_v22  ;;  %v8130_v22 = vld [vmem:[#allocation32_spill] sm:$0xff] }
 0xc56   :  { %v4964_v6 = vpop.eup %4963 }
 0xc57   :  { %v3134_v63 = vsub.f32 1.0, %v4964_v6  ;;  %v4966_v54 = vpop.eup %4965  ;;  %v3136_v41 = vmul.f32 %v4964_v6, %v6817_v61  ;;  %v8150_v61 = vld [vmem:[#allocation54_spill] sm:$0xff] }
 0xc58   :  { %v8166_v6 = vld [vmem:[#allocation22_spill] sm:$0xff] }
 0xc59   :  { %v3135_v39 = vmul.f32 %v4966_v54, %v3134_v63  ;;  %v8167_v63 = vld [vmem:[#allocation14_spill] sm:$0xff] }
 0xc5a   :  { %v8168_v54 = vld [vmem:[#allocation18_spill] sm:$0xff] }
 0xc5b   :  { %v7038_v57 = vadd.f32 %v3136_v41, %v3135_v39  ;;  %v8169_v39 = vld [vmem:[#allocation17_spill] sm:$0xff]  ;;  %v8170_v41 = vld [vmem:[#allocation12_spill] sm:$0xff] }
 0xc5d   :  { %3138 = vst [vmem:[#allocation2 + $0x6] sm:$0x3] %v7038_v57  ;;  %3204 = vmatmul.mubr.f32.vlgmr.msra.gmra.mxu0 %v7038_v57  ;;  %3275 = vmatmul.mubr.f32.vlgmr.msra.gmra.mxu1 %v7038_v57 }
 0xc5e   :  { %3282 = vmatpush1.msra.mxu0 %v6499_v18  ;;  %3345 = vmatprep.mubr.f32.mxu0 %v7971_v44  ;;  %v8131_v18 = vld [vmem:[#allocation67_spill] sm:$0xff] }
 0xc5f   :  { %3283 = vmatprep.subr.mxu0 %v6501_v48  ;;  %3401 = vmatpush1.msra.mxu1 %v6825_v49  ;;  %v8132_v48 = vld [vmem:[#allocation34_spill] sm:$0xff] }
 0xc60   :  { %3284 = vmatpush1.msra.mxu0 %v6506_v15  ;;  %3402 = vmatprep.subr.mxu1 %v6829_v35  ;;  %v8133_v15 = vld [vmem:[#allocation68_spill] sm:$0xff] }
 0xc61   :  { %3285 = vmatprep.subr.mxu0 %v6509_v37  ;;  %3403 = vmatpush1.msra.mxu1 %v6833_v55  ;;  %v8134_v37 = vld [vmem:[#allocation36_spill] sm:$0xff] }
 0xc62   :  { %3286 = vmatpush1.msra.mxu0 %v6513_v0  ;;  %3404 = vmatprep.subr.mxu1 %v6837_v13  ;;  %v8135_v0 = vld [vmem:[#allocation69_spill] sm:$0xff] }
 0xc63   :  { %3287 = vmatprep.subr.mxu0 %v6517_v4  ;;  %3405 = vmatpush1.msra.mxu1 %v6841_v56  ;;  %v8136_v4 = vld [vmem:[#allocation38_spill] sm:$0xff] }
 0xc64   :  { %3288 = vmatpush1.msra.mxu0 %v6521_v43  ;;  %3406 = vmatprep.subr.mxu1 %v6845_v34  ;;  %v8137_v43 = vld [vmem:[#allocation70_spill] sm:$0xff] }
 0xc65   :  { %3289 = vmatprep.subr.mxu0 %v6525_v2  ;;  %3407 = vmatpush1.msra.mxu1 %v6849_v29  ;;  %v8138_v2 = vld [vmem:[#allocation40_spill] sm:$0xff] }
 0xc66   :  { %3290 = vmatpush1.msra.mxu0 %v6529_v45  ;;  %3408 = vmatprep.subr.mxu1 %v6853_v1  ;;  %v8139_v45 = vld [vmem:[#allocation71_spill] sm:$0xff] }
 0xc67   :  { %3291 = vmatprep.subr.mxu0 %v6533_v30  ;;  %3409 = vmatpush1.msra.mxu1 %v6857_v19  ;;  %v8140_v30 = vld [vmem:[#allocation42_spill] sm:$0xff] }
 0xc68   :  { %3292 = vmatpush1.msra.mxu0 %v6537_v28  ;;  %3410 = vmatprep.subr.mxu1 %v6861_v5  ;;  %v8141_v28 = vld [vmem:[#allocation72_spill] sm:$0xff] }
 0xc69   :  { %3293 = vmatprep.subr.mxu0 %v6541_v51  ;;  %3411 = vmatpush1.msra.mxu1 %v6865_v50  ;;  %v8142_v51 = vld [vmem:[#allocation46_spill] sm:$0xff] }
 0xc6a   :  { %3294 = vmatpush1.msra.mxu0 %v6545_v42  ;;  %3412 = vmatprep.subr.mxu1 %v6869_v47  ;;  %v8143_v42 = vld [vmem:[#allocation73_spill] sm:$0xff] }
 0xc6b   :  { %3295 = vmatprep.subr.mxu0 %v6549_v25  ;;  %3413 = vmatpush1.msra.mxu1 %v6873_v59  ;;  %v8144_v25 = vld [vmem:[#allocation48_spill] sm:$0xff] }
 0xc6c   :  { %3296 = vmatpush1.msra.mxu0 %v6553_v21  ;;  %3414 = vmatprep.subr.mxu1 %v6877_v36  ;;  %v8145_v21 = vld [vmem:[#allocation74_spill] sm:$0xff] }
 0xc6d   :  { %3297 = vmatprep.subr.mxu0 %v6557_v10  ;;  %3415 = vmatpush1.msra.mxu1 %v6881_v58  ;;  %v8146_v10 = vld [vmem:[#allocation50_spill] sm:$0xff] }
 0xc6e   :  { %3298 = vmatpush1.msra.mxu0 %v6561_v23  ;;  %3416 = vmatprep.subr.mxu1 %v6885_v17  ;;  %v8147_v23 = vld [vmem:[#allocation75_spill] sm:$0xff] }
 0xc6f   :  { %3299 = vmatprep.subr.mxu0 %v6565_v38  ;;  %3417 = vmatpush1.msra.mxu1 %v6889_v20  ;;  %v8148_v38 = vld [vmem:[#allocation52_spill] sm:$0xff] }
 0xc70   :  { %3300 = vmatpush1.msra.mxu0 %v8129_v7  ;;  %3418 = vmatprep.subr.mxu1 %v8130_v22  ;;  %v8171_v7 = vld [vmem:[#allocation27_spill] sm:$0xff] }
 0xc71   :  { %3301 = vmatprep.subr.mxu0 %v8131_v18  ;;  %3419 = vmatpush1.msra.mxu1 %v8132_v48  ;;  %v8172_v18 = vld [vmem:[#allocation29_spill] sm:$0xff] }
 0xc72   :  { %3302 = vmatpush1.msra.mxu0 %v8133_v15  ;;  %3420 = vmatprep.subr.mxu1 %v8134_v37  ;;  %v8173_v15 = vld [vmem:[#allocation31_spill] sm:$0xff] }
 0xc73   :  { %3303 = vmatprep.subr.mxu0 %v8135_v0  ;;  %3421 = vmatpush1.msra.mxu1 %v8136_v4  ;;  %v8174_v0 = vld [vmem:[#allocation33_spill] sm:$0xff] }
 0xc74   :  { %3304 = vmatpush1.msra.mxu0 %v8137_v43  ;;  %3422 = vmatprep.subr.mxu1 %v8138_v2  ;;  %v8175_v43 = vld [vmem:[#allocation35_spill] sm:$0xff] }
 0xc75   :  { %3305 = vmatprep.subr.mxu0 %v8139_v45  ;;  %3423 = vmatpush1.msra.mxu1 %v8140_v30  ;;  %v8176_v45 = vld [vmem:[#allocation37_spill] sm:$0xff] }
 0xc76   :  { %3306 = vmatpush1.msra.mxu0 %v8141_v28  ;;  %3424 = vmatprep.subr.mxu1 %v8142_v51  ;;  %v8177_v28 = vld [vmem:[#allocation39_spill] sm:$0xff] }
 0xc77   :  { %3307 = vmatprep.subr.mxu0 %v8143_v42  ;;  %3425 = vmatpush1.msra.mxu1 %v8144_v25  ;;  %v8178_v42 = vld [vmem:[#allocation41_spill] sm:$0xff] }
 0xc78   :  { %3308 = vmatpush1.msra.mxu0 %v8145_v21  ;;  %3426 = vmatprep.subr.mxu1 %v8146_v10  ;;  %v8179_v21 = vld [vmem:[#allocation43_spill] sm:$0xff] }
 0xc79   :  { %3309 = vmatprep.subr.mxu0 %v8147_v23  ;;  %3427 = vmatpush1.msra.mxu1 %v8148_v38  ;;  %v8180_v23 = vld [vmem:[#allocation45_spill] sm:$0xff] }
 0xc7a   :  { %3310 = vmatpush1.msra.mxu0 %v8149_v3  ;;  %3428 = vmatprep.subr.mxu1 %v8150_v61  ;;  %v8181_v3 = vld [vmem:[#allocation47_spill] sm:$0xff] }
 0xc7b   :  { %3311 = vmatprep.subr.mxu0 %v8151_v52  ;;  %3429 = vmatpush1.msra.mxu1 %v8152_v40  ;;  %v8182_v52 = vld [vmem:[#allocation49_spill] sm:$0xff] }
 0xc7c   :  { %3312 = vmatpush1.msra.mxu0 %v8153_v33  ;;  %3430 = vmatprep.subr.mxu1 %v8154_v46  ;;  %v8183_v33 = vld [vmem:[#allocation51_spill] sm:$0xff] }
 0xc7d   :  { %3346 = vmatmul.mubr.f32.vlgmr.msra.gmra.mxu0 %v7038_v57  ;;  %3471 = vmatprep.subr.mxu0 %v8155_v9 }
 0xc7e   :  { %3472 = vmatpush1.msra.mxu0 %v8156_v8  ;;  %3431 = vmatpush1.msra.mxu1 %v8157_v62 }
 0xc7f   :  { %3473 = vmatprep.subr.mxu0 %v8158_v31  ;;  %3464 = vmatprep.mubr.f32.mxu1 %v7971_v44 }
 0xc80   :  { %3474 = vmatpush1.msra.mxu0 %v8159_v26  ;;  %3535 = vmatprep.mubr.f32.mxu0 %v7971_v44 }
 0xc81   :  { %3475 = vmatprep.subr.mxu0 %v8160_v60  ;;  %3542 = vmatprep.subr.mxu1 %v7114_v24 }
 0xc82   :  { %3476 = vmatpush1.msra.mxu0 %v8162_v16 }
 0xc83   :  { %3477 = vmatprep.subr.mxu0 %v8163_v12 }
 0xc84   :  { %3478 = vmatpush1.msra.mxu0 %v8164_v53  ;;  %v8192_v53 = vld [vmem:[#allocation13_spill] sm:$0xff] }
 0xc85   :  { %3479 = vmatprep.subr.mxu0 %v8165_v11 }
 0xc86   :  { %3480 = vmatpush1.msra.mxu0 %v8166_v6 }
 0xc87   :  { %3481 = vmatprep.subr.mxu0 %v8167_v63  ;;  %v8191_v63 = vld [vmem:[#allocation61_spill] sm:$0xff] }
 0xc88   :  { %3482 = vmatpush1.msra.mxu0 %v8168_v54 }
 0xc89   :  { %3483 = vmatprep.subr.mxu0 %v8169_v39 }
 0xc8a   :  { %3484 = vmatpush1.msra.mxu0 %v8170_v41 }
 0xc8b   :  { %3485 = vmatprep.subr.mxu0 %v8171_v7 }
 0xc8c   :  { %3486 = vmatpush1.msra.mxu0 %v8172_v18 }
 0xc8d   :  { %3487 = vmatprep.subr.mxu0 %v8173_v15  ;;  %v8184_v15 = vld [vmem:[#allocation53_spill] sm:$0xff] }
 0xc8e   :  { %3488 = vmatpush1.msra.mxu0 %v8174_v0  ;;  %v8185_v0 = vld [vmem:[#allocation55_spill] sm:$0xff] }
 0xc8f   :  { %3489 = vmatprep.subr.mxu0 %v8175_v43  ;;  %v8186_v43 = vld [vmem:[#allocation57_spill] sm:$0xff] }
 0xc90   :  { %3490 = vmatpush1.msra.mxu0 %v8176_v45  ;;  %v8187_v45 = vld [vmem:[#allocation59_spill] sm:$0xff] }
 0xc91   :  { %3491 = vmatprep.subr.mxu0 %v8177_v28  ;;  %v8188_v28 = vld [vmem:[#allocation65_spill] sm:$0xff] }
 0xc92   :  { %3492 = vmatpush1.msra.mxu0 %v8178_v42  ;;  %v8189_v42 = vld [vmem:[#allocation30_spill] sm:$0xff] }
 0xc93   :  { %3493 = vmatprep.subr.mxu0 %v8179_v21  ;;  %v8190_v21 = vld [vmem:[#allocation44_spill] sm:$0xff] }
 0xc94   :  { %3494 = vmatpush1.msra.mxu0 %v8180_v23 }
 0xc95   :  { %3495 = vmatprep.subr.mxu0 %v8181_v3  ;;  %v3361_v3 = vstv %s3360_s18 }
 0xc96   :  { %3496 = vmatpush1.msra.mxu0 %v8182_v52  ;;  %v3362_v52 = vmul.f32 %v3361_v3, %v8190_v21  ;;  %v3363_v6 = vmul.f32 %v3361_v3, %v8191_v63 }
 0xc97   :  { %3497 = vmatprep.subr.mxu0 %v8183_v33  ;;  %v3356_v33 = vstv %s4330_s17 }
 0xc98   :  { %3498 = vmatpush1.msra.mxu0 %v8184_v15  ;;  %v3369_v24 = vrot.slane %v3363_v6, 6 }
 0xc99   :  { %3499 = vmatprep.subr.mxu0 %v8185_v0  ;;  %v3368_v0 = vrot.slane %v3362_v52, 6 }
 0xc9a   :  { %3500 = vmatpush1.msra.mxu0 %v8186_v43 }
 0xc9b   :  { %3501 = vmatprep.subr.mxu0 %v8187_v45 }
 0xc9c   :  { %3502 = vmatpush1.msra.mxu0 %v8188_v28 }
 0xc9d   :  { %3652 = vmatprep.subr.mxu0 %v8189_v42 }
 0xd1d   :  { %v3276_v23 = vpop.f32.mrf.mxu1  ;;  %v3205_v43 = vpop.f32.mrf.mxu0 }
 0xd1f   :  { %v3278_v18 = vpop.f32.mrf.mxu1  ;;  %v3207_v42 = vpop.f32.mrf.mxu0 }
 0xd20   :  { %v3353_v15 = vadd.f32 %v3278_v18, %v8079_v14 }
 0xd22   :  { %v3357_v7 = vmul.f32 %v3356_v33, %v3353_v15 }
 0xd24   :  { %v3374_v41 = vadd.f32 %v3368_v0, %v3357_v7  ;;  %v3364_v7 = vmul.f32 %v3361_v3, %v8018_v27 }
 0xd26   :  { %v3377_v39 = vadd.f32 %v3374_v41, %v3205_v43  ;;  %v3370_v43 = vrot.slane %v3364_v7, 6  ;;  %v7183_v7 = vld [vmem:[#allocation7 + $0x268] sm:$0xff] }
 0xd28   :  { %v4331_v45 = vmul.f32 -1.442695, %v3377_v39 }
 0xd2a   :  { %4967 = vpow2.f32 %v4331_v45 }
 0xd37   :  { %v4968_v28 = vpop.eup %4967 }
 0xd38   :  { %v3381_v54 = vadd.f32 1.0, %v4968_v28 }
 0xd3a   :  { %4969 = vrcp.f32 %v3381_v54  ;;  %v7154_v54 = vld [vmem:[%s7551_s10] ss:$0 sm:$0xff]  ;;  %s4333_s10 = sld [smem:[#allocation3 + $0x4]] }
 0xd3b   :  { %v3391_v63 = vadd.f32 %v7154_v54, %v3276_v23  ;;  %v7163_v23 = vld [vmem:[#allocation7 + $0x2f0] sm:$0xff] }
 0xd3d   :  { %v3347_v11 = vpop.f32.mrf.mxu0 }
 0xd3e   :  { %v3354_v21 = vadd.f32 %v3347_v11, %v8192_v53 }
 0xd3f   :  { %v3349_v12 = vpop.f32.mrf.mxu0 }
 0xd40   :  { %v3358_v16 = vmul.f32 %v3356_v33, %v3354_v21  ;;  %v3355_v18 = vadd.f32 %v3349_v12, %v6676_v32  ;;  %v7167_v21 = vld [vmem:[#allocation7 + $0x2c8] sm:$0xff]  ;;  %s3621_s20 = ssub.f32 1.0, %s4333_s10 }
 0xd42   :  { %v3375_v15 = vadd.f32 %v3369_v24, %v3358_v16  ;;  %v3359_v39 = vmul.f32 %v3356_v33, %v3355_v18  ;;  %v7175_v18 = vld [vmem:[#allocation7 + $0x298] sm:$0xff] }
 0xd44   :  { %v3384_v41 = vadd.f32 %v3375_v15, %v3207_v42  ;;  %v3376_v45 = vadd.f32 %v3370_v43, %v3359_v39  ;;  %v7179_v15 = vld [vmem:[#allocation7 + $0x290] sm:$0xff]  ;;  %v7191_v39 = vld [vmem:[#allocation7 + $0x238] sm:$0xff]  ;;  %v7203_v43 = vld [vmem:[#allocation7 + $0x200] sm:$0xff] }
 0xd46   :  { %v4332_v0 = vmul.f32 -1.442695, %v3384_v41  ;;  %v7187_v41 = vld [vmem:[#allocation7 + $0x260] sm:$0xff] }
 0xd47   :  { %v4970_v11 = vpop.eup %4969 }
 0xd48   :  { %4971 = vpow2.f32 %v4332_v0  ;;  %v3392_v6 = vmul.f32 %v4970_v11, %v3391_v63  ;;  %v7195_v63 = vld [vmem:[#allocation7 + $0x230] sm:$0xff]  ;;  %v7199_v0 = vld [vmem:[#allocation7 + $0x208] sm:$0xff]  ;;  %v7207_v11 = vld [vmem:[#allocation7 + $0x1d8] sm:$0xff] }
 0xd4a   :  { %v3393_v28 = vadd.f32 %v3392_v6, %v3376_v45  ;;  %v7211_v45 = vld [vmem:[#allocation7 + $0x1d0] sm:$0xff]  ;;  %v7215_v6 = vld [vmem:[#allocation7 + $0x1a8] sm:$0xff] }
 0xd55   :  { %v4972_v12 = vpop.eup %4971 }
 0xd56   :  { %v3388_v24 = vadd.f32 1.0, %v4972_v12  ;;  %v7223_v12 = vld [vmem:[#allocation7 + $0x178] sm:$0xff] }
 0xd58   :  { %4973 = vrcp.f32 %v3388_v24  ;;  %v7227_v24 = vld [vmem:[#allocation7 + $0x170] sm:$0xff] }
 0xd59   :  { %4975 = vtanh.f32 %v3393_v28  ;;  %v7219_v28 = vld [vmem:[#allocation7 + $0x1a0] sm:$0xff] }
 0xd65   :  { %v4974_v27 = vpop.eup %4973 }
 0xd66   :  { %v3395_v16 = vsub.f32 1.0, %v4974_v27  ;;  %v4976_v42 = vpop.eup %4975  ;;  %v3397_v52 = vmul.f32 %v4974_v27, %v7038_v57  ;;  %v7171_v57 = vld [vmem:[#allocation7 + $0x2c0] sm:$0xff]  ;;  %v7231_v27 = vld [vmem:[#allocation7 + $0x148] sm:$0xff] }
 0xd68   :  { %v3396_v3 = vmul.f32 %v4976_v42, %v3395_v16  ;;  %v7235_v16 = vld [vmem:[#allocation7 + $0x140] sm:$0xff]  ;;  %v7239_v42 = vld [vmem:[#allocation7 + $0x118] sm:$0xff] }
 0xd69   :  { %8193 = vst [vmem:[#allocation32_spill] sm:$0xff] %v7235_v16  ;;  %8194 = vst [vmem:[#allocation67_spill] sm:$0xff] %v7239_v42 }
 0xd6a   :  { %v7158_v33 = vadd.f32 %v3397_v52, %v3396_v3  ;;  %v7243_v3 = vld [vmem:[#allocation7 + $0x110] sm:$0xff]  ;;  %v7247_v52 = vld [vmem:[#allocation7 + $0xe8] sm:$0xff] }
 0xd6b   :  { %8195 = vst [vmem:[#allocation34_spill] sm:$0xff] %v7243_v3  ;;  %8196 = vst [vmem:[#allocation68_spill] sm:$0xff] %v7247_v52 }
 0xd6c   :  { %3399 = vst [vmem:[#allocation2 + $0x8] sm:$0x3] %v7158_v33  ;;  %3465 = vmatmul.mubr.f32.vlgmr.msra.gmra.mxu1 %v7158_v33  ;;  %3536 = vmatmul.mubr.f32.vlgmr.msra.gmra.mxu0 %v7158_v33 }
 0xd6d   :  { %3543 = vmatpush1.msra.mxu1 %v7163_v23  ;;  %3606 = vmatprep.mubr.f32.mxu1 %v7971_v44 }
 0xd6e   :  { %3544 = vmatprep.subr.mxu1 %v7167_v21  ;;  %3653 = vmatpush1.msra.mxu0 %v6825_v49 }
 0xd6f   :  { %3545 = vmatpush1.msra.mxu1 %v7171_v57  ;;  %3654 = vmatprep.subr.mxu0 %v6829_v35 }
 0xd70   :  { %3546 = vmatprep.subr.mxu1 %v7175_v18  ;;  %3655 = vmatpush1.msra.mxu0 %v6833_v55 }
 0xd71   :  { %3547 = vmatpush1.msra.mxu1 %v7179_v15  ;;  %3656 = vmatprep.subr.mxu0 %v6837_v13 }
 0xd72   :  { %3548 = vmatprep.subr.mxu1 %v7183_v7  ;;  %3657 = vmatpush1.msra.mxu0 %v6841_v56 }
 0xd73   :  { %3549 = vmatpush1.msra.mxu1 %v7187_v41  ;;  %3658 = vmatprep.subr.mxu0 %v6845_v34 }
 0xd74   :  { %3550 = vmatprep.subr.mxu1 %v7191_v39  ;;  %3659 = vmatpush1.msra.mxu0 %v6849_v29 }
 0xd75   :  { %3551 = vmatpush1.msra.mxu1 %v7195_v63  ;;  %3660 = vmatprep.subr.mxu0 %v6853_v1 }
 0xd76   :  { %3552 = vmatprep.subr.mxu1 %v7199_v0  ;;  %3661 = vmatpush1.msra.mxu0 %v6857_v19 }
 0xd77   :  { %3553 = vmatpush1.msra.mxu1 %v7203_v43  ;;  %3662 = vmatprep.subr.mxu0 %v6861_v5 }
 0xd78   :  { %3554 = vmatprep.subr.mxu1 %v7207_v11  ;;  %3663 = vmatpush1.msra.mxu0 %v6865_v50 }
 0xd79   :  { %3555 = vmatpush1.msra.mxu1 %v7211_v45  ;;  %3664 = vmatprep.subr.mxu0 %v6869_v47 }
 0xd7a   :  { %3556 = vmatprep.subr.mxu1 %v7215_v6  ;;  %3665 = vmatpush1.msra.mxu0 %v6873_v59 }
 0xd7b   :  { %3557 = vmatpush1.msra.mxu1 %v7219_v28  ;;  %3666 = vmatprep.subr.mxu0 %v6877_v36 }
 0xd7c   :  { %3558 = vmatprep.subr.mxu1 %v7223_v12  ;;  %3667 = vmatpush1.msra.mxu0 %v6881_v58 }
 0xd7d   :  { %3559 = vmatpush1.msra.mxu1 %v7227_v24  ;;  %3668 = vmatprep.subr.mxu0 %v6885_v17 }
 0xd7e   :  { %3560 = vmatprep.subr.mxu1 %v7231_v27  ;;  %3669 = vmatpush1.msra.mxu0 %v6889_v20 }
 0xd7f   :  { %3561 = vmatpush1.msra.mxu1 %v7235_v16  ;;  %3670 = vmatprep.subr.mxu0 %v8130_v22  ;;  %v7251_v16 = vld [vmem:[#allocation7 + $0xe0] sm:$0xff] }
 0xd80   :  { %3562 = vmatprep.subr.mxu1 %v7239_v42  ;;  %3671 = vmatpush1.msra.mxu0 %v8132_v48  ;;  %8197 = vst [vmem:[#allocation69_spill] sm:$0xff] %v7251_v16  ;;  %v7255_v42 = vld [vmem:[#allocation7 + $0xb8] sm:$0xff] }
 0xd81   :  { %3563 = vmatpush1.msra.mxu1 %v7243_v3  ;;  %3672 = vmatprep.subr.mxu0 %v8134_v37  ;;  %8198 = vst [vmem:[#allocation70_spill] sm:$0xff] %v7255_v42  ;;  %v7259_v3 = vld [vmem:[#allocation7 + $0xb0] sm:$0xff] }
 0xd82   :  { %3564 = vmatprep.subr.mxu1 %v7247_v52  ;;  %3673 = vmatpush1.msra.mxu0 %v8136_v4  ;;  %8199 = vst [vmem:[#allocation71_spill] sm:$0xff] %v7259_v3  ;;  %v7263_v52 = vld [vmem:[#allocation7 + $0x88] sm:$0xff] }
 0xd83   :  { %3565 = vmatpush1.msra.mxu1 %v7251_v16  ;;  %3674 = vmatprep.subr.mxu0 %v8138_v2  ;;  %8200 = vst [vmem:[#allocation72_spill] sm:$0xff] %v7263_v52  ;;  %v7267_v16 = vld [vmem:[#allocation7 + $0x80] sm:$0xff] }
 0xd84   :  { %3566 = vmatprep.subr.mxu1 %v7255_v42  ;;  %3675 = vmatpush1.msra.mxu0 %v8140_v30  ;;  %8201 = vst [vmem:[#allocation73_spill] sm:$0xff] %v7267_v16  ;;  %v7271_v42 = vld [vmem:[#allocation7 + $0x58] sm:$0xff]  ;;  %v8236_v2 = vld [vmem:[#allocation64_spill] sm:$0xff] }
 0xd85   :  { %3567 = vmatpush1.msra.mxu1 %v7259_v3  ;;  %3676 = vmatprep.subr.mxu0 %v8142_v51  ;;  %8202 = vst [vmem:[#allocation74_spill] sm:$0xff] %v7271_v42  ;;  %v7275_v3 = vld [vmem:[#allocation7 + $0x50] sm:$0xff] }
 0xd86   :  { %3568 = vmatprep.subr.mxu1 %v7263_v52  ;;  %3677 = vmatpush1.msra.mxu0 %v8144_v25  ;;  %8203 = vst [vmem:[#allocation75_spill] sm:$0xff] %v7275_v3  ;;  %v7279_v52 = vld [vmem:[#allocation7 + $0x28] sm:$0xff] }
 0xd87   :  { %3569 = vmatpush1.msra.mxu1 %v7267_v16  ;;  %3678 = vmatprep.subr.mxu0 %v8146_v10  ;;  %8204 = vst [vmem:[#allocation76_spill] sm:$0xff] %v7279_v52  ;;  %v7283_v16 = vld [vmem:[#allocation7 + $0x20] sm:$0xff] }
 0xd88   :  { %3570 = vmatprep.subr.mxu1 %v7271_v42  ;;  %3679 = vmatpush1.msra.mxu0 %v8148_v38  ;;  %8205 = vst [vmem:[#allocation77_spill] sm:$0xff] %v7283_v16 }
 0xd89   :  { %3571 = vmatpush1.msra.mxu1 %v7275_v3  ;;  %3680 = vmatprep.subr.mxu0 %v8150_v61  ;;  %v8215_v61 = vld [vmem:[#allocation12_spill] sm:$0xff]  ;;  %v8235_v3 = vld [vmem:[#allocation63_spill] sm:$0xff] }
 0xd8a   :  { %3572 = vmatprep.subr.mxu1 %v7279_v52  ;;  %3681 = vmatpush1.msra.mxu0 %v8152_v40  ;;  %v8208_v40 = vld [vmem:[#allocation19_spill] sm:$0xff]  ;;  %v8213_v52 = vld [vmem:[#allocation18_spill] sm:$0xff] }
 0xd8b   :  { %3573 = vmatpush1.msra.mxu1 %v7283_v16  ;;  %3682 = vmatprep.subr.mxu0 %v8154_v46  ;;  %v8206_v16 = vld [vmem:[#allocation66_spill] sm:$0xff]  ;;  %v8207_v46 = vld [vmem:[#allocation16_spill] sm:$0xff] }
 0xd8c   :  { %3607 = vmatmul.mubr.f32.vlgmr.msra.gmra.mxu1 %v7158_v33  ;;  %3723 = vmatprep.subr.mxu1 %v8155_v9  ;;  %v8209_v9 = vld [vmem:[#allocation26_spill] sm:$0xff] }
 0xd8d   :  { %3724 = vmatpush1.msra.mxu1 %v8156_v8  ;;  %3683 = vmatpush1.msra.mxu0 %v8157_v62  ;;  %v8210_v8 = vld [vmem:[#allocation28_spill] sm:$0xff]  ;;  %v8211_v62 = vld [vmem:[#allocation22_spill] sm:$0xff] }
 0xd8e   :  { %3725 = vmatprep.subr.mxu1 %v8158_v31  ;;  %3716 = vmatprep.mubr.f32.mxu0 %v7971_v44  ;;  %v8212_v31 = vld [vmem:[#allocation14_spill] sm:$0xff] }
 0xd8f   :  { %3726 = vmatpush1.msra.mxu1 %v8159_v26  ;;  %3787 = vmatprep.mubr.f32.mxu1 %v7971_v44  ;;  %v8214_v26 = vld [vmem:[#allocation17_spill] sm:$0xff] }
 0xd90   :  { %3727 = vmatprep.subr.mxu1 %v8160_v60  ;;  %3794 = vmatprep.subr.mxu0 %v8206_v16  ;;  %v8216_v60 = vld [vmem:[#allocation27_spill] sm:$0xff]  ;;  %v8217_v16 = vld [vmem:[#allocation29_spill] sm:$0xff] }
 0xd91   :  { %3728 = vmatpush1.msra.mxu1 %v8207_v46  ;;  %v8218_v46 = vld [vmem:[#allocation31_spill] sm:$0xff] }
 0xd92   :  { %3729 = vmatprep.subr.mxu1 %v8208_v40  ;;  %v8219_v40 = vld [vmem:[#allocation33_spill] sm:$0xff] }
 0xd93   :  { %3730 = vmatpush1.msra.mxu1 %v8209_v9  ;;  %v8220_v9 = vld [vmem:[#allocation35_spill] sm:$0xff] }
 0xd94   :  { %3731 = vmatprep.subr.mxu1 %v8210_v8  ;;  %v8221_v8 = vld [vmem:[#allocation37_spill] sm:$0xff] }
 0xd95   :  { %3732 = vmatpush1.msra.mxu1 %v8211_v62  ;;  %v8222_v62 = vld [vmem:[#allocation39_spill] sm:$0xff] }
 0xd96   :  { %3733 = vmatprep.subr.mxu1 %v8212_v31  ;;  %v8223_v31 = vld [vmem:[#allocation41_spill] sm:$0xff] }
 0xd97   :  { %3734 = vmatpush1.msra.mxu1 %v8213_v52  ;;  %v8224_v52 = vld [vmem:[#allocation43_spill] sm:$0xff] }
 0xd98   :  { %3735 = vmatprep.subr.mxu1 %v8214_v26  ;;  %v8225_v26 = vld [vmem:[#allocation45_spill] sm:$0xff] }
 0xd99   :  { %3736 = vmatpush1.msra.mxu1 %v8215_v61  ;;  %v8226_v61 = vld [vmem:[#allocation47_spill] sm:$0xff] }
 0xd9a   :  { %3737 = vmatprep.subr.mxu1 %v8216_v60  ;;  %v8227_v60 = vld [vmem:[#allocation49_spill] sm:$0xff] }
 0xd9b   :  { %3738 = vmatpush1.msra.mxu1 %v8217_v16  ;;  %v8228_v16 = vld [vmem:[#allocation51_spill] sm:$0xff] }
 0xd9c   :  { %3739 = vmatprep.subr.mxu1 %v8218_v46  ;;  %v8229_v46 = vld [vmem:[#allocation53_spill] sm:$0xff] }
 0xd9d   :  { %3740 = vmatpush1.msra.mxu1 %v8219_v40  ;;  %v8230_v40 = vld [vmem:[#allocation55_spill] sm:$0xff] }
 0xd9e   :  { %3741 = vmatprep.subr.mxu1 %v8220_v9  ;;  %v8231_v9 = vld [vmem:[#allocation57_spill] sm:$0xff] }
 0xd9f   :  { %3742 = vmatpush1.msra.mxu1 %v8221_v8  ;;  %v8232_v8 = vld [vmem:[#allocation59_spill] sm:$0xff] }
 0xda0   :  { %3743 = vmatprep.subr.mxu1 %v8222_v62  ;;  %v8233_v62 = vld [vmem:[#allocation65_spill] sm:$0xff] }
 0xda1   :  { %3744 = vmatpush1.msra.mxu1 %v8223_v31  ;;  %v8234_v31 = vld [vmem:[#allocation30_spill] sm:$0xff] }
 0xda2   :  { %3745 = vmatprep.subr.mxu1 %v8224_v52  ;;  %v3617_v52 = vstv %s4333_s10 }
 0xda3   :  { %3746 = vmatpush1.msra.mxu1 %v8225_v26 }
 0xda4   :  { %3747 = vmatprep.subr.mxu1 %v8226_v61 }
 0xda5   :  { %3748 = vmatpush1.msra.mxu1 %v8227_v60 }
 0xda6   :  { %3749 = vmatprep.subr.mxu1 %v8228_v16  ;;  %v3622_v16 = vstv %s3621_s20 }
 0xda7   :  { %3750 = vmatpush1.msra.mxu1 %v8229_v46  ;;  %v3623_v46 = vmul.f32 %v3622_v16, %v8235_v3  ;;  %v3624_v4 = vmul.f32 %v3622_v16, %v8236_v2 }
 0xda8   :  { %3751 = vmatprep.subr.mxu1 %v8230_v40 }
 0xda9   :  { %3752 = vmatpush1.msra.mxu1 %v8231_v9 }
 0xdaa   :  { %3753 = vmatprep.subr.mxu1 %v8232_v8 }
 0xdab   :  { %3754 = vmatpush1.msra.mxu1 %v8233_v62 }
 0xdac   :  { %3913 = vmatprep.subr.mxu1 %v8234_v31 }
 0xe2c   :  { %v3537_v26 = vpop.f32.mrf.mxu0  ;;  %v3466_v42 = vpop.f32.mrf.mxu1 }
 0xe2e   :  { %v3539_v61 = vpop.f32.mrf.mxu0  ;;  %v3468_v31 = vpop.f32.mrf.mxu1 }
 0xe2f   :  { %v3614_v60 = vadd.f32 %v3539_v61, %v8079_v14 }
 0xe31   :  { %v3618_v38 = vmul.f32 %v3617_v52, %v3614_v60 }
 0xe33   :  { %v3626_v40 = vadd.f32 %v3623_v46, %v3618_v38  ;;  %v8237_v46 = vld [vmem:[#allocation60_spill] sm:$0xff] }
 0xe35   :  { %v3629_v9 = vadd.f32 %v3626_v40, %v3466_v42  ;;  %v3625_v42 = vmul.f32 %v3622_v16, %v8237_v46  ;;  %v8261_v16 = vld [vmem:[#allocation58_spill] sm:$0xff] }
 0xe37   :  { %v4334_v10 = vmul.f32 -1.442695, %v3629_v9 }
 0xe39   :  { %4977 = vpow2.f32 %v4334_v10  ;;  %v3643_v10 = vadd.f32 %v7154_v54, %v3537_v26  ;;  %v5155_v26 = vld [vmem:[#allocation7 + $0x2e0] sm:$0xff] }
 0xe46   :  { %v4978_v8 = vpop.eup %4977 }
 0xe47   :  { %v3633_v62 = vadd.f32 1.0, %v4978_v8 }
 0xe49   :  { %4979 = vrcp.f32 %v3633_v62 }
 0xe4c   :  { %v3608_v25 = vpop.f32.mrf.mxu1 }
 0xe4d   :  { %v3615_v51 = vadd.f32 %v3608_v25, %v8192_v53 }
 0xe4e   :  { %v3610_v30 = vpop.f32.mrf.mxu1 }
 0xe4f   :  { %v3619_v61 = vmul.f32 %v3617_v52, %v3615_v51  ;;  %v3616_v14 = vadd.f32 %v3610_v30, %v6676_v32 }
 0xe51   :  { %v3627_v3 = vadd.f32 %v3624_v4, %v3619_v61  ;;  %v3620_v38 = vmul.f32 %v3617_v52, %v3616_v14  ;;  %v5154_v52 = vld [vmem:[#allocation7 + $0x2e8] sm:$0xff]  ;;  %v5156_v61 = vld [vmem:[#allocation7 + $0x2b8] sm:$0xff] }
 0xe53   :  { %v3636_v60 = vadd.f32 %v3627_v3, %v3468_v31  ;;  %v3628_v62 = vadd.f32 %v3625_v42, %v3620_v38  ;;  %v8262_v31 = vld [vmem:[#allocation25_spill] sm:$0xff]  ;;  %v8263_v42 = vld [vmem:[#allocation66_spill] sm:$0xff] }
 0xe54   :  { %v5158_v38 = vld [vmem:[#allocation7 + $0x288] sm:$0xff] }
 0xe55   :  { %v4335_v40 = vmul.f32 -1.442695, %v3636_v60  ;;  %v5157_v60 = vld [vmem:[#allocation7 + $0x2b0] sm:$0xff] }
 0xe56   :  { %v4980_v9 = vpop.eup %4979 }
 0xe57   :  { %4981 = vpow2.f32 %v4335_v40  ;;  %v3644_v8 = vmul.f32 %v4980_v9, %v3643_v10  ;;  %v5159_v10 = vld [vmem:[#allocation7 + $0x280] sm:$0xff]  ;;  %v5160_v40 = vld [vmem:[#allocation7 + $0x258] sm:$0xff]  ;;  %v5161_v9 = vld [vmem:[#allocation7 + $0x250] sm:$0xff] }
 0xe59   :  { %v3645_v37 = vadd.f32 %v3644_v8, %v3628_v62  ;;  %v5162_v62 = vld [vmem:[#allocation7 + $0x228] sm:$0xff]  ;;  %v8264_v8 = vld [vmem:[#allocation22_spill] sm:$0xff] }
 0xe64   :  { %v4982_v25 = vpop.eup %4981 }
 0xe65   :  { %v3640_v53 = vadd.f32 1.0, %v4982_v25  ;;  %v8265_v25 = vld [vmem:[#allocation14_spill] sm:$0xff] }
 0xe67   :  { %4983 = vrcp.f32 %v3640_v53  ;;  %v8259_v53 = vld [vmem:[#allocation56_spill] sm:$0xff] }
 0xe68   :  { %4985 = vtanh.f32 %v3645_v37  ;;  %v8257_v37 = vld [vmem:[#allocation54_spill] sm:$0xff] }
 0xe74   :  { %v4984_v51 = vpop.eup %4983 }
 0xe75   :  { %v3647_v2 = vsub.f32 1.0, %v4984_v51  ;;  %v4986_v30 = vpop.eup %4985  ;;  %v3649_v14 = vmul.f32 %v4984_v51, %v7158_v33  ;;  %v8260_v33 = vld [vmem:[#allocation77_spill] sm:$0xff]  ;;  %v8266_v51 = vld [vmem:[#allocation18_spill] sm:$0xff] }
 0xe77   :  { %v3648_v4 = vmul.f32 %v4986_v30, %v3647_v2  ;;  %v8258_v2 = vld [vmem:[#allocation76_spill] sm:$0xff]  ;;  %v8267_v30 = vld [vmem:[#allocation17_spill] sm:$0xff] }
 0xe79   :  { %v7333_v3 = vadd.f32 %v3649_v14, %v3648_v4  ;;  %v8268_v4 = vld [vmem:[#allocation12_spill] sm:$0xff]  ;;  %v8269_v14 = vld [vmem:[#allocation27_spill] sm:$0xff] }
 0xe7b   :  { %3651 = vst [vmem:[#allocation2 + $0xa] sm:$0x3] %v7333_v3  ;;  %3717 = vmatmul.mubr.f32.vlgmr.msra.gmra.mxu0 %v7333_v3  ;;  %3788 = vmatmul.mubr.f32.vlgmr.msra.gmra.mxu1 %v7333_v3 }
 0xe7c   :  { %3795 = vmatpush1.msra.mxu0 %v7163_v23  ;;  %3858 = vmatprep.mubr.f32.mxu0 %v7971_v44 }
 0xe7d   :  { %3796 = vmatprep.subr.mxu0 %v7167_v21  ;;  %3914 = vmatpush1.msra.mxu1 %v6825_v49  ;;  %v8238_v49 = vld [vmem:[#allocation32_spill] sm:$0xff] }
 0xe7e   :  { %3797 = vmatpush1.msra.mxu0 %v7171_v57  ;;  %3915 = vmatprep.subr.mxu1 %v6829_v35  ;;  %v8239_v35 = vld [vmem:[#allocation67_spill] sm:$0xff] }
 0xe7f   :  { %3798 = vmatprep.subr.mxu0 %v7175_v18  ;;  %3916 = vmatpush1.msra.mxu1 %v6833_v55  ;;  %v8240_v55 = vld [vmem:[#allocation34_spill] sm:$0xff] }
 0xe80   :  { %3799 = vmatpush1.msra.mxu0 %v7179_v15  ;;  %3917 = vmatprep.subr.mxu1 %v6837_v13  ;;  %v8241_v13 = vld [vmem:[#allocation36_spill] sm:$0xff] }
 0xe81   :  { %3800 = vmatprep.subr.mxu0 %v7183_v7  ;;  %3918 = vmatpush1.msra.mxu1 %v6841_v56  ;;  %v8242_v56 = vld [vmem:[#allocation68_spill] sm:$0xff] }
 0xe82   :  { %3801 = vmatpush1.msra.mxu0 %v7187_v41  ;;  %3919 = vmatprep.subr.mxu1 %v6845_v34  ;;  %v8243_v34 = vld [vmem:[#allocation38_spill] sm:$0xff] }
 0xe83   :  { %3802 = vmatprep.subr.mxu0 %v7191_v39  ;;  %3920 = vmatpush1.msra.mxu1 %v6849_v29  ;;  %v8244_v29 = vld [vmem:[#allocation69_spill] sm:$0xff] }
 0xe84   :  { %3803 = vmatpush1.msra.mxu0 %v7195_v63  ;;  %3921 = vmatprep.subr.mxu1 %v6853_v1  ;;  %v8245_v1 = vld [vmem:[#allocation40_spill] sm:$0xff] }
 0xe85   :  { %3804 = vmatprep.subr.mxu0 %v7199_v0  ;;  %3922 = vmatpush1.msra.mxu1 %v6857_v19  ;;  %v8246_v19 = vld [vmem:[#allocation70_spill] sm:$0xff] }
 0xe86   :  { %3805 = vmatpush1.msra.mxu0 %v7203_v43  ;;  %3923 = vmatprep.subr.mxu1 %v6861_v5  ;;  %v8247_v5 = vld [vmem:[#allocation42_spill] sm:$0xff] }
 0xe87   :  { %3806 = vmatprep.subr.mxu0 %v7207_v11  ;;  %3924 = vmatpush1.msra.mxu1 %v6865_v50  ;;  %v8248_v50 = vld [vmem:[#allocation71_spill] sm:$0xff] }
 0xe88   :  { %3807 = vmatpush1.msra.mxu0 %v7211_v45  ;;  %3925 = vmatprep.subr.mxu1 %v6869_v47  ;;  %v8249_v47 = vld [vmem:[#allocation46_spill] sm:$0xff] }
 0xe89   :  { %3808 = vmatprep.subr.mxu0 %v7215_v6  ;;  %3926 = vmatpush1.msra.mxu1 %v6873_v59  ;;  %v8250_v59 = vld [vmem:[#allocation72_spill] sm:$0xff] }
 0xe8a   :  { %3809 = vmatpush1.msra.mxu0 %v7219_v28  ;;  %3927 = vmatprep.subr.mxu1 %v6877_v36  ;;  %v8251_v36 = vld [vmem:[#allocation48_spill] sm:$0xff] }
 0xe8b   :  { %3810 = vmatprep.subr.mxu0 %v7223_v12  ;;  %3928 = vmatpush1.msra.mxu1 %v6881_v58  ;;  %v8252_v58 = vld [vmem:[#allocation73_spill] sm:$0xff] }
 0xe8c   :  { %3811 = vmatpush1.msra.mxu0 %v7227_v24  ;;  %3929 = vmatprep.subr.mxu1 %v6885_v17  ;;  %v8253_v17 = vld [vmem:[#allocation50_spill] sm:$0xff] }
 0xe8d   :  { %3812 = vmatprep.subr.mxu0 %v7231_v27  ;;  %3930 = vmatpush1.msra.mxu1 %v6889_v20  ;;  %v8254_v20 = vld [vmem:[#allocation74_spill] sm:$0xff] }
 0xe8e   :  { %3813 = vmatpush1.msra.mxu0 %v8238_v49  ;;  %3931 = vmatprep.subr.mxu1 %v8130_v22  ;;  %v8255_v22 = vld [vmem:[#allocation52_spill] sm:$0xff] }
 0xe8f   :  { %3814 = vmatprep.subr.mxu0 %v8239_v35  ;;  %3932 = vmatpush1.msra.mxu1 %v8132_v48  ;;  %v8256_v48 = vld [vmem:[#allocation75_spill] sm:$0xff] }
 0xe90   :  { %3815 = vmatpush1.msra.mxu0 %v8240_v55  ;;  %3933 = vmatprep.subr.mxu1 %v8241_v13  ;;  %v8270_v13 = vld [vmem:[#allocation29_spill] sm:$0xff] }
 0xe91   :  { %3816 = vmatprep.subr.mxu0 %v8242_v56  ;;  %3934 = vmatpush1.msra.mxu1 %v8243_v34  ;;  %v8271_v34 = vld [vmem:[#allocation31_spill] sm:$0xff] }
 0xe92   :  { %3817 = vmatpush1.msra.mxu0 %v8244_v29  ;;  %3935 = vmatprep.subr.mxu1 %v8245_v1  ;;  %v8272_v1 = vld [vmem:[#allocation33_spill] sm:$0xff] }
 0xe93   :  { %3818 = vmatprep.subr.mxu0 %v8246_v19  ;;  %3936 = vmatpush1.msra.mxu1 %v8247_v5  ;;  %v8273_v5 = vld [vmem:[#allocation35_spill] sm:$0xff] }
 0xe94   :  { %3819 = vmatpush1.msra.mxu0 %v8248_v50  ;;  %3937 = vmatprep.subr.mxu1 %v8249_v47  ;;  %v8274_v47 = vld [vmem:[#allocation37_spill] sm:$0xff] }
 0xe95   :  { %3820 = vmatprep.subr.mxu0 %v8250_v59  ;;  %3938 = vmatpush1.msra.mxu1 %v8251_v36  ;;  %v8275_v36 = vld [vmem:[#allocation39_spill] sm:$0xff] }
 0xe96   :  { %3821 = vmatpush1.msra.mxu0 %v8252_v58  ;;  %3939 = vmatprep.subr.mxu1 %v8253_v17  ;;  %v8276_v17 = vld [vmem:[#allocation41_spill] sm:$0xff] }
 0xe97   :  { %3822 = vmatprep.subr.mxu0 %v8254_v20  ;;  %3940 = vmatpush1.msra.mxu1 %v8255_v22  ;;  %v8277_v22 = vld [vmem:[#allocation43_spill] sm:$0xff] }
 0xe98   :  { %3823 = vmatpush1.msra.mxu0 %v8256_v48  ;;  %3941 = vmatprep.subr.mxu1 %v8257_v37  ;;  %v8278_v37 = vld [vmem:[#allocation45_spill] sm:$0xff] }
 0xe99   :  { %3824 = vmatprep.subr.mxu0 %v8258_v2  ;;  %3942 = vmatpush1.msra.mxu1 %v8259_v53  ;;  %v8279_v53 = vld [vmem:[#allocation47_spill] sm:$0xff] }
 0xe9a   :  { %3825 = vmatpush1.msra.mxu0 %v8260_v33  ;;  %3943 = vmatprep.subr.mxu1 %v8261_v16  ;;  %v8280_v16 = vld [vmem:[#allocation49_spill] sm:$0xff] }
 0xe9b   :  { %3859 = vmatmul.mubr.f32.vlgmr.msra.gmra.mxu0 %v7333_v3  ;;  %3984 = vmatprep.subr.mxu0 %v5154_v52  ;;  %v8281_v52 = vld [vmem:[#allocation51_spill] sm:$0xff] }
 0xe9c   :  { %3985 = vmatpush1.msra.mxu0 %v5155_v26  ;;  %3944 = vmatpush1.msra.mxu1 %v8262_v31  ;;  %v8282_v26 = vld [vmem:[#allocation53_spill] sm:$0xff]  ;;  %v8283_v31 = vld [vmem:[#allocation55_spill] sm:$0xff] }
 0xe9d   :  { %3986 = vmatprep.subr.mxu0 %v5156_v61  ;;  %3977 = vmatprep.mubr.f32.mxu1 %v7971_v44  ;;  %v8284_v61 = vld [vmem:[#allocation57_spill] sm:$0xff] }
 0xe9e   :  { %3987 = vmatpush1.msra.mxu0 %v5157_v60  ;;  %4048 = vmatprep.mubr.f32.mxu0 %v7971_v44  ;;  %v8285_v60 = vld [vmem:[#allocation59_spill] sm:$0xff] }
 0xe9f   :  { %3988 = vmatprep.subr.mxu0 %v5158_v38  ;;  %4055 = vmatprep.subr.mxu1 %v8263_v42  ;;  %v8286_v38 = vld [vmem:[#allocation65_spill] sm:$0xff]  ;;  %v3874_v42 = vstv %s3873_s21 }
 0xea0   :  { %3989 = vmatpush1.msra.mxu0 %v5159_v10 }
 0xea1   :  { %3990 = vmatprep.subr.mxu0 %v5160_v40  ;;  %v8287_v40 = vld [vmem:[#allocation63_spill] sm:$0xff] }
 0xea2   :  { %3991 = vmatpush1.msra.mxu0 %v5161_v9  ;;  %v3875_v9 = vmul.f32 %v3874_v42, %v8287_v40 }
 0xea3   :  { %3992 = vmatprep.subr.mxu0 %v5162_v62 }
 0xea4   :  { %3993 = vmatpush1.msra.mxu0 %v8264_v8  ;;  %v3869_v8 = vstv %s4336_s0 }
 0xea5   :  { %3994 = vmatprep.subr.mxu0 %v8265_v25  ;;  %v8288_v25 = vld [vmem:[#allocation24_spill] sm:$0xff] }
 0xea6   :  { %3995 = vmatpush1.msra.mxu0 %v8266_v51 }
 0xea7   :  { %3996 = vmatprep.subr.mxu0 %v8267_v30  ;;  %v3881_v30 = vrot.slane %v3875_v9, 2 }
 0xea8   :  { %3997 = vmatpush1.msra.mxu0 %v8268_v4 }
 0xea9   :  { %3998 = vmatprep.subr.mxu0 %v8269_v14 }
 0xeaa   :  { %3999 = vmatpush1.msra.mxu0 %v8270_v13 }
 0xeab   :  { %4000 = vmatprep.subr.mxu0 %v8271_v34 }
 0xeac   :  { %4001 = vmatpush1.msra.mxu0 %v8272_v1 }
 0xead   :  { %4002 = vmatprep.subr.mxu0 %v8273_v5 }
 0xeae   :  { %4003 = vmatpush1.msra.mxu0 %v8274_v47 }
 0xeaf   :  { %4004 = vmatprep.subr.mxu0 %v8275_v36 }
 0xeb0   :  { %4005 = vmatpush1.msra.mxu0 %v8276_v17  ;;  %v8289_v17 = vld [vmem:[#allocation64_spill] sm:$0xff] }
 0xeb1   :  { %4006 = vmatprep.subr.mxu0 %v8277_v22  ;;  %v3876_v22 = vmul.f32 %v3874_v42, %v8289_v17 }
 0xeb2   :  { %4007 = vmatpush1.msra.mxu0 %v8278_v37 }
 0xeb3   :  { %4008 = vmatprep.subr.mxu0 %v8279_v53  ;;  %v8290_v53 = vld [vmem:[#allocation13_spill] sm:$0xff] }
 0xeb4   :  { %4009 = vmatpush1.msra.mxu0 %v8280_v16 }
 0xeb5   :  { %4010 = vmatprep.subr.mxu0 %v8281_v52 }
 0xeb6   :  { %4011 = vmatpush1.msra.mxu0 %v8282_v26  ;;  %v3882_v26 = vrot.slane %v3876_v22, 2 }
 0xeb7   :  { %4012 = vmatprep.subr.mxu0 %v8283_v31 }
 0xeb8   :  { %4013 = vmatpush1.msra.mxu0 %v8284_v61 }
 0xeb9   :  { %4014 = vmatprep.subr.mxu0 %v8285_v60  ;;  %v3877_v60 = vmul.f32 %v3874_v42, %v8237_v46 }
 0xeba   :  { %4015 = vmatpush1.msra.mxu0 %v8286_v38 }
 0xf3b   :  { %v3789_v10 = vpop.f32.mrf.mxu1  ;;  %v3718_v13 = vpop.f32.mrf.mxu0 }
 0xf3d   :  { %v3791_v62 = vpop.f32.mrf.mxu1  ;;  %v3720_v36 = vpop.f32.mrf.mxu0 }
 0xf3e   :  { %v3866_v51 = vadd.f32 %v3791_v62, %v8288_v25 }
 0xf40   :  { %v3870_v4 = vmul.f32 %v3869_v8, %v3866_v51  ;;  %v3883_v51 = vrot.slane %v3877_v60, 2 }
 0xf42   :  { %v3887_v14 = vadd.f32 %v3881_v30, %v3870_v4  ;;  %v3904_v30 = vadd.f32 %v7154_v54, %v3789_v10  ;;  %v4174_v10 = vld [vmem:[#allocation2] sm:$0xff] }
 0xf44   :  { %v3890_v34 = vadd.f32 %v3887_v14, %v3718_v13 }
 0xf46   :  { %v4337_v1 = vmul.f32 -1.442695, %v3890_v34 }
 0xf48   :  { %4987 = vpow2.f32 %v4337_v1 }
 0xf55   :  { %v4988_v5 = vpop.eup %4987 }
 0xf56   :  { %v3894_v47 = vadd.f32 1.0, %v4988_v5 }
 0xf58   :  { %4989 = vrcp.f32 %v3894_v47 }
 0xf5b   :  { %v3860_v37 = vpop.f32.mrf.mxu0 }
 0xf5c   :  { %v3867_v16 = vadd.f32 %v3860_v37, %v8290_v53 }
 0xf5d   :  { %v3862_v52 = vpop.f32.mrf.mxu0 }
 0xf5e   :  { %v3871_v31 = vmul.f32 %v3869_v8, %v3867_v16  ;;  %v3868_v61 = vadd.f32 %v3862_v52, %v6676_v32 }
 0xf60   :  { %v3888_v38 = vadd.f32 %v3882_v26, %v3871_v31  ;;  %v3872_v62 = vmul.f32 %v3869_v8, %v3868_v61 }
 0xf62   :  { %v3897_v9 = vadd.f32 %v3888_v38, %v3720_v36  ;;  %v3889_v13 = vadd.f32 %v3883_v51, %v3872_v62 }
 0xf64   :  { %v4338_v4 = vmul.f32 -1.442695, %v3897_v9 }
 0xf65   :  { %v4990_v14 = vpop.eup %4989 }
 0xf66   :  { %4991 = vpow2.f32 %v4338_v4  ;;  %v3905_v34 = vmul.f32 %v4990_v14, %v3904_v30 }
 0xf68   :  { %v3906_v1 = vadd.f32 %v3905_v34, %v3889_v13 }
 0xf73   :  { %v4992_v5 = vpop.eup %4991 }
 0xf74   :  { %v3901_v47 = vadd.f32 1.0, %v4992_v5 }
 0xf76   :  { %4993 = vrcp.f32 %v3901_v47 }
 0xf77   :  { %4995 = vtanh.f32 %v3906_v1 }
 0xf83   :  { %v4994_v22 = vpop.eup %4993 }
 0xf84   :  { %v3908_v37 = vsub.f32 1.0, %v4994_v22  ;;  %v4996_v16 = vpop.eup %4995  ;;  %v3910_v36 = vmul.f32 %v4994_v22, %v7333_v3 }
 0xf86   :  { %v3909_v42 = vmul.f32 %v4996_v16, %v3908_v37 }
 0xf88   :  { %v7436_v8 = vadd.f32 %v3910_v36, %v3909_v42 }
 0xf8a   :  { %3912 = vst [vmem:[#allocation2 + $0xc] sm:$0x3] %v7436_v8  ;;  %3978 = vmatmul.mubr.f32.vlgmr.msra.gmra.mxu1 %v7436_v8  ;;  %4049 = vmatmul.mubr.f32.vlgmr.msra.gmra.mxu0 %v7436_v8 }
 0xf8b   :  { %4056 = vmatpush1.msra.mxu1 %v7163_v23  ;;  %4832 = vmatprep.mubr.f32.mxu0 %v4174_v10  ;;  %v4190_v23 = vld [vmem:[%s7553_s12 + $0x70] sm:$0xff] }
 0xf8c   :  { %4057 = vmatprep.subr.mxu1 %v7167_v21  ;;  %4119 = vmatprep.mubr.f32.mxu1 %v7971_v44  ;;  %v4191_v44 = vld [vmem:[%s7553_s12 + $0x78] sm:$0xff]  ;;  %v4189_v21 = vld [vmem:[%s7553_s12 + $0x68] sm:$0xff] }
 0xf8d   :  { %4058 = vmatpush1.msra.mxu1 %v7171_v57  ;;  %4800 = vmatprep.subr.mxu0 %v4191_v44  ;;  %v4188_v57 = vld [vmem:[%s7553_s12 + $0x60] sm:$0xff] }
 0xf8e   :  { %4059 = vmatprep.subr.mxu1 %v7175_v18  ;;  %4801 = vmatpush3.msra.mxu0 %v4191_v44  ;;  %v4187_v18 = vld [vmem:[%s7553_s12 + $0x58] sm:$0xff] }
 0xf8f   :  { %4060 = vmatpush1.msra.mxu1 %v7179_v15  ;;  %4802 = vmatprep.subr.mxu0 %v4190_v23  ;;  %v4186_v15 = vld [vmem:[%s7553_s12 + $0x50] sm:$0xff] }
 0xf90   :  { %4061 = vmatprep.subr.mxu1 %v7183_v7  ;;  %4803 = vmatpush3.msra.mxu0 %v4190_v23  ;;  %v4185_v7 = vld [vmem:[%s7553_s12 + $0x48] sm:$0xff] }
 0xf91   :  { %4062 = vmatpush1.msra.mxu1 %v7187_v41  ;;  %4804 = vmatprep.subr.mxu0 %v4189_v21  ;;  %v4184_v41 = vld [vmem:[%s7553_s12 + $0x40] sm:$0xff] }
 0xf92   :  { %4063 = vmatprep.subr.mxu1 %v7191_v39  ;;  %4805 = vmatpush3.msra.mxu0 %v4189_v21  ;;  %v4183_v39 = vld [vmem:[%s7553_s12 + $0x38] sm:$0xff] }
 0xf93   :  { %4064 = vmatpush1.msra.mxu1 %v7195_v63  ;;  %4806 = vmatprep.subr.mxu0 %v4188_v57  ;;  %v4182_v63 = vld [vmem:[%s7553_s12 + $0x30] sm:$0xff] }
 0xf94   :  { %4065 = vmatprep.subr.mxu1 %v7199_v0  ;;  %4807 = vmatpush3.msra.mxu0 %v4188_v57  ;;  %v4181_v0 = vld [vmem:[%s7553_s12 + $0x28] sm:$0xff] }
 0xf95   :  { %4066 = vmatpush1.msra.mxu1 %v7203_v43  ;;  %4808 = vmatprep.subr.mxu0 %v4187_v18  ;;  %v4180_v43 = vld [vmem:[%s7553_s12 + $0x20] sm:$0xff] }
 0xf96   :  { %4067 = vmatprep.subr.mxu1 %v7207_v11  ;;  %4809 = vmatpush3.msra.mxu0 %v4187_v18  ;;  %v4179_v11 = vld [vmem:[%s7553_s12 + $0x18] sm:$0xff] }
 0xf97   :  { %4068 = vmatpush1.msra.mxu1 %v7211_v45  ;;  %4810 = vmatprep.subr.mxu0 %v4186_v15  ;;  %v4178_v45 = vld [vmem:[%s7553_s12 + $0x10] sm:$0xff] }
 0xf98   :  { %4069 = vmatprep.subr.mxu1 %v7215_v6  ;;  %4811 = vmatpush3.msra.mxu0 %v4186_v15  ;;  %v4177_v6 = vld [vmem:[%s7553_s12 + $0x8] sm:$0xff] }
 0xf99   :  { %4070 = vmatpush1.msra.mxu1 %v7219_v28  ;;  %4812 = vmatprep.subr.mxu0 %v4185_v7  ;;  %v4176_v28 = vld [vmem:[%s7553_s12] sm:$0xff] }
 0xf9a   :  { %4071 = vmatprep.subr.mxu1 %v7223_v12  ;;  %4813 = vmatpush3.msra.mxu0 %v4185_v7  ;;  %v4135_v12 = vstv %s4134_s25 }
 0xf9b   :  { %4072 = vmatpush1.msra.mxu1 %v7227_v24  ;;  %4814 = vmatprep.subr.mxu0 %v4184_v41  ;;  %v4138_v61 = vmul.f32 %v4135_v12, %v8237_v46 }
 0xf9c   :  { %4073 = vmatprep.subr.mxu1 %v7231_v27  ;;  %4815 = vmatpush3.msra.mxu0 %v4184_v41  ;;  %v4136_v27 = vmul.f32 %v4135_v12, %v8287_v40 }
 0xf9d   :  { %4074 = vmatpush1.msra.mxu1 %v8238_v49  ;;  %4816 = vmatprep.subr.mxu0 %v4183_v39  ;;  %v4130_v49 = vstv %s4339_s7  ;;  %v4144_v62 = vrot.slane %v4138_v61, 4 }
 0xf9e   :  { %4075 = vmatprep.subr.mxu1 %v8239_v35  ;;  %4817 = vmatpush3.msra.mxu0 %v4183_v39 }
 0xf9f   :  { %4076 = vmatpush1.msra.mxu1 %v8240_v55  ;;  %4818 = vmatprep.subr.mxu0 %v4182_v63  ;;  %v4142_v55 = vrot.slane %v4136_v27, 4 }
 0xfa0   :  { %4077 = vmatprep.subr.mxu1 %v8242_v56  ;;  %4819 = vmatpush3.msra.mxu0 %v4182_v63 }
 0xfa1   :  { %4078 = vmatpush1.msra.mxu1 %v8244_v29  ;;  %4820 = vmatprep.subr.mxu0 %v4181_v0 }
 0xfa2   :  { %4079 = vmatprep.subr.mxu1 %v8246_v19  ;;  %4821 = vmatpush3.msra.mxu0 %v4181_v0 }
 0xfa3   :  { %4080 = vmatpush1.msra.mxu1 %v8248_v50  ;;  %4822 = vmatprep.subr.mxu0 %v4180_v43 }
 0xfa4   :  { %4081 = vmatprep.subr.mxu1 %v8250_v59  ;;  %4823 = vmatpush3.msra.mxu0 %v4180_v43 }
 0xfa5   :  { %4082 = vmatpush1.msra.mxu1 %v8252_v58  ;;  %4824 = vmatprep.subr.mxu0 %v4179_v11 }
 0xfa6   :  { %4083 = vmatprep.subr.mxu1 %v8254_v20  ;;  %4825 = vmatpush3.msra.mxu0 %v4179_v11 }
 0xfa7   :  { %4084 = vmatpush1.msra.mxu1 %v8256_v48  ;;  %4826 = vmatprep.subr.mxu0 %v4178_v45 }
 0xfa8   :  { %4085 = vmatprep.subr.mxu1 %v8258_v2  ;;  %4827 = vmatpush3.msra.mxu0 %v4178_v45  ;;  %v4137_v2 = vmul.f32 %v4135_v12, %v8289_v17 }
 0xfa9   :  { %4086 = vmatpush1.msra.mxu1 %v8260_v33  ;;  %4828 = vmatprep.subr.mxu0 %v4177_v6 }
 0xfaa   :  { %4120 = vmatmul.mubr.f32.vlgmr.msra.gmra.mxu1 %v7436_v8  ;;  %4829 = vmatpush3.msra.mxu0 %v4177_v6  ;;  %v4143_v26 = vrot.slane %v4137_v2, 4 }
 0xfab   :  { %4830 = vmatprep.subr.mxu0 %v4176_v28 }
 0xfac   :  { %4831 = vmatpush3.msra.mxu0 %v4176_v28 }
0x104a   :  { %v4050_v24 = vpop.f32.mrf.mxu0  ;;  %v3979_v19 = vpop.f32.mrf.mxu1 }
0x104b   :  { %v4165_v51 = vadd.f32 %v7154_v54, %v4050_v24  ;;  %v4342_v54 = vld [vmem:[%s7554_s13] ss:$0 sm:$0xff] }
0x104c   :  { %v4052_v3 = vpop.f32.mrf.mxu0  ;;  %v3981_v48 = vpop.f32.mrf.mxu1 }
0x104d   :  { %v4127_v35 = vadd.f32 %v4052_v3, %v8288_v25 }
0x104f   :  { %v4131_v56 = vmul.f32 %v4130_v49, %v4127_v35 }
0x1051   :  { %v4148_v29 = vadd.f32 %v4142_v55, %v4131_v56 }
0x1053   :  { %v4151_v50 = vadd.f32 %v4148_v29, %v3979_v19 }
0x1055   :  { %v4340_v59 = vmul.f32 -1.442695, %v4151_v50 }
0x1057   :  { %4997 = vpow2.f32 %v4340_v59 }
0x1064   :  { %v4998_v58 = vpop.eup %4997 }
0x1065   :  { %v4155_v20 = vadd.f32 1.0, %v4998_v58 }
0x1067   :  { %4999 = vrcp.f32 %v4155_v20 }
0x106a   :  { %v4121_v33 = vpop.f32.mrf.mxu1 }
0x106b   :  { %v4128_v40 = vadd.f32 %v4121_v33, %v8290_v53 }
0x106c   :  { %v4123_v52 = vpop.f32.mrf.mxu1 }
0x106d   :  { %v4132_v31 = vmul.f32 %v4130_v49, %v4128_v40  ;;  %v4129_v25 = vadd.f32 %v4123_v52, %v6676_v32 }
0x106f   :  { %v4149_v60 = vadd.f32 %v4143_v26, %v4132_v31  ;;  %v4133_v9 = vmul.f32 %v4130_v49, %v4129_v25 }
0x1071   :  { %v4158_v38 = vadd.f32 %v4149_v60, %v3981_v48  ;;  %v4150_v17 = vadd.f32 %v4144_v62, %v4133_v9 }
0x1073   :  { %v4341_v30 = vmul.f32 -1.442695, %v4158_v38 }
0x1074   :  { %v5000_v4 = vpop.eup %4999 }
0x1075   :  { %5001 = vpow2.f32 %v4341_v30  ;;  %v4166_v14 = vmul.f32 %v5000_v4, %v4165_v51 }
0x1077   :  { %v4167_v13 = vadd.f32 %v4166_v14, %v4150_v17 }
0x1082   :  { %v5002_v53 = vpop.eup %5001 }
0x1083   :  { %v4162_v34 = vadd.f32 1.0, %v5002_v53 }
0x1085   :  { %5003 = vrcp.f32 %v4162_v34 }
0x1086   :  { %5005 = vtanh.f32 %v4167_v13 }
0x1092   :  { %v5004_v1 = vpop.eup %5003 }
0x1093   :  { %v4169_v32 = vsub.f32 1.0, %v5004_v1  ;;  %v5006_v5 = vpop.eup %5005  ;;  %v4171_v47 = vmul.f32 %v5004_v1, %v7436_v8 }
0x1095   :  { %v4170_v46 = vmul.f32 %v5006_v5, %v4169_v32 }
0x1097   :  { %v4172_v22 = vadd.f32 %v4171_v47, %v4170_v46 }
0x1099   :  { %4173 = vst [vmem:[#allocation2 + $0xe] sm:$0x3] %v4172_v22 }
0x10a0   :  { %v4175_v37 = vld [vmem:[#allocation2 + $0x8] sm:$0xff] }
0x10a1   :  { %4833 = vmatmul.mubr.f32.vlgmr.msra.gmra.mxu0 %v4175_v37 }
0x1161   :  { %v4834_v16 = vpop.f32.mrf.mxu0 }
0x1162   :  { %v4271_v42 = vadd.f32 %v4834_v16, %v4342_v54 }
0x1163   :  { %v4265_v36 = vpop.f32.mrf.mxu0 }
0x1164   :  { %4275 = vst.msk [vmem:[%s7555_s14 + $0x8] sm:$0xff] %vm300_vm0, %v4271_v42  ;;  %v4266_v10 = vadd.f32 %v4342_v54, %v4265_v36 }
0x1166   :  { %4274 = vst.msk [vmem:[%s7555_s14] sm:$0xff] %vm300_vm0, %v4266_v10 }
0x1167   :  { %4280 = vsyncpa [#allocation4], 1 }
0x1168   :  { %4281 = vsyncpa [#allocation8], 1 }
0x1169   :  { %4282 = vsyncpa [#allocation5], 1 }

</bundles_post_ra>
